<compile_context>
chip_gen: v7x
topology: tpu7x:2x2x1
jax: 0.10.0
libtpu: 0.0.40
codegen_flags: <defaults>
</compile_context>

<pallas_src>
import jax
import jax.numpy as jnp
from jax.experimental import pallas as pl
from jax.experimental.pallas import tpu as pltpu

EPS = 1e-5
LANE = 128   # pad Cout to this so output stores are lane-dense (unmasked vst)
SUB = 8      # pad Cin to sublane granularity


def _round_up(x, m):
    return (x + m - 1) // m * m


def _pick_bh(H, W):
    """Rows per grid step: aim for an MXU M dimension (BH*W) around 2048."""
    target = max(1, min(32, 2048 // max(W, 1)))
    bh = min(H, target)
    while H % bh:
        bh -= 1
    return bh


# ------------------------------ kernel bodies ------------------------------ #

def _row_mask(cond, dtype):
    return jnp.where(cond, 1.0, 0.0).astype(dtype)


def _stage1_kernel(xt_ref, xm_ref, xb_ref, w1_ref, wr_ref, y1_ref, st_ref):
    """BH rows of y1_raw = conv1_3x3(x) (un-normalized), plus per-block BN
    statistics for BN1 and for the residual 1x1 conv."""
    hb = pl.program_id(1)
    nhb = pl.num_programs(1)
    BH, W, cin = xm_ref.shape
    cp = y1_ref.shape[-1]

    # Assemble (BH+2, W+2, cin) once per block: 1-row halos (zeroed at image
    # borders) + zero columns for the horizontal padding.
    top = xt_ref[...] * _row_mask(hb > 0, xt_ref.dtype)
    bot = xb_ref[...] * _row_mask(hb < nhb - 1, xb_ref.dtype)
    blk = jnp.concatenate([top, xm_ref[...], bot], axis=0)          # (BH+2, W, cin)
    zcol = jnp.zeros((BH + 2, 1, cin), blk.dtype)
    blk = jnp.concatenate([zcol, blk, zcol], axis=1)                # (BH+2, W+2, cin)

    # im2col along K only: one (BH*W, 9*cin) x (9*cin, cp) MXU matmul.
    taps = [blk[dy:dy + BH, dx:dx + W, :].reshape(BH * W, cin)
            for dy in range(3) for dx in range(3)]
    lhs = jnp.concatenate(taps, axis=1)                             # (BH*W, 9*cin)
    acc = jnp.dot(lhs, w1_ref[...], preferred_element_type=jnp.float32)

    y1_ref[...] = acc.reshape(BH, W, cp).astype(y1_ref.dtype)

    # Residual 1x1 conv: values are recomputed cheaply in stage 3; only its BN
    # statistics are produced here.
    res = jnp.dot(xm_ref[...].reshape(BH * W, cin), wr_ref[...],
                  preferred_element_type=jnp.float32)

    st_ref[0:1, :] = jnp.sum(acc, axis=0, keepdims=True)
    st_ref[1:2, :] = jnp.sum(acc * acc, axis=0, keepdims=True)
    st_ref[2:3, :] = jnp.sum(res, axis=0, keepdims=True)
    st_ref[3:4, :] = jnp.sum(res * res, axis=0, keepdims=True)


def _stage2_kernel(yt_ref, ym_ref, yb_ref, w2_ref, cf_ref, y2_ref, st_ref):
    """BH rows of y2_raw = conv2_3x3( relu(bn1(y1_raw)) ), plus BN2 statistics.
    BN1 (folded to per-channel scale/shift) + ReLU are applied on the fly."""
    hb = pl.program_id(1)
    nhb = pl.num_programs(1)
    BH, W, cp = ym_ref.shape
    scale1 = cf_ref[0:1, :]
    shift1 = cf_ref[1:2, :]

    def act(ref, valid):
        a = jnp.maximum(ref[...].astype(jnp.float32) * scale1 + shift1, 0.0)
        if valid is not None:                    # conv2 zero-pads AFTER bn+relu
            a = a * _row_mask(valid, a.dtype)
        return a.astype(jnp.bfloat16)

    blk = jnp.concatenate([act(yt_ref, hb > 0), act(ym_ref, None),
                           act(yb_ref, hb < nhb - 1)], axis=0)      # (BH+2, W, cp)
    zcol = jnp.zeros((BH + 2, 1, cp), jnp.bfloat16)
    blk = jnp.concatenate([zcol, blk, zcol], axis=1)                # (BH+2, W+2, cp)

    taps = [blk[dy:dy + BH, dx:dx + W, :].reshape(BH * W, cp)
            for dy in range(3) for dx in range(3)]

    # Pair taps along K (K = 2*cp) to fill the 256-deep MXU on v6e/v7x:
    # 5 matmuls + 5 accumulate adds instead of 9 + 9.
    acc = jnp.zeros((BH * W, cp), jnp.float32)
    k = 0
    while k < 9:
        g = 2 if k + 1 < 9 else 1
        lhs = jnp.concatenate(taps[k:k + 2], axis=1) if g == 2 else taps[k]
        acc = acc + jnp.dot(lhs, w2_ref[k * cp:(k + g) * cp, :],
                            preferred_element_type=jnp.float32)
        k += g

    y2_ref[...] = acc.reshape(BH, W, cp).astype(y2_ref.dtype)
    st_ref[0:1, :] = jnp.sum(acc, axis=0, keepdims=True)
    st_ref[1:2, :] = jnp.sum(acc * acc, axis=0, keepdims=True)


def _stage3_kernel(y2_ref, xm_ref, wr_ref, cf_ref, out_ref):
    """out = relu( relu(bn2(y2_raw)) + bn_r(conv1x1(x)) ), fully fused."""
    BH, W, cp = y2_ref.shape
    cin = xm_ref.shape[-1]
    scale2, shift2 = cf_ref[0:1, :], cf_ref[1:2, :]
    scale_r, shift_r = cf_ref[2:3, :], cf_ref[3:4, :]

    h2 = jnp.maximum(y2_ref[...].astype(jnp.float32) * scale2 + shift2, 0.0)
    res = jnp.dot(xm_ref[...].reshape(BH * W, cin), wr_ref[...],
                  preferred_element_type=jnp.float32).reshape(BH, W, cp)
    res = res * scale_r + shift_r
    out_ref[...] = jnp.maximum(h2 + res, 0.0).astype(out_ref.dtype)


# ------------------------------- wrapper ----------------------------------- #

def double_conv(x_nchw, params, out_dtype=None):
    N, Cin, H, W = x_nchw.shape
    Cout = params["w1"].shape[0]
    cin_p = _round_up(Cin, SUB)
    cp = _round_up(Cout, LANE)
    f32 = jnp.float32
    out_dtype = out_dtype or x_nchw.dtype          # pass bf16 to halve store bytes

    BH = _pick_bh(H, W)
    HB = H // BH

    # ---------- layout / weight prep (tiny, channel-sized work in XLA) ----------
    x = jnp.transpose(x_nchw, (0, 2, 3, 1)).astype(f32)            # NHWC
    x = jnp.pad(x, ((0, 0), (0, 0), (0, 0), (0, cin_p - Cin)))
    x_bf = x.astype(jnp.bfloat16)                                  # bf16 MXU operand

    def prep_w3x3(w, ci_pad):        # OIHW -> (9*ci_pad, cp) bf16, tap k = ky*3+kx
        co, ci = w.shape[0], w.shape[1]
        w = jnp.transpose(w, (2, 3, 1, 0)).reshape(9, ci, co)
        w = jnp.pad(w, ((0, 0), (0, ci_pad - ci), (0, cp - co)))
        return w.reshape(9 * ci_pad, cp).astype(jnp.bfloat16)

    w1 = prep_w3x3(params["w1"], cin_p)                            # (9*cin_p, cp)
    w2 = prep_w3x3(params["w2"], cp)                               # (9*cp,    cp)
    wr = jnp.pad(params["wr"].reshape(Cout, Cin).T,
                 ((0, cin_p - Cin), (0, cp - Cout))).astype(jnp.bfloat16)

    pad_c = lambda v: jnp.pad(v.astype(f32), (0, cp - Cout))
    g1, be1 = pad_c(params["g1"]), pad_c(params["be1"])
    g2, be2 = pad_c(params["g2"]), pad_c(params["be2"])
    gr, ber = pad_c(params["gr"]), pad_c(params["ber"])
    # NOTE: conv biases b1/b2 are intentionally not applied (exactly cancelled
    # by the training-mode BatchNorm that immediately follows each conv).

    # ------------------------------ specs / grids ------------------------------
    def mid_spec(c):
        return pl.BlockSpec((None, BH, W, c), lambda n, hb: (n, hb, 0, 0))

    def halo_spec(c, shift):
        if shift < 0:    # 1-row halo above the block (clamped; masked in-kernel)
            imap = lambda n, hb: (n, jnp.maximum(hb * BH - 1, 0), 0, 0)
        else:            # 1-row halo below the block
            imap = lambda n, hb: (n, jnp.minimum(hb * BH + BH, H - 1), 0, 0)
        return pl.BlockSpec((None, 1, W, c), imap)

    def full_spec(shape):
        zeros = (0,) * len(shape)
        return pl.BlockSpec(shape, lambda n, hb: zeros)

    st1_spec = pl.BlockSpec((None, None, 4, cp), lambda n, hb: (n, hb, 0, 0))
    st2_spec = pl.BlockSpec((None, None, 2, cp), lambda n, hb: (n, hb, 0, 0))

    # Per-(n, hb) partial BN statistics -> no cross-step accumulation -> both
    # grid axes fully parallel (feeds both v7x TensorCores even when N == 1).
    cparams = pltpu.CompilerParams(
        dimension_semantics=("parallel", "parallel"),
        vmem_limit_bytes=48 * 1024 * 1024)

    # -------- stage 1: raw conv1 blocks + BN1 / residual-BN statistics --------
    y1_raw, stats1 = pl.pallas_call(
        _stage1_kernel,
        grid=(N, HB),
        in_specs=[halo_spec(cin_p, -1), mid_spec(cin_p), halo_spec(cin_p, +1),
                  full_spec((9 * cin_p, cp)), full_spec((cin_p, cp))],
        out_specs=[mid_spec(cp), st1_spec],
        out_shape=[jax.ShapeDtypeStruct((N, H, W, cp), jnp.bfloat16),
                   jax.ShapeDtypeStruct((N, HB, 4, cp), f32)],
        compiler_params=cparams,
    )(x_bf, x_bf, x_bf, w1, wr)

    cnt = float(N * H * W)

    def bn_affine(s, ss, gamma, beta):
        mean = s / cnt
        var = jnp.maximum(ss / cnt - mean * mean, 0.0)
        scale = gamma * jax.lax.rsqrt(var + EPS)
        return scale, beta - mean * scale

    st1 = jnp.sum(stats1, axis=(0, 1))                              # (4, cp)
    scale1, shift1 = bn_affine(st1[0], st1[1], g1, be1)
    scale_r, shift_r = bn_affine(st1[2], st1[3], gr, ber)
    coef2 = jnp.stack([scale1, shift1], axis=0)                     # (2, cp)

    # ---- stage 2: conv2( relu(bn1(y1_raw)) ) raw blocks + BN2 statistics ----
    y2_raw, stats2 = pl.pallas_call(
        _stage2_kernel,
        grid=(N, HB),
        in_specs=[halo_spec(cp, -1), mid_spec(cp), halo_spec(cp, +1),
                  full_spec((9 * cp, cp)), full_spec((2, cp))],
        out_specs=[mid_spec(cp), st2_spec],
        out_shape=[jax.ShapeDtypeStruct((N, H, W, cp), jnp.bfloat16),
                   jax.ShapeDtypeStruct((N, HB, 2, cp), f32)],
        compiler_params=cparams,
    )(y1_raw, y1_raw, y1_raw, w2, coef2)

    st2 = jnp.sum(stats2, axis=(0, 1))                              # (2, cp)
    scale2, shift2 = bn_affine(st2[0], st2[1], g2, be2)
    coef3 = jnp.stack([scale2, shift2, scale_r, shift_r], axis=0)   # (4, cp)

    # -- stage 3: out = relu( relu(bn2(y2)) + bn_r(conv1x1(x)) ), fused per block --
    out_p = pl.pallas_call(
        _stage3_kernel,
        grid=(N, HB),
        in_specs=[mid_spec(cp), mid_spec(cin_p),
                  full_spec((cin_p, cp)), full_spec((4, cp))],
        out_specs=mid_spec(cp),
        out_shape=jax.ShapeDtypeStruct((N, H, W, cp), out_dtype),
        compiler_params=cparams,
    )(y2_raw, x_bf, wr, coef3)

    out = out_p[..., :Cout]                                         # drop channel pad
    return jnp.transpose(out, (0, 3, 1, 2))                         # back to NCHW


# --------------------------- pure-JAX reference ---------------------------- #

def _reference(x, p):
    def conv(h, w, b=None):
        y = jax.lax.conv_general_dilated(
            h, w, (1, 1), "SAME", dimension_numbers=("NCHW", "OIHW", "NCHW"))
        return y if b is None else y + b.reshape(1, -1, 1, 1)

    def bn(y, g, be):
        mean = jnp.mean(y, axis=(0, 2, 3), keepdims=True)
        var = jnp.mean((y - mean) ** 2, axis=(0, 2, 3), keepdims=True)
        return (y - mean) * jax.lax.rsqrt(var + EPS) * g.reshape(1, -1, 1, 1) \
            + be.reshape(1, -1, 1, 1)

    res = bn(conv(x, p["wr"]), p["gr"], p["ber"])
    h = jax.nn.relu(bn(conv(x, p["w1"], p["b1"]), p["g1"], p["be1"]))
    h = jax.nn.relu(bn(conv(h, p["w2"], p["b2"]), p["g2"], p["be2"]))
    return jax.nn.relu(h + res)


# ----------------------------------- main ----------------------------------- #

if __name__ == "__main__":
    N, Cin, Cout, H, W = 2, 4, 8, 16, 16
    key = jax.random.PRNGKey(0)
    ks = jax.random.split(key, 12)

    params = {
        "w1": 0.1 * jax.random.normal(ks[0], (Cout, Cin, 3, 3), jnp.float32),
        "b1": 0.1 * jax.random.normal(ks[1], (Cout,), jnp.float32),
        "g1": 1.0 + 0.1 * jax.random.normal(ks[2], (Cout,), jnp.float32),
        "be1": 0.1 * jax.random.normal(ks[3], (Cout,), jnp.float32),
        "w2": 0.1 * jax.random.normal(ks[4], (Cout, Cout, 3, 3), jnp.float32),
        "b2": 0.1 * jax.random.normal(ks[5], (Cout,), jnp.float32),
        "g2": 1.0 + 0.1 * jax.random.normal(ks[6], (Cout,), jnp.float32),
        "be2": 0.1 * jax.random.normal(ks[7], (Cout,), jnp.float32),
        "wr": 0.1 * jax.random.normal(ks[8], (Cout, Cin, 1, 1), jnp.float32),
        "gr": 1.0 + 0.1 * jax.random.normal(ks[9], (Cout,), jnp.float32),
        "ber": 0.1 * jax.random.normal(ks[10], (Cout,), jnp.float32),
    }

    x = jax.random.normal(ks[11], (N, Cin, H, W), jnp.float32)

    out = jax.block_until_ready(jax.jit(double_conv)(x, params))
    assert out.shape == (N, Cout, H, W), out.shape

    ref = jax.block_until_ready(_reference(x, params))
    err = float(jnp.max(jnp.abs(out - ref)))
    assert jnp.allclose(out, ref, atol=5e-2, rtol=5e-2), err

    print("KERNEL_OK")
</pallas_src>

<mosaic_0001>
module attributes {stable_mosaic.version = 11 : i64} {
  func.func @_stage1_kernel(%arg0: i32, %arg1: i32, %arg2: memref<1x1x16x8xbf16, #tpu.memory_space<vmem>>, %arg3: memref<1x16x16x8xbf16, #tpu.memory_space<vmem>>, %arg4: memref<1x1x16x8xbf16, #tpu.memory_space<vmem>>, %arg5: memref<72x128xbf16, #tpu.memory_space<vmem>>, %arg6: memref<8x128xbf16, #tpu.memory_space<vmem>>, %arg7: memref<1x16x16x128xbf16, #tpu.memory_space<vmem>>, %arg8: memref<1x1x4x128xf32, #tpu.memory_space<vmem>>) attributes {dimension_semantics = [#tpu.dimension_semantics<parallel>, #tpu.dimension_semantics<parallel>], iteration_bounds = array<i64: 2, 1>, scalar_prefetch = 0 : i64, scratch_operands = 0 : i64, tpu.core_type = #tpu.core_type<tc>, window_params = [{transform_indices = @transform_0, window_bounds = array<i64: 1, 1, 16, 8>}, {transform_indices = @transform_1, window_bounds = array<i64: 1, 16, 16, 8>}, {transform_indices = @transform_2, window_bounds = array<i64: 1, 1, 16, 8>}, {pipeline_mode = #tpu.pipeline_mode<synchronous>, transform_indices = @transform_3, window_bounds = array<i64: 72, 128>}, {pipeline_mode = #tpu.pipeline_mode<synchronous>, transform_indices = @transform_4, window_bounds = array<i64: 8, 128>}, {transform_indices = @transform_5, window_bounds = array<i64: 1, 16, 16, 128>}, {transform_indices = @transform_6, window_bounds = array<i64: 1, 1, 4, 128>}]} {
    %c0 = arith.constant 0 : index
    %c0_0 = arith.constant 0 : index
    %c0_1 = arith.constant 0 : index
    %c0_2 = arith.constant 0 : index
    %0 = vector.load %arg2[%c0, %c0_0, %c0_1, %c0_2] : memref<1x1x16x8xbf16, #tpu.memory_space<vmem>>, vector<1x1x16x8xbf16>
    %1 = vector.shape_cast %0 : vector<1x1x16x8xbf16> to vector<1x16x8xbf16>
    %c0_i32 = arith.constant 0 : i32
    %2 = arith.cmpi sgt, %arg1, %c0_i32 : i32
    %cst = arith.constant 1.000000e+00 : f32
    %cst_3 = arith.constant 0.000000e+00 : f32
    %3 = arith.select %2, %cst, %cst_3 : f32
    %4 = arith.truncf %3 : f32 to bf16
    %5 = vector.broadcast %4 : bf16 to vector<1x16x8xbf16>
    %6 = arith.mulf %1, %5 : vector<1x16x8xbf16>
    %c0_4 = arith.constant 0 : index
    %c0_5 = arith.constant 0 : index
    %c0_6 = arith.constant 0 : index
    %c0_7 = arith.constant 0 : index
    %7 = vector.load %arg4[%c0_4, %c0_5, %c0_6, %c0_7] : memref<1x1x16x8xbf16, #tpu.memory_space<vmem>>, vector<1x1x16x8xbf16>
    %8 = vector.shape_cast %7 : vector<1x1x16x8xbf16> to vector<1x16x8xbf16>
    %c0_i32_8 = arith.constant 0 : i32
    %9 = arith.cmpi slt, %arg1, %c0_i32_8 : i32
    %cst_9 = arith.constant 1.000000e+00 : f32
    %cst_10 = arith.constant 0.000000e+00 : f32
    %10 = arith.select %9, %cst_9, %cst_10 : f32
    %11 = arith.truncf %10 : f32 to bf16
    %12 = vector.broadcast %11 : bf16 to vector<1x16x8xbf16>
    %13 = arith.mulf %8, %12 : vector<1x16x8xbf16>
    %c0_11 = arith.constant 0 : index
    %c0_12 = arith.constant 0 : index
    %c0_13 = arith.constant 0 : index
    %c0_14 = arith.constant 0 : index
    %14 = vector.load %arg3[%c0_11, %c0_12, %c0_13, %c0_14] : memref<1x16x16x8xbf16, #tpu.memory_space<vmem>>, vector<1x16x16x8xbf16>
    %15 = vector.shape_cast %14 : vector<1x16x16x8xbf16> to vector<16x16x8xbf16>
    %16 = tpu.concatenate %6, %15, %13 in 0 : vector<1x16x8xbf16>, vector<16x16x8xbf16>, vector<1x16x8xbf16> -> vector<18x16x8xbf16>
    %cst_15 = arith.constant 0.000000e+00 : bf16
    %17 = vector.broadcast %cst_15 : bf16 to vector<18x1x8xbf16>
    %18 = tpu.concatenate %17, %16, %17 in 1 : vector<18x1x8xbf16>, vector<18x16x8xbf16>, vector<18x1x8xbf16> -> vector<18x18x8xbf16>
    %19 = vector.extract_strided_slice %18 {offsets = [0, 0, 0], sizes = [16, 16, 8], strides = [1, 1, 1]} : vector<18x18x8xbf16> to vector<16x16x8xbf16>
    %20 = vector.shape_cast %19 : vector<16x16x8xbf16> to vector<256x8xbf16>
    %21 = vector.extract_strided_slice %18 {offsets = [0, 1, 0], sizes = [16, 16, 8], strides = [1, 1, 1]} : vector<18x18x8xbf16> to vector<16x16x8xbf16>
    %22 = vector.shape_cast %21 : vector<16x16x8xbf16> to vector<256x8xbf16>
    %23 = vector.extract_strided_slice %18 {offsets = [0, 2, 0], sizes = [16, 16, 8], strides = [1, 1, 1]} : vector<18x18x8xbf16> to vector<16x16x8xbf16>
    %24 = vector.shape_cast %23 : vector<16x16x8xbf16> to vector<256x8xbf16>
    %25 = vector.extract_strided_slice %18 {offsets = [1, 0, 0], sizes = [16, 16, 8], strides = [1, 1, 1]} : vector<18x18x8xbf16> to vector<16x16x8xbf16>
    %26 = vector.shape_cast %25 : vector<16x16x8xbf16> to vector<256x8xbf16>
    %27 = vector.extract_strided_slice %18 {offsets = [1, 1, 0], sizes = [16, 16, 8], strides = [1, 1, 1]} : vector<18x18x8xbf16> to vector<16x16x8xbf16>
    %28 = vector.shape_cast %27 : vector<16x16x8xbf16> to vector<256x8xbf16>
    %29 = vector.extract_strided_slice %18 {offsets = [1, 2, 0], sizes = [16, 16, 8], strides = [1, 1, 1]} : vector<18x18x8xbf16> to vector<16x16x8xbf16>
    %30 = vector.shape_cast %29 : vector<16x16x8xbf16> to vector<256x8xbf16>
    %31 = vector.extract_strided_slice %18 {offsets = [2, 0, 0], sizes = [16, 16, 8], strides = [1, 1, 1]} : vector<18x18x8xbf16> to vector<16x16x8xbf16>
    %32 = vector.shape_cast %31 : vector<16x16x8xbf16> to vector<256x8xbf16>
    %33 = vector.extract_strided_slice %18 {offsets = [2, 1, 0], sizes = [16, 16, 8], strides = [1, 1, 1]} : vector<18x18x8xbf16> to vector<16x16x8xbf16>
    %34 = vector.shape_cast %33 : vector<16x16x8xbf16> to vector<256x8xbf16>
    %35 = vector.extract_strided_slice %18 {offsets = [2, 2, 0], sizes = [16, 16, 8], strides = [1, 1, 1]} : vector<18x18x8xbf16> to vector<16x16x8xbf16>
    %36 = vector.shape_cast %35 : vector<16x16x8xbf16> to vector<256x8xbf16>
    %37 = tpu.concatenate %20, %22, %24, %26, %28, %30, %32, %34, %36 in 1 : vector<256x8xbf16>, vector<256x8xbf16>, vector<256x8xbf16>, vector<256x8xbf16>, vector<256x8xbf16>, vector<256x8xbf16>, vector<256x8xbf16>, vector<256x8xbf16>, vector<256x8xbf16> -> vector<256x72xbf16>
    %c0_16 = arith.constant 0 : index
    %c0_17 = arith.constant 0 : index
    %38 = vector.load %arg5[%c0_16, %c0_17] : memref<72x128xbf16, #tpu.memory_space<vmem>>, vector<72x128xbf16>
    %cst_18 = arith.constant dense<0.000000e+00> : vector<256x128xf32>
    %39 = tpu.matmul %37, %38, %cst_18 {dimension_numbers = #tpu.dot_dimension_numbers<[1], [0], [0], [1], [0, 0, 1, 1], [], []>} : vector<256x72xbf16>, vector<72x128xbf16>, vector<256x128xf32> -> vector<256x128xf32>
    %40 = vector.shape_cast %39 : vector<256x128xf32> to vector<16x16x128xf32>
    %41 = arith.truncf %40 : vector<16x16x128xf32> to vector<16x16x128xbf16>
    %c0_19 = arith.constant 0 : index
    %c0_20 = arith.constant 0 : index
    %c0_21 = arith.constant 0 : index
    %c0_22 = arith.constant 0 : index
    %42 = vector.load %arg7[%c0_19, %c0_20, %c0_21, %c0_22] : memref<1x16x16x128xbf16, #tpu.memory_space<vmem>>, vector<1x16x16x128xbf16>
    %43 = vector.shape_cast %42 : vector<1x16x16x128xbf16> to vector<16x16x128xbf16>
    %44 = vector.shape_cast %41 : vector<16x16x128xbf16> to vector<1x16x16x128xbf16>
    tpu.vector_store %arg7[%c0_19, %c0_20, %c0_21, %c0_22], %44 {strides = array<i32>} : memref<1x16x16x128xbf16, #tpu.memory_space<vmem>>, vector<1x16x16x128xbf16>,
    %c0_23 = arith.constant 0 : index
    %c0_24 = arith.constant 0 : index
    %c0_25 = arith.constant 0 : index
    %c0_26 = arith.constant 0 : index
    %45 = vector.load %arg3[%c0_23, %c0_24, %c0_25, %c0_26] : memref<1x16x16x8xbf16, #tpu.memory_space<vmem>>, vector<1x16x16x8xbf16>
    %46 = vector.shape_cast %45 : vector<1x16x16x8xbf16> to vector<16x16x8xbf16>
    %47 = vector.shape_cast %46 : vector<16x16x8xbf16> to vector<256x8xbf16>
    %c0_27 = arith.constant 0 : index
    %c0_28 = arith.constant 0 : index
    %48 = vector.load %arg6[%c0_27, %c0_28] : memref<8x128xbf16, #tpu.memory_space<vmem>>, vector<8x128xbf16>
    %cst_29 = arith.constant dense<0.000000e+00> : vector<256x128xf32>
    %49 = tpu.matmul %47, %48, %cst_29 {dimension_numbers = #tpu.dot_dimension_numbers<[1], [0], [0], [1], [0, 0, 1, 1], [], []>} : vector<256x8xbf16>, vector<8x128xbf16>, vector<256x128xf32> -> vector<256x128xf32>
    %cst_30 = arith.constant dense<0.000000e+00> : vector<128xf32>
    %50 = vector.multi_reduction <add>, %39, %cst_30 [0] : vector<256x128xf32> to vector<128xf32>
    %51 = vector.shape_cast %50 : vector<128xf32> to vector<1x128xf32>
    %c0_31 = arith.constant 0 : index
    %c0_32 = arith.constant 0 : index
    %c0_33 = arith.constant 0 : index
    %c0_34 = arith.constant 0 : index
    %52 = vector.load %arg8[%c0_31, %c0_32, %c0_33, %c0_34] : memref<1x1x4x128xf32, #tpu.memory_space<vmem>>, vector<1x1x1x128xf32>
    %53 = vector.shape_cast %52 : vector<1x1x1x128xf32> to vector<1x128xf32>
    %54 = vector.shape_cast %51 : vector<1x128xf32> to vector<1x1x1x128xf32>
    tpu.vector_store %arg8[%c0_31, %c0_32, %c0_33, %c0_34], %54 {strides = array<i32>} : memref<1x1x4x128xf32, #tpu.memory_space<vmem>>, vector<1x1x1x128xf32>,
    %55 = arith.mulf %39, %39 : vector<256x128xf32>
    %cst_35 = arith.constant dense<0.000000e+00> : vector<128xf32>
    %56 = vector.multi_reduction <add>, %55, %cst_35 [0] : vector<256x128xf32> to vector<128xf32>
    %57 = vector.shape_cast %56 : vector<128xf32> to vector<1x128xf32>
    %c0_36 = arith.constant 0 : index
    %c0_37 = arith.constant 0 : index
    %c1 = arith.constant 1 : index
    %c0_38 = arith.constant 0 : index
    %58 = vector.load %arg8[%c0_36, %c0_37, %c1, %c0_38] : memref<1x1x4x128xf32, #tpu.memory_space<vmem>>, vector<1x1x1x128xf32>
    %59 = vector.shape_cast %58 : vector<1x1x1x128xf32> to vector<1x128xf32>
    %60 = vector.shape_cast %57 : vector<1x128xf32> to vector<1x1x1x128xf32>
    tpu.vector_store %arg8[%c0_36, %c0_37, %c1, %c0_38], %60 {strides = array<i32>} : memref<1x1x4x128xf32, #tpu.memory_space<vmem>>, vector<1x1x1x128xf32>,
    %cst_39 = arith.constant dense<0.000000e+00> : vector<128xf32>
    %61 = vector.multi_reduction <add>, %49, %cst_39 [0] : vector<256x128xf32> to vector<128xf32>
    %62 = vector.shape_cast %61 : vector<128xf32> to vector<1x128xf32>
    %c0_40 = arith.constant 0 : index
    %c0_41 = arith.constant 0 : index
    %c2 = arith.constant 2 : index
    %c0_42 = arith.constant 0 : index
    %63 = vector.load %arg8[%c0_40, %c0_41, %c2, %c0_42] : memref<1x1x4x128xf32, #tpu.memory_space<vmem>>, vector<1x1x1x128xf32>
    %64 = vector.shape_cast %63 : vector<1x1x1x128xf32> to vector<1x128xf32>
    %65 = vector.shape_cast %62 : vector<1x128xf32> to vector<1x1x1x128xf32>
    tpu.vector_store %arg8[%c0_40, %c0_41, %c2, %c0_42], %65 {strides = array<i32>} : memref<1x1x4x128xf32, #tpu.memory_space<vmem>>, vector<1x1x1x128xf32>,
    %66 = arith.mulf %49, %49 : vector<256x128xf32>
    %cst_43 = arith.constant dense<0.000000e+00> : vector<128xf32>
    %67 = vector.multi_reduction <add>, %66, %cst_43 [0] : vector<256x128xf32> to vector<128xf32>
    %68 = vector.shape_cast %67 : vector<128xf32> to vector<1x128xf32>
    %c0_44 = arith.constant 0 : index
    %c0_45 = arith.constant 0 : index
    %c3 = arith.constant 3 : index
    %c0_46 = arith.constant 0 : index
    %69 = vector.load %arg8[%c0_44, %c0_45, %c3, %c0_46] : memref<1x1x4x128xf32, #tpu.memory_space<vmem>>, vector<1x1x1x128xf32>
    %70 = vector.shape_cast %69 : vector<1x1x1x128xf32> to vector<1x128xf32>
    %71 = vector.shape_cast %68 : vector<1x128xf32> to vector<1x1x1x128xf32>
    tpu.vector_store %arg8[%c0_44, %c0_45, %c3, %c0_46], %71 {strides = array<i32>} : memref<1x1x4x128xf32, #tpu.memory_space<vmem>>, vector<1x1x1x128xf32>,
    return
  }
  func.func @transform_0(%arg0: i32, %arg1: i32) -> (i32, i32, i32, i32) {
    %c16_i32 = arith.constant 16 : i32
    %0 = arith.muli %arg1, %c16_i32 : i32
    %c1_i32 = arith.constant 1 : i32
    %1 = arith.subi %0, %c1_i32 : i32
    %c0_i32 = arith.constant 0 : i32
    %2 = arith.maxsi %1, %c0_i32 : i32
    %c0_i32_0 = arith.constant 0 : i32
    %c0_i32_1 = arith.constant 0 : i32
    %c0_i32_2 = arith.constant 0 : i32
    return %arg0, %2, %c0_i32_0, %c0_i32_1 : i32, i32, i32, i32
  }
  func.func @transform_1(%arg0: i32, %arg1: i32) -> (i32, i32, i32, i32) {
    %c0_i32 = arith.constant 0 : i32
    %c0_i32_0 = arith.constant 0 : i32
    %c0_i32_1 = arith.constant 0 : i32
    return %arg0, %arg1, %c0_i32, %c0_i32_0 : i32, i32, i32, i32
  }
  func.func @transform_2(%arg0: i32, %arg1: i32) -> (i32, i32, i32, i32) {
    %c16_i32 = arith.constant 16 : i32
    %0 = arith.muli %arg1, %c16_i32 : i32
    %c16_i32_0 = arith.constant 16 : i32
    %1 = arith.addi %0, %c16_i32_0 : i32
    %c15_i32 = arith.constant 15 : i32
    %2 = arith.minsi %1, %c15_i32 : i32
    %c0_i32 = arith.constant 0 : i32
    %c0_i32_1 = arith.constant 0 : i32
    %c0_i32_2 = arith.constant 0 : i32
    return %arg0, %2, %c0_i32, %c0_i32_1 : i32, i32, i32, i32
  }
  func.func @transform_3(%arg0: i32, %arg1: i32) -> (i32, i32) {
    %c0_i32 = arith.constant 0 : i32
    %c0_i32_0 = arith.constant 0 : i32
    %c0_i32_1 = arith.constant 0 : i32
    return %c0_i32, %c0_i32_0 : i32, i32
  }
  func.func @transform_4(%arg0: i32, %arg1: i32) -> (i32, i32) {
    %c0_i32 = arith.constant 0 : i32
    %c0_i32_0 = arith.constant 0 : i32
    %c0_i32_1 = arith.constant 0 : i32
    return %c0_i32, %c0_i32_0 : i32, i32
  }
  func.func @transform_5(%arg0: i32, %arg1: i32) -> (i32, i32, i32, i32) {
    %c0_i32 = arith.constant 0 : i32
    %c0_i32_0 = arith.constant 0 : i32
    %c0_i32_1 = arith.constant 0 : i32
    return %arg0, %arg1, %c0_i32, %c0_i32_0 : i32, i32, i32, i32
  }
  func.func @transform_6(%arg0: i32, %arg1: i32) -> (i32, i32, i32, i32) {
    %c0_i32 = arith.constant 0 : i32
    %c0_i32_0 = arith.constant 0 : i32
    %c0_i32_1 = arith.constant 0 : i32
    return %arg0, %arg1, %c0_i32, %c0_i32_0 : i32, i32, i32, i32
  }
}

module attributes {stable_mosaic.version = 11 : i64} {
  func.func @_stage2_kernel(%arg0: i32, %arg1: i32, %arg2: memref<1x1x16x128xbf16, #tpu.memory_space<vmem>>, %arg3: memref<1x16x16x128xbf16, #tpu.memory_space<vmem>>, %arg4: memref<1x1x16x128xbf16, #tpu.memory_space<vmem>>, %arg5: memref<1152x128xbf16, #tpu.memory_space<vmem>>, %arg6: memref<2x128xf32, #tpu.memory_space<vmem>>, %arg7: memref<1x16x16x128xbf16, #tpu.memory_space<vmem>>, %arg8: memref<1x1x2x128xf32, #tpu.memory_space<vmem>>) attributes {dimension_semantics = [#tpu.dimension_semantics<parallel>, #tpu.dimension_semantics<parallel>], iteration_bounds = array<i64: 2, 1>, scalar_prefetch = 0 : i64, scratch_operands = 0 : i64, tpu.core_type = #tpu.core_type<tc>, window_params = [{transform_indices = @transform_0, window_bounds = array<i64: 1, 1, 16, 128>}, {transform_indices = @transform_1, window_bounds = array<i64: 1, 16, 16, 128>}, {transform_indices = @transform_2, window_bounds = array<i64: 1, 1, 16, 128>}, {pipeline_mode = #tpu.pipeline_mode<synchronous>, transform_indices = @transform_3, window_bounds = array<i64: 1152, 128>}, {pipeline_mode = #tpu.pipeline_mode<synchronous>, transform_indices = @transform_4, window_bounds = array<i64: 2, 128>}, {transform_indices = @transform_5, window_bounds = array<i64: 1, 16, 16, 128>}, {transform_indices = @transform_6, window_bounds = array<i64: 1, 1, 2, 128>}]} {
    %c0 = arith.constant 0 : index
    %c0_0 = arith.constant 0 : index
    %0 = vector.load %arg6[%c0, %c0_0] : memref<2x128xf32, #tpu.memory_space<vmem>>, vector<1x128xf32>
    %c1 = arith.constant 1 : index
    %c0_1 = arith.constant 0 : index
    %1 = vector.load %arg6[%c1, %c0_1] : memref<2x128xf32, #tpu.memory_space<vmem>>, vector<1x128xf32>
    %c0_i32 = arith.constant 0 : i32
    %2 = arith.cmpi sgt, %arg1, %c0_i32 : i32
    %c0_2 = arith.constant 0 : index
    %c0_3 = arith.constant 0 : index
    %c0_4 = arith.constant 0 : index
    %c0_5 = arith.constant 0 : index
    %3 = vector.load %arg2[%c0_2, %c0_3, %c0_4, %c0_5] : memref<1x1x16x128xbf16, #tpu.memory_space<vmem>>, vector<1x1x16x128xbf16>
    %4 = vector.shape_cast %3 : vector<1x1x16x128xbf16> to vector<1x16x128xbf16>
    %5 = arith.extf %4 : vector<1x16x128xbf16> to vector<1x16x128xf32>
    %6 = vector.shape_cast %0 : vector<1x128xf32> to vector<1x1x128xf32>
    %7 = vector.broadcast %6 : vector<1x1x128xf32> to vector<1x16x128xf32>
    %8 = arith.mulf %5, %7 : vector<1x16x128xf32>
    %9 = vector.shape_cast %1 : vector<1x128xf32> to vector<1x1x128xf32>
    %10 = vector.broadcast %9 : vector<1x1x128xf32> to vector<1x16x128xf32>
    %11 = arith.addf %8, %10 : vector<1x16x128xf32>
    %cst = arith.constant 0.000000e+00 : f32
    %12 = vector.broadcast %cst : f32 to vector<1x16x128xf32>
    %13 = arith.maximumf %11, %12 : vector<1x16x128xf32>
    %cst_6 = arith.constant 1.000000e+00 : f32
    %cst_7 = arith.constant 0.000000e+00 : f32
    %14 = arith.select %2, %cst_6, %cst_7 : f32
    %15 = vector.broadcast %14 : f32 to vector<1x16x128xf32>
    %16 = arith.mulf %13, %15 : vector<1x16x128xf32>
    %17 = arith.truncf %16 : vector<1x16x128xf32> to vector<1x16x128xbf16>
    %c0_8 = arith.constant 0 : index
    %c0_9 = arith.constant 0 : index
    %c0_10 = arith.constant 0 : index
    %c0_11 = arith.constant 0 : index
    %18 = vector.load %arg3[%c0_8, %c0_9, %c0_10, %c0_11] : memref<1x16x16x128xbf16, #tpu.memory_space<vmem>>, vector<1x16x16x128xbf16>
    %19 = vector.shape_cast %18 : vector<1x16x16x128xbf16> to vector<16x16x128xbf16>
    %20 = arith.extf %19 : vector<16x16x128xbf16> to vector<16x16x128xf32>
    %21 = vector.shape_cast %0 : vector<1x128xf32> to vector<1x1x128xf32>
    %22 = vector.broadcast %21 : vector<1x1x128xf32> to vector<16x16x128xf32>
    %23 = arith.mulf %20, %22 : vector<16x16x128xf32>
    %24 = vector.shape_cast %1 : vector<1x128xf32> to vector<1x1x128xf32>
    %25 = vector.broadcast %24 : vector<1x1x128xf32> to vector<16x16x128xf32>
    %26 = arith.addf %23, %25 : vector<16x16x128xf32>
    %cst_12 = arith.constant 0.000000e+00 : f32
    %27 = vector.broadcast %cst_12 : f32 to vector<16x16x128xf32>
    %28 = arith.maximumf %26, %27 : vector<16x16x128xf32>
    %29 = arith.truncf %28 : vector<16x16x128xf32> to vector<16x16x128xbf16>
    %c0_i32_13 = arith.constant 0 : i32
    %30 = arith.cmpi slt, %arg1, %c0_i32_13 : i32
    %c0_14 = arith.constant 0 : index
    %c0_15 = arith.constant 0 : index
    %c0_16 = arith.constant 0 : index
    %c0_17 = arith.constant 0 : index
    %31 = vector.load %arg4[%c0_14, %c0_15, %c0_16, %c0_17] : memref<1x1x16x128xbf16, #tpu.memory_space<vmem>>, vector<1x1x16x128xbf16>
    %32 = vector.shape_cast %31 : vector<1x1x16x128xbf16> to vector<1x16x128xbf16>
    %33 = arith.extf %32 : vector<1x16x128xbf16> to vector<1x16x128xf32>
    %34 = vector.shape_cast %0 : vector<1x128xf32> to vector<1x1x128xf32>
    %35 = vector.broadcast %34 : vector<1x1x128xf32> to vector<1x16x128xf32>
    %36 = arith.mulf %33, %35 : vector<1x16x128xf32>
    %37 = vector.shape_cast %1 : vector<1x128xf32> to vector<1x1x128xf32>
    %38 = vector.broadcast %37 : vector<1x1x128xf32> to vector<1x16x128xf32>
    %39 = arith.addf %36, %38 : vector<1x16x128xf32>
    %cst_18 = arith.constant 0.000000e+00 : f32
    %40 = vector.broadcast %cst_18 : f32 to vector<1x16x128xf32>
    %41 = arith.maximumf %39, %40 : vector<1x16x128xf32>
    %cst_19 = arith.constant 1.000000e+00 : f32
    %cst_20 = arith.constant 0.000000e+00 : f32
    %42 = arith.select %30, %cst_19, %cst_20 : f32
    %43 = vector.broadcast %42 : f32 to vector<1x16x128xf32>
    %44 = arith.mulf %41, %43 : vector<1x16x128xf32>
    %45 = arith.truncf %44 : vector<1x16x128xf32> to vector<1x16x128xbf16>
    %46 = tpu.concatenate %17, %29, %45 in 0 : vector<1x16x128xbf16>, vector<16x16x128xbf16>, vector<1x16x128xbf16> -> vector<18x16x128xbf16>
    %cst_21 = arith.constant 0.000000e+00 : bf16
    %47 = vector.broadcast %cst_21 : bf16 to vector<18x1x128xbf16>
    %48 = tpu.concatenate %47, %46, %47 in 1 : vector<18x1x128xbf16>, vector<18x16x128xbf16>, vector<18x1x128xbf16> -> vector<18x18x128xbf16>
    %49 = vector.extract_strided_slice %48 {offsets = [0, 0, 0], sizes = [16, 16, 128], strides = [1, 1, 1]} : vector<18x18x128xbf16> to vector<16x16x128xbf16>
    %50 = vector.shape_cast %49 : vector<16x16x128xbf16> to vector<256x128xbf16>
    %51 = vector.extract_strided_slice %48 {offsets = [0, 1, 0], sizes = [16, 16, 128], strides = [1, 1, 1]} : vector<18x18x128xbf16> to vector<16x16x128xbf16>
    %52 = vector.shape_cast %51 : vector<16x16x128xbf16> to vector<256x128xbf16>
    %53 = vector.extract_strided_slice %48 {offsets = [0, 2, 0], sizes = [16, 16, 128], strides = [1, 1, 1]} : vector<18x18x128xbf16> to vector<16x16x128xbf16>
    %54 = vector.shape_cast %53 : vector<16x16x128xbf16> to vector<256x128xbf16>
    %55 = vector.extract_strided_slice %48 {offsets = [1, 0, 0], sizes = [16, 16, 128], strides = [1, 1, 1]} : vector<18x18x128xbf16> to vector<16x16x128xbf16>
    %56 = vector.shape_cast %55 : vector<16x16x128xbf16> to vector<256x128xbf16>
    %57 = vector.extract_strided_slice %48 {offsets = [1, 1, 0], sizes = [16, 16, 128], strides = [1, 1, 1]} : vector<18x18x128xbf16> to vector<16x16x128xbf16>
    %58 = vector.shape_cast %57 : vector<16x16x128xbf16> to vector<256x128xbf16>
    %59 = vector.extract_strided_slice %48 {offsets = [1, 2, 0], sizes = [16, 16, 128], strides = [1, 1, 1]} : vector<18x18x128xbf16> to vector<16x16x128xbf16>
    %60 = vector.shape_cast %59 : vector<16x16x128xbf16> to vector<256x128xbf16>
    %61 = vector.extract_strided_slice %48 {offsets = [2, 0, 0], sizes = [16, 16, 128], strides = [1, 1, 1]} : vector<18x18x128xbf16> to vector<16x16x128xbf16>
    %62 = vector.shape_cast %61 : vector<16x16x128xbf16> to vector<256x128xbf16>
    %63 = vector.extract_strided_slice %48 {offsets = [2, 1, 0], sizes = [16, 16, 128], strides = [1, 1, 1]} : vector<18x18x128xbf16> to vector<16x16x128xbf16>
    %64 = vector.shape_cast %63 : vector<16x16x128xbf16> to vector<256x128xbf16>
    %65 = vector.extract_strided_slice %48 {offsets = [2, 2, 0], sizes = [16, 16, 128], strides = [1, 1, 1]} : vector<18x18x128xbf16> to vector<16x16x128xbf16>
    %66 = vector.shape_cast %65 : vector<16x16x128xbf16> to vector<256x128xbf16>
    %cst_22 = arith.constant 0.000000e+00 : f32
    %67 = vector.broadcast %cst_22 : f32 to vector<256x128xf32>
    %68 = tpu.concatenate %50, %52 in 1 : vector<256x128xbf16>, vector<256x128xbf16> -> vector<256x256xbf16>
    %c0_23 = arith.constant 0 : index
    %c0_24 = arith.constant 0 : index
    %69 = vector.load %arg5[%c0_23, %c0_24] : memref<1152x128xbf16, #tpu.memory_space<vmem>>, vector<256x128xbf16>
    %cst_25 = arith.constant dense<0.000000e+00> : vector<256x128xf32>
    %70 = tpu.matmul %68, %69, %cst_25 {dimension_numbers = #tpu.dot_dimension_numbers<[1], [0], [0], [1], [0, 0, 1, 1], [], []>} : vector<256x256xbf16>, vector<256x128xbf16>, vector<256x128xf32> -> vector<256x128xf32>
    %71 = arith.addf %67, %70 : vector<256x128xf32>
    %72 = tpu.concatenate %54, %56 in 1 : vector<256x128xbf16>, vector<256x128xbf16> -> vector<256x256xbf16>
    %c256 = arith.constant 256 : index
    %c0_26 = arith.constant 0 : index
    %73 = vector.load %arg5[%c256, %c0_26] : memref<1152x128xbf16, #tpu.memory_space<vmem>>, vector<256x128xbf16>
    %cst_27 = arith.constant dense<0.000000e+00> : vector<256x128xf32>
    %74 = tpu.matmul %72, %73, %cst_27 {dimension_numbers = #tpu.dot_dimension_numbers<[1], [0], [0], [1], [0, 0, 1, 1], [], []>} : vector<256x256xbf16>, vector<256x128xbf16>, vector<256x128xf32> -> vector<256x128xf32>
    %75 = arith.addf %71, %74 : vector<256x128xf32>
    %76 = tpu.concatenate %58, %60 in 1 : vector<256x128xbf16>, vector<256x128xbf16> -> vector<256x256xbf16>
    %c512 = arith.constant 512 : index
    %c0_28 = arith.constant 0 : index
    %77 = vector.load %arg5[%c512, %c0_28] : memref<1152x128xbf16, #tpu.memory_space<vmem>>, vector<256x128xbf16>
    %cst_29 = arith.constant dense<0.000000e+00> : vector<256x128xf32>
    %78 = tpu.matmul %76, %77, %cst_29 {dimension_numbers = #tpu.dot_dimension_numbers<[1], [0], [0], [1], [0, 0, 1, 1], [], []>} : vector<256x256xbf16>, vector<256x128xbf16>, vector<256x128xf32> -> vector<256x128xf32>
    %79 = arith.addf %75, %78 : vector<256x128xf32>
    %80 = tpu.concatenate %62, %64 in 1 : vector<256x128xbf16>, vector<256x128xbf16> -> vector<256x256xbf16>
    %c768 = arith.constant 768 : index
    %c0_30 = arith.constant 0 : index
    %81 = vector.load %arg5[%c768, %c0_30] : memref<1152x128xbf16, #tpu.memory_space<vmem>>, vector<256x128xbf16>
    %cst_31 = arith.constant dense<0.000000e+00> : vector<256x128xf32>
    %82 = tpu.matmul %80, %81, %cst_31 {dimension_numbers = #tpu.dot_dimension_numbers<[1], [0], [0], [1], [0, 0, 1, 1], [], []>} : vector<256x256xbf16>, vector<256x128xbf16>, vector<256x128xf32> -> vector<256x128xf32>
    %83 = arith.addf %79, %82 : vector<256x128xf32>
    %c1024 = arith.constant 1024 : index
    %c0_32 = arith.constant 0 : index
    %84 = vector.load %arg5[%c1024, %c0_32] : memref<1152x128xbf16, #tpu.memory_space<vmem>>, vector<128x128xbf16>
    %cst_33 = arith.constant dense<0.000000e+00> : vector<256x128xf32>
    %85 = tpu.matmul %66, %84, %cst_33 {dimension_numbers = #tpu.dot_dimension_numbers<[1], [0], [0], [1], [0, 0, 1, 1], [], []>} : vector<256x128xbf16>, vector<128x128xbf16>, vector<256x128xf32> -> vector<256x128xf32>
    %86 = arith.addf %83, %85 : vector<256x128xf32>
    %87 = vector.shape_cast %86 : vector<256x128xf32> to vector<16x16x128xf32>
    %88 = arith.truncf %87 : vector<16x16x128xf32> to vector<16x16x128xbf16>
    %c0_34 = arith.constant 0 : index
    %c0_35 = arith.constant 0 : index
    %c0_36 = arith.constant 0 : index
    %c0_37 = arith.constant 0 : index
    %89 = vector.load %arg7[%c0_34, %c0_35, %c0_36, %c0_37] : memref<1x16x16x128xbf16, #tpu.memory_space<vmem>>, vector<1x16x16x128xbf16>
    %90 = vector.shape_cast %89 : vector<1x16x16x128xbf16> to vector<16x16x128xbf16>
    %91 = vector.shape_cast %88 : vector<16x16x128xbf16> to vector<1x16x16x128xbf16>
    tpu.vector_store %arg7[%c0_34, %c0_35, %c0_36, %c0_37], %91 {strides = array<i32>} : memref<1x16x16x128xbf16, #tpu.memory_space<vmem>>, vector<1x16x16x128xbf16>,
    %cst_38 = arith.constant dense<0.000000e+00> : vector<128xf32>
    %92 = vector.multi_reduction <add>, %86, %cst_38 [0] : vector<256x128xf32> to vector<128xf32>
    %93 = vector.shape_cast %92 : vector<128xf32> to vector<1x128xf32>
    %c0_39 = arith.constant 0 : index
    %c0_40 = arith.constant 0 : index
    %c0_41 = arith.constant 0 : index
    %c0_42 = arith.constant 0 : index
    %94 = vector.load %arg8[%c0_39, %c0_40, %c0_41, %c0_42] : memref<1x1x2x128xf32, #tpu.memory_space<vmem>>, vector<1x1x1x128xf32>
    %95 = vector.shape_cast %94 : vector<1x1x1x128xf32> to vector<1x128xf32>
    %96 = vector.shape_cast %93 : vector<1x128xf32> to vector<1x1x1x128xf32>
    tpu.vector_store %arg8[%c0_39, %c0_40, %c0_41, %c0_42], %96 {strides = array<i32>} : memref<1x1x2x128xf32, #tpu.memory_space<vmem>>, vector<1x1x1x128xf32>,
    %97 = arith.mulf %86, %86 : vector<256x128xf32>
    %cst_43 = arith.constant dense<0.000000e+00> : vector<128xf32>
    %98 = vector.multi_reduction <add>, %97, %cst_43 [0] : vector<256x128xf32> to vector<128xf32>
    %99 = vector.shape_cast %98 : vector<128xf32> to vector<1x128xf32>
    %c0_44 = arith.constant 0 : index
    %c0_45 = arith.constant 0 : index
    %c1_46 = arith.constant 1 : index
    %c0_47 = arith.constant 0 : index
    %100 = vector.load %arg8[%c0_44, %c0_45, %c1_46, %c0_47] : memref<1x1x2x128xf32, #tpu.memory_space<vmem>>, vector<1x1x1x128xf32>
    %101 = vector.shape_cast %100 : vector<1x1x1x128xf32> to vector<1x128xf32>
    %102 = vector.shape_cast %99 : vector<1x128xf32> to vector<1x1x1x128xf32>
    tpu.vector_store %arg8[%c0_44, %c0_45, %c1_46, %c0_47], %102 {strides = array<i32>} : memref<1x1x2x128xf32, #tpu.memory_space<vmem>>, vector<1x1x1x128xf32>,
    return
  }
  func.func @transform_0(%arg0: i32, %arg1: i32) -> (i32, i32, i32, i32) {
    %c16_i32 = arith.constant 16 : i32
    %0 = arith.muli %arg1, %c16_i32 : i32
    %c1_i32 = arith.constant 1 : i32
    %1 = arith.subi %0, %c1_i32 : i32
    %c0_i32 = arith.constant 0 : i32
    %2 = arith.maxsi %1, %c0_i32 : i32
    %c0_i32_0 = arith.constant 0 : i32
    %c0_i32_1 = arith.constant 0 : i32
    %c0_i32_2 = arith.constant 0 : i32
    return %arg0, %2, %c0_i32_0, %c0_i32_1 : i32, i32, i32, i32
  }
  func.func @transform_1(%arg0: i32, %arg1: i32) -> (i32, i32, i32, i32) {
    %c0_i32 = arith.constant 0 : i32
    %c0_i32_0 = arith.constant 0 : i32
    %c0_i32_1 = arith.constant 0 : i32
    return %arg0, %arg1, %c0_i32, %c0_i32_0 : i32, i32, i32, i32
  }
  func.func @transform_2(%arg0: i32, %arg1: i32) -> (i32, i32, i32, i32) {
    %c16_i32 = arith.constant 16 : i32
    %0 = arith.muli %arg1, %c16_i32 : i32
    %c16_i32_0 = arith.constant 16 : i32
    %1 = arith.addi %0, %c16_i32_0 : i32
    %c15_i32 = arith.constant 15 : i32
    %2 = arith.minsi %1, %c15_i32 : i32
    %c0_i32 = arith.constant 0 : i32
    %c0_i32_1 = arith.constant 0 : i32
    %c0_i32_2 = arith.constant 0 : i32
    return %arg0, %2, %c0_i32, %c0_i32_1 : i32, i32, i32, i32
  }
  func.func @transform_3(%arg0: i32, %arg1: i32) -> (i32, i32) {
    %c0_i32 = arith.constant 0 : i32
    %c0_i32_0 = arith.constant 0 : i32
    %c0_i32_1 = arith.constant 0 : i32
    return %c0_i32, %c0_i32_0 : i32, i32
  }
  func.func @transform_4(%arg0: i32, %arg1: i32) -> (i32, i32) {
    %c0_i32 = arith.constant 0 : i32
    %c0_i32_0 = arith.constant 0 : i32
    %c0_i32_1 = arith.constant 0 : i32
    return %c0_i32, %c0_i32_0 : i32, i32
  }
  func.func @transform_5(%arg0: i32, %arg1: i32) -> (i32, i32, i32, i32) {
    %c0_i32 = arith.constant 0 : i32
    %c0_i32_0 = arith.constant 0 : i32
    %c0_i32_1 = arith.constant 0 : i32
    return %arg0, %arg1, %c0_i32, %c0_i32_0 : i32, i32, i32, i32
  }
  func.func @transform_6(%arg0: i32, %arg1: i32) -> (i32, i32, i32, i32) {
    %c0_i32 = arith.constant 0 : i32
    %c0_i32_0 = arith.constant 0 : i32
    %c0_i32_1 = arith.constant 0 : i32
    return %arg0, %arg1, %c0_i32, %c0_i32_0 : i32, i32, i32, i32
  }
}

module attributes {stable_mosaic.version = 11 : i64} {
  func.func @_stage3_kernel(%arg0: i32, %arg1: i32, %arg2: memref<1x16x16x128xbf16, #tpu.memory_space<vmem>>, %arg3: memref<1x16x16x8xbf16, #tpu.memory_space<vmem>>, %arg4: memref<8x128xbf16, #tpu.memory_space<vmem>>, %arg5: memref<4x128xf32, #tpu.memory_space<vmem>>, %arg6: memref<1x16x16x128xf32, #tpu.memory_space<vmem>>) attributes {dimension_semantics = [#tpu.dimension_semantics<parallel>, #tpu.dimension_semantics<parallel>], iteration_bounds = array<i64: 2, 1>, scalar_prefetch = 0 : i64, scratch_operands = 0 : i64, tpu.core_type = #tpu.core_type<tc>, window_params = [{transform_indices = @transform_0, window_bounds = array<i64: 1, 16, 16, 128>}, {transform_indices = @transform_1, window_bounds = array<i64: 1, 16, 16, 8>}, {pipeline_mode = #tpu.pipeline_mode<synchronous>, transform_indices = @transform_2, window_bounds = array<i64: 8, 128>}, {pipeline_mode = #tpu.pipeline_mode<synchronous>, transform_indices = @transform_3, window_bounds = array<i64: 4, 128>}, {transform_indices = @transform_4, window_bounds = array<i64: 1, 16, 16, 128>}]} {
    %c0 = arith.constant 0 : index
    %c0_0 = arith.constant 0 : index
    %0 = vector.load %arg5[%c0, %c0_0] : memref<4x128xf32, #tpu.memory_space<vmem>>, vector<1x128xf32>
    %c1 = arith.constant 1 : index
    %c0_1 = arith.constant 0 : index
    %1 = vector.load %arg5[%c1, %c0_1] : memref<4x128xf32, #tpu.memory_space<vmem>>, vector<1x128xf32>
    %c2 = arith.constant 2 : index
    %c0_2 = arith.constant 0 : index
    %2 = vector.load %arg5[%c2, %c0_2] : memref<4x128xf32, #tpu.memory_space<vmem>>, vector<1x128xf32>
    %c3 = arith.constant 3 : index
    %c0_3 = arith.constant 0 : index
    %3 = vector.load %arg5[%c3, %c0_3] : memref<4x128xf32, #tpu.memory_space<vmem>>, vector<1x128xf32>
    %c0_4 = arith.constant 0 : index
    %c0_5 = arith.constant 0 : index
    %c0_6 = arith.constant 0 : index
    %c0_7 = arith.constant 0 : index
    %4 = vector.load %arg2[%c0_4, %c0_5, %c0_6, %c0_7] : memref<1x16x16x128xbf16, #tpu.memory_space<vmem>>, vector<1x16x16x128xbf16>
    %5 = vector.shape_cast %4 : vector<1x16x16x128xbf16> to vector<16x16x128xbf16>
    %6 = arith.extf %5 : vector<16x16x128xbf16> to vector<16x16x128xf32>
    %7 = vector.shape_cast %0 : vector<1x128xf32> to vector<1x1x128xf32>
    %8 = vector.broadcast %7 : vector<1x1x128xf32> to vector<16x16x128xf32>
    %9 = arith.mulf %6, %8 : vector<16x16x128xf32>
    %10 = vector.shape_cast %1 : vector<1x128xf32> to vector<1x1x128xf32>
    %11 = vector.broadcast %10 : vector<1x1x128xf32> to vector<16x16x128xf32>
    %12 = arith.addf %9, %11 : vector<16x16x128xf32>
    %cst = arith.constant 0.000000e+00 : f32
    %13 = vector.broadcast %cst : f32 to vector<16x16x128xf32>
    %14 = arith.maximumf %12, %13 : vector<16x16x128xf32>
    %c0_8 = arith.constant 0 : index
    %c0_9 = arith.constant 0 : index
    %c0_10 = arith.constant 0 : index
    %c0_11 = arith.constant 0 : index
    %15 = vector.load %arg3[%c0_8, %c0_9, %c0_10, %c0_11] : memref<1x16x16x8xbf16, #tpu.memory_space<vmem>>, vector<1x16x16x8xbf16>
    %16 = vector.shape_cast %15 : vector<1x16x16x8xbf16> to vector<16x16x8xbf16>
    %17 = vector.shape_cast %16 : vector<16x16x8xbf16> to vector<256x8xbf16>
    %c0_12 = arith.constant 0 : index
    %c0_13 = arith.constant 0 : index
    %18 = vector.load %arg4[%c0_12, %c0_13] : memref<8x128xbf16, #tpu.memory_space<vmem>>, vector<8x128xbf16>
    %cst_14 = arith.constant dense<0.000000e+00> : vector<256x128xf32>
    %19 = tpu.matmul %17, %18, %cst_14 {dimension_numbers = #tpu.dot_dimension_numbers<[1], [0], [0], [1], [0, 0, 1, 1], [], []>} : vector<256x8xbf16>, vector<8x128xbf16>, vector<256x128xf32> -> vector<256x128xf32>
    %20 = vector.shape_cast %19 : vector<256x128xf32> to vector<16x16x128xf32>
    %21 = vector.shape_cast %2 : vector<1x128xf32> to vector<1x1x128xf32>
    %22 = vector.broadcast %21 : vector<1x1x128xf32> to vector<16x16x128xf32>
    %23 = arith.mulf %20, %22 : vector<16x16x128xf32>
    %24 = vector.shape_cast %3 : vector<1x128xf32> to vector<1x1x128xf32>
    %25 = vector.broadcast %24 : vector<1x1x128xf32> to vector<16x16x128xf32>
    %26 = arith.addf %23, %25 : vector<16x16x128xf32>
    %27 = arith.addf %14, %26 : vector<16x16x128xf32>
    %cst_15 = arith.constant 0.000000e+00 : f32
    %28 = vector.broadcast %cst_15 : f32 to vector<16x16x128xf32>
    %29 = arith.maximumf %27, %28 : vector<16x16x128xf32>
    %c0_16 = arith.constant 0 : index
    %c0_17 = arith.constant 0 : index
    %c0_18 = arith.constant 0 : index
    %c0_19 = arith.constant 0 : index
    %30 = vector.load %arg6[%c0_16, %c0_17, %c0_18, %c0_19] : memref<1x16x16x128xf32, #tpu.memory_space<vmem>>, vector<1x16x16x128xf32>
    %31 = vector.shape_cast %30 : vector<1x16x16x128xf32> to vector<16x16x128xf32>
    %32 = vector.shape_cast %29 : vector<16x16x128xf32> to vector<1x16x16x128xf32>
    tpu.vector_store %arg6[%c0_16, %c0_17, %c0_18, %c0_19], %32 {strides = array<i32>} : memref<1x16x16x128xf32, #tpu.memory_space<vmem>>, vector<1x16x16x128xf32>,
    return
  }
  func.func @transform_0(%arg0: i32, %arg1: i32) -> (i32, i32, i32, i32) {
    %c0_i32 = arith.constant 0 : i32
    %c0_i32_0 = arith.constant 0 : i32
    %c0_i32_1 = arith.constant 0 : i32
    return %arg0, %arg1, %c0_i32, %c0_i32_0 : i32, i32, i32, i32
  }
  func.func @transform_1(%arg0: i32, %arg1: i32) -> (i32, i32, i32, i32) {
    %c0_i32 = arith.constant 0 : i32
    %c0_i32_0 = arith.constant 0 : i32
    %c0_i32_1 = arith.constant 0 : i32
    return %arg0, %arg1, %c0_i32, %c0_i32_0 : i32, i32, i32, i32
  }
  func.func @transform_2(%arg0: i32, %arg1: i32) -> (i32, i32) {
    %c0_i32 = arith.constant 0 : i32
    %c0_i32_0 = arith.constant 0 : i32
    %c0_i32_1 = arith.constant 0 : i32
    return %c0_i32, %c0_i32_0 : i32, i32
  }
  func.func @transform_3(%arg0: i32, %arg1: i32) -> (i32, i32) {
    %c0_i32 = arith.constant 0 : i32
    %c0_i32_0 = arith.constant 0 : i32
    %c0_i32_1 = arith.constant 0 : i32
    return %c0_i32, %c0_i32_0 : i32, i32
  }
  func.func @transform_4(%arg0: i32, %arg1: i32) -> (i32, i32, i32, i32) {
    %c0_i32 = arith.constant 0 : i32
    %c0_i32_0 = arith.constant 0 : i32
    %c0_i32_1 = arith.constant 0 : i32
    return %arg0, %arg1, %c0_i32, %c0_i32_0 : i32, i32, i32, i32
  }
}

</mosaic_0001>

<bundles_post_ra>
// kernel: double_conv.5
= control target key start
LH: loop header
LB: loop body
LE: loop exit
PB: predicated region body
PF: predicated region fallthrough
CT: control target
= control target key end

     0   :  { %s1341_s15 = smov 0   ;;  %s1343_s16 = smov 0   ;;  %s1782_s0 = inlined_call_operand.vmem [shape: bf16[2,16,16,128], index: 0, kind: input, shape index: {}]   ;;  %s1783_s1 = inlined_call_operand.vmem [shape: bf16[2,16,16,8], index: 1, kind: input, shape index: {}]   ;;  %s1784_s2 = inlined_call_operand.vmem [shape: bf16[8,128], index: 2, kind: input, shape index: {}]   ;;  %s1785_s3 = inlined_call_operand.vmem [shape: f32[4,128], index: 3, kind: input, shape index: {}]   ;;  %s1786_s4 = inlined_call_operand.vmem [shape: f32[2,16,16,128], index: 4, kind: output, shape index: {}]  }
   0x1   :  { %s1345_s17 = smov 0  }
   0x2 LB: > { %s26_s18 = sadd.s32 1, %s1310_s16  ;;  %p1070_p0 = scmp.ge.s32.totalorder %s1314_s17, 1  ;;  %s1314_s17 = sphi %s1345_s17, %s14_s17   ;;  %s1310_s16 = sphi %s1343_s16, %s1806_s16   ;;  %s1306_s15 = sphi %s1341_s15, %s1805_s15  }
   0x3   : > { %p28_p1 = scmp.ge.s32.totalorder %s26_s18, 2  ;;  %p202_p2 = scmp.lt.s32.totalorder %s1314_s17, 3 }
   0x5   : > { %s1808_s18 = smov (%p28_p1, %s26_s18), 0  ;;  %p203_p3 = pnand %p1070_p0, %p202_p2 }
   0x6   : > { %v486_v0 = vld [vmem:[%s1784_s2] sm:$0xf] (!%p203_p3)  ;;  %vm616_vm0 = vcmask (!%p203_p3), 1043456   ;;  %p249_p4 = scmp.lt.s32.totalorder (!%p203_p3), %s1306_s15, 1  ;;  %vm567_vm1 = vcmask (!%p203_p3), 64512  }
   0x7   : > { %206 = sbr.rel (%p203_p3) target bundleno = 272 (0x110), region = 36  ;;  %1250 = vmatprep.subr.msk.bf16.mxu0 (!%p203_p3), %vm616_vm0, %v486_v0  ;;  %1251 = vmatprep.subr.msk.bf16.mxu1 (!%p203_p3), %vm616_vm0, %v486_v0  ;;  %v618_v1 = vsel (!%p203_p3), %vm616_vm0, %v486_v0, 0  ;;  %v1420_v25 = vld [vmem:[%s1785_s3] ss:$0 sm:$0xff] (!%p203_p3)  ;;  %v1428_v41 = vld [vmem:[%s1785_s3 + $0x1] ss:$0 sm:$0xff] (!%p203_p3) }
   0x8   : > { %1215 = vmatpush3.bf16.msra.mxu0 (!%p203_p3), %v618_v1  ;;  %1249 = vmatpush3.bf16.msra.mxu1 (!%p203_p3), %v618_v1 }
   0xe   : > { %s1810_s15 = smov (!%p249_p4, %s1306_s15), 1 }
   0xf   : > { %s1115_s21 = sshll.u32 %s1810_s15, 7  ;;  %s1117_s10 = sshll.u32 %s1810_s15, 8 }
  0x10   : > { %s1370_s24 = scalar_lea.vmem %s1783_s1, %s1115_s21  ;;  %s1409_s27 = scalar_lea.vmem %s1782_s0, %s1115_s21 }
  0x11   : > { %v1276_v2 = vld [vmem:[%s1370_s24] sm:$0xff]   ;;  %v1278_v4 = vld [vmem:[%s1370_s24 + $0x8] sm:$0xff]   ;;  %v1280_v6 = vld [vmem:[%s1370_s24 + $0x10] sm:$0xff]   ;;  %s1626_s13 = scalar_lea.vmem %s1786_s4, %s1117_s10 }
  0x12   : > { %v1277_v3 = vld [vmem:[%s1370_s24 + $0x40] sm:$0xff]   ;;  %1216 = vmatprep.mubr.msk.bf16.mxu0 %vm567_vm1, %v1276_v2  ;;  %v1279_v5 = vld [vmem:[%s1370_s24 + $0x48] sm:$0xff]   ;;  %v1281_v7 = vld [vmem:[%s1370_s24 + $0x50] sm:$0xff]  }
  0x13   : > { %1232 = vmatprep.mubr.msk.bf16.mxu1 %vm567_vm1, %v1277_v3  ;;  %1217 = vmatmul.mubr.msk.bf16.vlgmr.msra.gmra.mrb[0].mxu0 %vm567_vm1, %v1278_v4  ;;  %v1282_v8 = vld [vmem:[%s1370_s24 + $0x18] sm:$0xff]   ;;  %v1284_v10 = vld [vmem:[%s1370_s24 + $0x20] sm:$0xff]   ;;  %v1286_v12 = vld [vmem:[%s1370_s24 + $0x28] sm:$0xff]  }
  0x14   : > { %1233 = vmatmul.mubr.msk.bf16.vlgmr.msra.gmra.mrb[0].mxu1 %vm567_vm1, %v1279_v5  ;;  %1220 = vmatprep.mubr.msk.bf16.mxu0 %vm567_vm1, %v1280_v6  ;;  %v1283_v9 = vld [vmem:[%s1370_s24 + $0x58] sm:$0xff]   ;;  %v1285_v11 = vld [vmem:[%s1370_s24 + $0x60] sm:$0xff]   ;;  %v1287_v13 = vld [vmem:[%s1370_s24 + $0x68] sm:$0xff]  }
  0x15   : > { %1236 = vmatprep.mubr.msk.bf16.mxu1 %vm567_vm1, %v1281_v7  ;;  %v1288_v14 = vld [vmem:[%s1370_s24 + $0x30] sm:$0xff]   ;;  %v1290_v16 = vld [vmem:[%s1370_s24 + $0x38] sm:$0xff]   ;;  %v1182_v18 = vld [vmem:[%s1409_s27 + $0x8] sm:$0xff]  }
  0x16   : > { %v1289_v15 = vld [vmem:[%s1370_s24 + $0x70] sm:$0xff]   ;;  %v1291_v17 = vld [vmem:[%s1370_s24 + $0x78] sm:$0xff]   ;;  %v1190_v19 = vld [vmem:[%s1409_s27 + $0x48] sm:$0xff]   ;;  %v1124_v22 = vunpack.c.l.bf16 %v1182_v18  ;;  %v1125_v31 = vunpack.c.h.bf16 %v1182_v18 }
  0x17   : > { %v1119_v20 = vld [vmem:[%s1409_s27] sm:$0xff]   ;;  %v1184_v23 = vld [vmem:[%s1409_s27 + $0x18] sm:$0xff]   ;;  %v1156_v26 = vunpack.c.l.bf16 %v1190_v19  ;;  %v1183_v28 = vld [vmem:[%s1409_s27 + $0x10] sm:$0xff]   ;;  %v1157_v32 = vunpack.c.h.bf16 %v1190_v19 }
  0x18   : > { %v1189_v21 = vld [vmem:[%s1409_s27 + $0x40] sm:$0xff]   ;;  %v1192_v24 = vld [vmem:[%s1409_s27 + $0x58] sm:$0xff]   ;;  %v1120_v27 = vunpack.c.l.bf16 %v1119_v20  ;;  %v1191_v29 = vld [vmem:[%s1409_s27 + $0x50] sm:$0xff]   ;;  %v1121_v33 = vunpack.c.h.bf16 %v1119_v20  ;;  %v1132_v35 = vunpack.c.l.bf16 %v1184_v23  ;;  %v356_v37 = vmul.f32 %v1124_v22, %v1420_v25 }
  0x19   : > { %v1152_v30 = vunpack.c.l.bf16 %v1189_v21  ;;  %v1153_v34 = vunpack.c.h.bf16 %v1189_v21  ;;  %v1164_v36 = vunpack.c.l.bf16 %v1192_v24  ;;  %v1128_v38 = vunpack.c.l.bf16 %v1183_v28  ;;  %v1194_v19 = vld [vmem:[%s1409_s27 + $0x68] sm:$0xff]   ;;  %v1185_v20 = vld [vmem:[%s1409_s27 + $0x20] sm:$0xff]  }
  0x1a   : > { %v1160_v39 = vunpack.c.l.bf16 %v1191_v29  ;;  %v1133_v40 = vunpack.c.h.bf16 %v1184_v23  ;;  %v372_v42 = vmul.f32 %v1156_v26, %v1420_v25  ;;  %v354_v43 = vmul.f32 %v1120_v27, %v1420_v25  ;;  %v1193_v26 = vld [vmem:[%s1409_s27 + $0x60] sm:$0xff]  }
  0x1b   : > { %1221 = vmatmul.mubr.msk.bf16.gmra.mrb[4].mxu0 %vm567_vm1, %v1282_v8  ;;  %v1165_v44 = vunpack.c.h.bf16 %v1192_v24  ;;  %v1129_v45 = vunpack.c.h.bf16 %v1183_v28  ;;  %v370_v46 = vmul.f32 %v1152_v30, %v1420_v25  ;;  %v357_v47 = vmul.f32 %v1125_v31, %v1420_v25  ;;  %v1188_v31 = vld [vmem:[%s1409_s27 + $0x38] sm:$0xff]  }
  0x1c   : > { %1237 = vmatmul.mubr.msk.bf16.gmra.mrb[4].mxu1 %vm567_vm1, %v1283_v9  ;;  %1224 = vmatprep.mubr.msk.bf16.mxu0 %vm567_vm1, %v1284_v10  ;;  %v373_v48 = vmul.f32 %v1157_v32, %v1420_v25  ;;  %v1161_v49 = vunpack.c.h.bf16 %v1191_v29  ;;  %v355_v50 = vmul.f32 %v1121_v33, %v1420_v25  ;;  %v371_v51 = vmul.f32 %v1153_v34, %v1420_v25  ;;  %v1196_v32 = vld [vmem:[%s1409_s27 + $0x78] sm:$0xff]  }
  0x1d   : > { %1240 = vmatprep.mubr.msk.bf16.mxu1 %vm567_vm1, %v1285_v11  ;;  %v360_v52 = vmul.f32 %v1132_v35, %v1420_v25  ;;  %v376_v53 = vmul.f32 %v1164_v36, %v1420_v25  ;;  %v1440_v54 = vadd.f32 %v1428_v41, %v356_v37  ;;  %v358_v55 = vmul.f32 %v1128_v38, %v1420_v25  ;;  %v1187_v37 = vld [vmem:[%s1409_s27 + $0x30] sm:$0xff]  }
  0x1e   : > { %v374_v56 = vmul.f32 %v1160_v39, %v1420_v25  ;;  %v361_v57 = vmul.f32 %v1133_v40, %v1420_v25  ;;  %v1446_v58 = vadd.f32 %v1428_v41, %v372_v42  ;;  %v1449_v59 = vadd.f32 %v1428_v41, %v354_v43  ;;  %v1195_v38 = vld [vmem:[%s1409_s27 + $0x70] sm:$0xff]  }
  0x1f   : > { %v377_v60 = vmul.f32 %v1165_v44, %v1420_v25  ;;  %v359_v61 = vmul.f32 %v1129_v45, %v1420_v25  ;;  %v1454_v62 = vadd.f32 %v1428_v41, %v370_v46  ;;  %v1457_v63 = vadd.f32 %v1428_v41, %v357_v47 }
  0x20   : > { %v1460_v0 = vadd.f32 %v1428_v41, %v373_v48  ;;  %v375_v1 = vmul.f32 %v1161_v49, %v1420_v25  ;;  %v1464_v2 = vadd.f32 %v1428_v41, %v355_v50  ;;  %v1467_v3 = vadd.f32 %v1428_v41, %v371_v51 }
  0x21   : > { %v1470_v4 = vadd.f32 %v1428_v41, %v360_v52  ;;  %v1473_v5 = vadd.f32 %v1428_v41, %v376_v53  ;;  %v424_v6 = vmax.f32 %v1440_v54, 0.0  ;;  %v1477_v7 = vadd.f32 %v1428_v41, %v358_v55 }
  0x22   : > { %v1480_v8 = vadd.f32 %v1428_v41, %v374_v56  ;;  %v1483_v9 = vadd.f32 %v1428_v41, %v361_v57  ;;  %v440_v10 = vmax.f32 %v1446_v58, 0.0  ;;  %v422_v11 = vmax.f32 %v1449_v59, 0.0 }
  0x23   : > { %1225 = vmatmul.mubr.msk.bf16.gmra.mrb[8].mxu0 %vm567_vm1, %v1286_v12  ;;  %v1488_v12 = vadd.f32 %v1428_v41, %v377_v60  ;;  %v1498_v18 = vadd.f32 %v1428_v41, %v375_v1  ;;  %v423_v21 = vmax.f32 %v1464_v2, 0.0  ;;  %v439_v22 = vmax.f32 %v1467_v3, 0.0 }
  0x24   : > { %1241 = vmatmul.mubr.msk.bf16.gmra.mrb[8].mxu1 %vm567_vm1, %v1287_v13  ;;  %1228 = vmatprep.mubr.msk.bf16.mxu0 %vm567_vm1, %v1288_v14  ;;  %v1491_v13 = vadd.f32 %v1428_v41, %v359_v61  ;;  %v1186_v14 = vld [vmem:[%s1409_s27 + $0x28] sm:$0xff]   ;;  %v428_v23 = vmax.f32 %v1470_v4, 0.0  ;;  %v444_v24 = vmax.f32 %v1473_v5, 0.0  ;;  %v426_v27 = vmax.f32 %v1477_v7, 0.0 }
  0x25   : > { %1244 = vmatprep.mubr.msk.bf16.mxu1 %vm567_vm1, %v1289_v15  ;;  %v438_v15 = vmax.f32 %v1454_v62, 0.0  ;;  %v442_v28 = vmax.f32 %v1480_v8, 0.0  ;;  %v429_v29 = vmax.f32 %v1483_v9, 0.0  ;;  %v1140_v30 = vunpack.c.l.bf16 %v1186_v14 }
  0x26   : > { %v1172_v35 = vunpack.c.l.bf16 %v1194_v19  ;;  %v1136_v36 = vunpack.c.l.bf16 %v1185_v20  ;;  %v1168_v40 = vunpack.c.l.bf16 %v1193_v26  ;;  %v1141_v42 = vunpack.c.h.bf16 %v1186_v14 }
  0x27   : > { %v1173_v43 = vunpack.c.h.bf16 %v1194_v19  ;;  %v1137_v44 = vunpack.c.h.bf16 %v1185_v20  ;;  %v1169_v45 = vunpack.c.h.bf16 %v1193_v26  ;;  %v1148_v46 = vunpack.c.l.bf16 %v1188_v31 }
  0x28   : > { %v1180_v47 = vunpack.c.l.bf16 %v1196_v32  ;;  %v364_v48 = vmul.f32 %v1140_v30, %v1420_v25  ;;  %v1144_v49 = vunpack.c.l.bf16 %v1187_v37  ;;  %v1176_v50 = vunpack.c.l.bf16 %v1195_v38 }
  0x29   : > { %v1149_v51 = vunpack.c.h.bf16 %v1188_v31  ;;  %v380_v52 = vmul.f32 %v1172_v35, %v1420_v25  ;;  %v362_v53 = vmul.f32 %v1136_v36, %v1420_v25  ;;  %v1181_v55 = vunpack.c.h.bf16 %v1196_v32 }
  0x2a   : > { %v1145_v56 = vunpack.c.h.bf16 %v1187_v37  ;;  %v378_v57 = vmul.f32 %v1168_v40, %v1420_v25  ;;  %v365_v60 = vmul.f32 %v1141_v42, %v1420_v25  ;;  %v381_v61 = vmul.f32 %v1173_v43, %v1420_v25 }
  0x2b   : > { %1229 = vmatmul.mubr.msk.bf16.gmra.mrb[12].mxu0 %vm567_vm1, %v1290_v16  ;;  %v425_v16 = vmax.f32 %v1457_v63, 0.0  ;;  %v1177_v1 = vunpack.c.h.bf16 %v1195_v38  ;;  %v363_v14 = vmul.f32 %v1137_v44, %v1420_v25  ;;  %v379_v19 = vmul.f32 %v1169_v45, %v1420_v25 }
  0x2c   : > { %1245 = vmatmul.mubr.msk.bf16.gmra.mrb[12].mxu1 %vm567_vm1, %v1291_v17  ;;  %v441_v17 = vmax.f32 %v1460_v0, 0.0  ;;  %v368_v20 = vmul.f32 %v1148_v46, %v1420_v25  ;;  %v384_v26 = vmul.f32 %v1180_v47, %v1420_v25  ;;  %v1528_v30 = vadd.f32 %v1428_v41, %v364_v48 }
  0x2d   : > { %v366_v31 = vmul.f32 %v1144_v49, %v1420_v25  ;;  %v382_v32 = vmul.f32 %v1176_v50, %v1420_v25  ;;  %v369_v35 = vmul.f32 %v1149_v51, %v1420_v25  ;;  %v1534_v36 = vadd.f32 %v1428_v41, %v380_v52 }
  0x2e   : > { %v1537_v37 = vadd.f32 %v1428_v41, %v362_v53  ;;  %v385_v38 = vmul.f32 %v1181_v55, %v1420_v25  ;;  %v367_v40 = vmul.f32 %v1145_v56, %v1420_v25  ;;  %v1542_v42 = vadd.f32 %v1428_v41, %v378_v57  ;;  %v1576_v53 = vld [vmem:[%s1785_s3 + $0x2] ss:$0 sm:$0xff] }
  0x2f   : > { %v1545_v43 = vadd.f32 %v1428_v41, %v365_v60  ;;  %v1548_v44 = vadd.f32 %v1428_v41, %v381_v61  ;;  %v383_v45 = vmul.f32 %v1177_v1, %v1420_v25  ;;  %v1552_v46 = vadd.f32 %v1428_v41, %v363_v14  ;;  %v1589_v61 = vld [vmem:[%s1785_s3 + $0x3] ss:$0 sm:$0xff] }
  0x30   : > { %v1555_v47 = vadd.f32 %v1428_v41, %v379_v19  ;;  %v1558_v48 = vadd.f32 %v1428_v41, %v368_v20  ;;  %v1561_v49 = vadd.f32 %v1428_v41, %v384_v26  ;;  %v1565_v51 = vadd.f32 %v1428_v41, %v366_v31 }
  0x31   : > { %v1568_v52 = vadd.f32 %v1428_v41, %v382_v32  ;;  %v1571_v25 = vadd.f32 %v1428_v41, %v369_v35  ;;  %v1581_v57 = vadd.f32 %v1428_v41, %v385_v38  ;;  %v1584_v60 = vadd.f32 %v1428_v41, %v367_v40 }
  0x32   : > { %v1595_v20 = vadd.f32 %v1428_v41, %v383_v45  ;;  %v1787_v7 = vmax.f32 %v1488_v12, 0.0  ;;  %v1789_v9 = vmax.f32 %v1498_v18, 0.0 }
  0x34   : > { %v451_v41 = vmax.f32 %v1595_v20, 0.0 }
  0xe6   : > { %v1218_v26 = vpop.f32.mrb[0].mxu0 }
  0xe7   : > { %v787_v40 = vmul.f32 %v1218_v26, %v1576_v53  ;;  %v1234_v1 = vpop.f32.mrb[0].mxu1  ;;  %v654_v56 = vpop.f32.mrb[1].mxu0 }
  0xe8   : > { %v803_v45 = vmul.f32 %v1234_v1, %v1576_v53  ;;  %v785_v31 = vmul.f32 %v1576_v53, %v654_v56  ;;  %v718_v55 = vpop.f32.mrb[1].mxu1  ;;  %v1219_v32 = vpop.f32.mrb[2].mxu0 }
  0xe9   : > { %v823_v26 = vadd.f32 %v1589_v61, %v787_v40  ;;  %v801_v50 = vmul.f32 %v1576_v53, %v718_v55  ;;  %v788_v14 = vmul.f32 %v1219_v32, %v1576_v53  ;;  %v1235_v19 = vpop.f32.mrb[2].mxu1  ;;  %v657_v39 = vpop.f32.mrb[3].mxu0 }
  0xea   : > { %v839_v1 = vadd.f32 %v1589_v61, %v803_v45  ;;  %v821_v56 = vadd.f32 %v1589_v61, %v785_v31  ;;  %v804_v34 = vmul.f32 %v1235_v19, %v1576_v53  ;;  %v786_v35 = vmul.f32 %v1576_v53, %v657_v39  ;;  %v721_v38 = vpop.f32.mrb[3].mxu1 }
  0xeb   : > { %v855_v40 = vadd.f32 %v823_v26, %v424_v6  ;;  %v837_v55 = vadd.f32 %v1589_v61, %v801_v50  ;;  %v824_v32 = vadd.f32 %v1589_v61, %v788_v14  ;;  %v802_v33 = vmul.f32 %v1576_v53, %v721_v38 }
  0xec   : > { %v871_v19 = vadd.f32 %v839_v1, %v440_v10  ;;  %v853_v39 = vadd.f32 %v821_v56, %v422_v11  ;;  %v840_v54 = vadd.f32 %v1589_v61, %v804_v34  ;;  %v822_v6 = vadd.f32 %v1589_v61, %v786_v35 }
  0xed   : > { %v887_v50 = vmax.f32 %v855_v40, 0.0  ;;  %v869_v14 = vadd.f32 %v837_v55, %v438_v15  ;;  %v856_v31 = vadd.f32 %v824_v32, %v425_v16  ;;  %v838_v58 = vadd.f32 %v1589_v61, %v802_v33 }
  0xee   : > { %v903_v38 = vmax.f32 %v871_v19, 0.0  ;;  %v885_v10 = vmax.f32 %v853_v39, 0.0  ;;  %v872_v59 = vadd.f32 %v840_v54, %v441_v17  ;;  %v854_v11 = vadd.f32 %v822_v6, %v423_v21  ;;  %v1222_v34 = vpop.f32.mrb[4].mxu0 }
  0xef   : > { %919 = vst [vmem:[%s1626_s13 + $0x10] sm:$0xff] %v887_v50  ;;  %v901_v62 = vmax.f32 %v869_v14, 0.0  ;;  %v888_v15 = vmax.f32 %v856_v31, 0.0  ;;  %v870_v63 = vadd.f32 %v838_v58, %v439_v22  ;;  %v791_v16 = vmul.f32 %v1222_v34, %v1576_v53  ;;  %v1238_v33 = vpop.f32.mrb[4].mxu1  ;;  %v670_v35 = vpop.f32.mrb[5].mxu0 }
  0xf0   : > { %935 = vst [vmem:[%s1626_s13 + $0x90] sm:$0xff] %v903_v38  ;;  %917 = vst [vmem:[%s1626_s13] sm:$0xff] %v885_v10  ;;  %v904_v0 = vmax.f32 %v872_v59, 0.0  ;;  %v886_v2 = vmax.f32 %v854_v11, 0.0  ;;  %v807_v17 = vmul.f32 %v1238_v33, %v1576_v53  ;;  %v789_v21 = vmul.f32 %v1576_v53, %v670_v35  ;;  %v734_v45 = vpop.f32.mrb[5].mxu1  ;;  %v1223_v26 = vpop.f32.mrb[6].mxu0 }
  0xf1   : > { %933 = vst [vmem:[%s1626_s13 + $0x80] sm:$0xff] %v901_v62  ;;  %920 = vst [vmem:[%s1626_s13 + $0x18] sm:$0xff] %v888_v15  ;;  %v902_v3 = vmax.f32 %v870_v63, 0.0  ;;  %v827_v22 = vadd.f32 %v1589_v61, %v791_v16  ;;  %v805_v1 = vmul.f32 %v1576_v53, %v734_v45  ;;  %v792_v56 = vmul.f32 %v1223_v26, %v1576_v53  ;;  %v1239_v40 = vpop.f32.mrb[6].mxu1  ;;  %v673_v55 = vpop.f32.mrb[7].mxu0 }
  0xf2   : > { %936 = vst [vmem:[%s1626_s13 + $0x98] sm:$0xff] %v904_v0  ;;  %918 = vst [vmem:[%s1626_s13 + $0x8] sm:$0xff] %v886_v2  ;;  %v843_v32 = vadd.f32 %v1589_v61, %v807_v17  ;;  %v825_v19 = vadd.f32 %v1589_v61, %v789_v21  ;;  %v808_v39 = vmul.f32 %v1239_v40, %v1576_v53  ;;  %v737_v6 = vpop.f32.mrb[7].mxu1  ;;  %v1788_v15 = vmax.f32 %v1491_v13, 0.0 }
  0xf3   : > { %v790_v54 = vmul.f32 %v1576_v53, %v673_v55  ;;  %934 = vst [vmem:[%s1626_s13 + $0x88] sm:$0xff] %v902_v3  ;;  %v859_v50 = vadd.f32 %v827_v22, %v428_v23  ;;  %v841_v14 = vadd.f32 %v1589_v61, %v805_v1  ;;  %v828_v31 = vadd.f32 %v1589_v61, %v792_v56 }
  0xf4   : > { %v806_v58 = vmul.f32 %v1576_v53, %v737_v6  ;;  %v875_v38 = vadd.f32 %v843_v32, %v444_v24  ;;  %v857_v10 = vadd.f32 %v825_v19, %v426_v27  ;;  %v844_v59 = vadd.f32 %v1589_v61, %v808_v39 }
  0xf5   : > { %v826_v11 = vadd.f32 %v1589_v61, %v790_v54  ;;  %v891_v34 = vmax.f32 %v859_v50, 0.0  ;;  %v873_v4 = vadd.f32 %v841_v14, %v442_v28  ;;  %v860_v23 = vadd.f32 %v828_v31, %v429_v29 }
  0xf6   : > { %v842_v62 = vadd.f32 %v1589_v61, %v806_v58  ;;  %v907_v5 = vmax.f32 %v875_v38, 0.0  ;;  %v889_v24 = vmax.f32 %v857_v10, 0.0  ;;  %v876_v27 = vadd.f32 %v844_v59, %v1787_v7  ;;  %v1226_v16 = vpop.f32.mrb[8].mxu0 }
  0xf7   : > { %v858_v63 = vadd.f32 %v826_v11, %v1788_v15  ;;  %923 = vst [vmem:[%s1626_s13 + $0x30] sm:$0xff] %v891_v34  ;;  %v905_v8 = vmax.f32 %v873_v4, 0.0  ;;  %v892_v28 = vmax.f32 %v860_v23, 0.0  ;;  %v795_v29 = vmul.f32 %v1226_v16, %v1576_v53  ;;  %v1242_v35 = vpop.f32.mrb[8].mxu1  ;;  %v686_v0 = vpop.f32.mrb[9].mxu0 }
  0xf8   : > { %v874_v33 = vadd.f32 %v842_v62, %v1789_v9  ;;  %939 = vst [vmem:[%s1626_s13 + $0xb0] sm:$0xff] %v907_v5  ;;  %921 = vst [vmem:[%s1626_s13 + $0x20] sm:$0xff] %v889_v24  ;;  %v908_v12 = vmax.f32 %v876_v27, 0.0  ;;  %v811_v2 = vmul.f32 %v1242_v35, %v1576_v53  ;;  %v793_v17 = vmul.f32 %v1576_v53, %v686_v0  ;;  %v750_v21 = vpop.f32.mrb[9].mxu1  ;;  %v1227_v45 = vpop.f32.mrb[10].mxu0 }
  0xf9   : > { %v890_v13 = vmax.f32 %v858_v63, 0.0  ;;  %937 = vst [vmem:[%s1626_s13 + $0xa0] sm:$0xff] %v905_v8  ;;  %924 = vst [vmem:[%s1626_s13 + $0x38] sm:$0xff] %v892_v28  ;;  %v831_v26 = vadd.f32 %v1589_v61, %v795_v29  ;;  %v809_v3 = vmul.f32 %v1576_v53, %v750_v21  ;;  %v796_v22 = vmul.f32 %v1227_v45, %v1576_v53  ;;  %v1243_v1 = vpop.f32.mrb[10].mxu1  ;;  %v689_v56 = vpop.f32.mrb[11].mxu0 }
  0xfa   : > { %v906_v18 = vmax.f32 %v874_v33, 0.0  ;;  %940 = vst [vmem:[%s1626_s13 + $0xb8] sm:$0xff] %v908_v12  ;;  %v847_v40 = vadd.f32 %v1589_v61, %v811_v2  ;;  %v829_v55 = vadd.f32 %v1589_v61, %v793_v17  ;;  %v812_v32 = vmul.f32 %v1243_v1, %v1576_v53  ;;  %v753_v39 = vpop.f32.mrb[11].mxu1 }
  0xfb   : > { %922 = vst [vmem:[%s1626_s13 + $0x28] sm:$0xff] %v890_v13  ;;  %v794_v19 = vmul.f32 %v1576_v53, %v689_v56  ;;  %v1790_v54 = vmax.f32 %v1528_v30, 0.0  ;;  %v845_v50 = vadd.f32 %v1589_v61, %v809_v3  ;;  %v832_v14 = vadd.f32 %v1589_v61, %v796_v22 }
  0xfc   : > { %938 = vst [vmem:[%s1626_s13 + $0xa8] sm:$0xff] %v906_v18  ;;  %v810_v31 = vmul.f32 %v1576_v53, %v753_v39  ;;  %v1791_v58 = vmax.f32 %v1534_v36, 0.0  ;;  %v1792_v10 = vmax.f32 %v1537_v37, 0.0  ;;  %v848_v11 = vadd.f32 %v1589_v61, %v812_v32 }
  0xfd   : > { %v863_v6 = vadd.f32 %v831_v26, %v1790_v54  ;;  %v830_v34 = vadd.f32 %v1589_v61, %v794_v19  ;;  %v1793_v30 = vmax.f32 %v1542_v42, 0.0  ;;  %v1794_v62 = vmax.f32 %v1545_v43, 0.0 }
  0xfe   : > { %v879_v38 = vadd.f32 %v847_v40, %v1791_v58  ;;  %v861_v59 = vadd.f32 %v829_v55, %v1792_v10  ;;  %v846_v24 = vadd.f32 %v1589_v61, %v810_v31  ;;  %v1795_v37 = vmax.f32 %v1548_v44, 0.0  ;;  %v1230_v16 = vpop.f32.mrb[12].mxu0 }
  0xff   : > { %v895_v4 = vmax.f32 %v863_v6, 0.0  ;;  %v877_v23 = vadd.f32 %v845_v50, %v1793_v30  ;;  %v864_v5 = vadd.f32 %v832_v14, %v1794_v62  ;;  %v1796_v15 = vmax.f32 %v1552_v46, 0.0  ;;  %v1246_v33 = vpop.f32.mrb[12].mxu1  ;;  %v702_v29 = vpop.f32.mrb[13].mxu0 }
 0x100   : > { %v911_v36 = vmax.f32 %v879_v38, 0.0  ;;  %v893_v7 = vmax.f32 %v861_v59, 0.0  ;;  %v880_v27 = vadd.f32 %v848_v11, %v1795_v37  ;;  %v1797_v43 = vmax.f32 %v1555_v47, 0.0  ;;  %v766_v12 = vpop.f32.mrb[13].mxu1  ;;  %v1231_v13 = vpop.f32.mrb[14].mxu0 }
 0x101   : > { %v862_v63 = vadd.f32 %v830_v34, %v1796_v15  ;;  %927 = vst [vmem:[%s1626_s13 + $0x50] sm:$0xff] %v895_v4  ;;  %v909_v42 = vmax.f32 %v877_v23, 0.0  ;;  %v896_v8 = vmax.f32 %v864_v5, 0.0  ;;  %v799_v9 = vmul.f32 %v1230_v16, %v1576_v53  ;;  %v1247_v45 = vpop.f32.mrb[14].mxu1  ;;  %v705_v18 = vpop.f32.mrb[15].mxu0 }
 0x102   : > { %v878_v28 = vadd.f32 %v846_v24, %v1797_v43  ;;  %943 = vst [vmem:[%s1626_s13 + $0xd0] sm:$0xff] %v911_v36  ;;  %925 = vst [vmem:[%s1626_s13 + $0x40] sm:$0xff] %v893_v7  ;;  %v912_v44 = vmax.f32 %v880_v27, 0.0  ;;  %v815_v35 = vmul.f32 %v1246_v33, %v1576_v53  ;;  %v797_v0 = vmul.f32 %v1576_v53, %v702_v29  ;;  %v769_v56 = vpop.f32.mrb[15].mxu1 }
 0x103   : > { %v894_v46 = vmax.f32 %v862_v63, 0.0  ;;  %941 = vst [vmem:[%s1626_s13 + $0xc0] sm:$0xff] %v909_v42  ;;  %928 = vst [vmem:[%s1626_s13 + $0x58] sm:$0xff] %v896_v8  ;;  %v835_v2 = vadd.f32 %v1589_v61, %v799_v9  ;;  %v813_v17 = vmul.f32 %v1576_v53, %v766_v12  ;;  %v800_v21 = vmul.f32 %v1231_v13, %v1576_v53 }
 0x104   : > { %v910_v47 = vmax.f32 %v878_v28, 0.0  ;;  %944 = vst [vmem:[%s1626_s13 + $0xd8] sm:$0xff] %v912_v44  ;;  %v851_v26 = vadd.f32 %v1589_v61, %v815_v35  ;;  %v833_v3 = vadd.f32 %v1589_v61, %v797_v0  ;;  %v816_v22 = vmul.f32 %v1247_v45, %v1576_v53 }
 0x105   : > { %926 = vst [vmem:[%s1626_s13 + $0x48] sm:$0xff] %v894_v46  ;;  %v798_v1 = vmul.f32 %v1576_v53, %v705_v18  ;;  %v1798_v40 = vmax.f32 %v1558_v48, 0.0  ;;  %v849_v32 = vadd.f32 %v1589_v61, %v813_v17  ;;  %v836_v19 = vadd.f32 %v1589_v61, %v800_v21 }
 0x106   : > { %942 = vst [vmem:[%s1626_s13 + $0xc8] sm:$0xff] %v910_v47  ;;  %v814_v39 = vmul.f32 %v1576_v53, %v769_v56  ;;  %v1799_v54 = vmax.f32 %v1561_v49, 0.0  ;;  %v1800_v50 = vmax.f32 %v1565_v51, 0.0  ;;  %v852_v31 = vadd.f32 %v1589_v61, %v816_v22 }
 0x107   : > { %v867_v55 = vadd.f32 %v835_v2, %v1798_v40  ;;  %v834_v48 = vadd.f32 %v1589_v61, %v798_v1  ;;  %v1801_v38 = vmax.f32 %v1568_v52, 0.0  ;;  %v1802_v59 = vmax.f32 %v1571_v25, 0.0 }
 0x108   : > { %v883_v6 = vadd.f32 %v851_v26, %v1799_v54  ;;  %v865_v14 = vadd.f32 %v833_v3, %v1800_v50  ;;  %v850_v49 = vadd.f32 %v1589_v61, %v814_v39  ;;  %v1803_v34 = vmax.f32 %v1581_v57, 0.0 }
 0x109   : > { %v899_v58 = vmax.f32 %v867_v55, 0.0  ;;  %v881_v10 = vadd.f32 %v849_v32, %v1801_v38  ;;  %v868_v53 = vadd.f32 %v836_v19, %v1802_v59  ;;  %v1804_v30 = vmax.f32 %v1584_v60, 0.0 }
 0x10a   : > { %v915_v51 = vmax.f32 %v883_v6, 0.0  ;;  %v897_v11 = vmax.f32 %v865_v14, 0.0  ;;  %v884_v4 = vadd.f32 %v852_v31, %v1803_v34  ;;  %v882_v25 = vadd.f32 %v850_v49, %v451_v41 }
 0x10b   : > { %v866_v23 = vadd.f32 %v834_v48, %v1804_v30  ;;  %931 = vst [vmem:[%s1626_s13 + $0x70] sm:$0xff] %v899_v58  ;;  %v913_v52 = vmax.f32 %v881_v10, 0.0  ;;  %v900_v62 = vmax.f32 %v868_v53, 0.0 }
 0x10c   : > { %947 = vst [vmem:[%s1626_s13 + $0xf0] sm:$0xff] %v915_v51  ;;  %929 = vst [vmem:[%s1626_s13 + $0x60] sm:$0xff] %v897_v11  ;;  %v916_v61 = vmax.f32 %v884_v4, 0.0  ;;  %v914_v24 = vmax.f32 %v882_v25, 0.0 }
 0x10d   : > { %v898_v5 = vmax.f32 %v866_v23, 0.0  ;;  %945 = vst [vmem:[%s1626_s13 + $0xe0] sm:$0xff] %v913_v52  ;;  %932 = vst [vmem:[%s1626_s13 + $0x78] sm:$0xff] %v900_v62 }
 0x10e   : > { %948 = vst [vmem:[%s1626_s13 + $0xf8] sm:$0xff] %v916_v61  ;;  %946 = vst [vmem:[%s1626_s13 + $0xe8] sm:$0xff] %v914_v24 }
 0x10f   : > { %930 = vst [vmem:[%s1626_s13 + $0x68] sm:$0xff] %v898_v5 }
 0x110 PF: > { %s14_s17 = sadd.s32 1, %s1314_s17   ;;  %s1805_s15 = smov %s1310_s16 }
 0x111   : > { %p11_p5 = scmp.ge.s32.totalorder %s14_s17, 4   ;;  %s1806_s16 = smov %s1808_s18 }
 0x113   :  { %13 = sbr.rel (!%p11_p5) target bundleno = 2 (0x2), region = 69 }

// kernel: double_conv.3
= control target key start
LH: loop header
LB: loop body
LE: loop exit
PB: predicated region body
PF: predicated region fallthrough
CT: control target
= control target key end

     0   :  { %s3249_s21 = smov 0   ;;  %s3251_s22 = smov 0   ;;  %s4028_s0 = inlined_call_operand.vmem [shape: bf16[2,16,16,8], index: 0, kind: input, shape index: {}, may-alias: {0,1,2}]   ;;  %s4029_s1 = inlined_call_operand.vmem [shape: bf16[2,16,16,8], index: 1, kind: input, shape index: {}, may-alias: {0,1,2}]   ;;  %s4030_s2 = inlined_call_operand.vmem [shape: bf16[2,16,16,8], index: 2, kind: input, shape index: {}, may-alias: {0,1,2}]   ;;  %s4031_s3 = inlined_call_operand.vmem [shape: bf16[72,128], index: 3, kind: input, shape index: {}]   ;;  %s4032_s4 = inlined_call_operand.vmem [shape: bf16[8,128], index: 4, kind: input, shape index: {}]   ;;  %s4033_s5 = inlined_call_operand.vmem [shape: bf16[2,16,16,128], index: 5, kind: output, shape index: {0}]   ;;  %s4034_s6 = inlined_call_operand.vmem [shape: f32[2,1,4,128], index: 6, kind: output, shape index: {1}]  }
   0x1   :  { %s3253_s23 = smov 0  }
   0x2 LB: > { %s29_s24 = sadd.s32 1, %s3200_s22  ;;  %p2749_p0 = scmp.ge.s32.totalorder %s3204_s23, 1  ;;  %s3204_s23 = sphi %s3253_s23, %s17_s23   ;;  %s3200_s22 = sphi %s3251_s22, %s4038_s22   ;;  %s3196_s21 = sphi %s3249_s21, %s4037_s21  }
   0x3   : > { %p31_p1 = scmp.ge.s32.totalorder %s29_s24, 2  ;;  %p303_p2 = scmp.lt.s32.totalorder %s3204_s23, 3 }
   0x5   : > { %s4040_s24 = smov (%p31_p1, %s29_s24), 0  ;;  %p304_p3 = pnand %p2749_p0, %p303_p2 }
   0x6   : > { %p380_p4 = scmp.lt.s32.totalorder (!%p304_p3), %s3196_s21, 1  ;;  %vm765_vm0 = vsmask.f32 (!%p304_p3), 256  ;;  %vm764_vm1 = vcmask (!%p304_p3), 1040384   ;;  %s3206_s8 = smov (!%p304_p3), 24   ;;  %vm1028_vm3 = vcmask (!%p304_p3), 1046528  }
   0x7   : > { %307 = sbr.rel (%p304_p3) target bundleno = 631 (0x277), region = 40  ;;  %vm3285_vm2 = vmand (!%p304_p3), %vm764_vm1, %vm765_vm0  ;;  %v3154_v34 = vld [vmem:[%s4031_s3] sm:$0xff] (!%p304_p3)   ;;  %s3207_s11 = smov (!%p304_p3), 48   ;;  %v3155_v40 = vld [vmem:[%s4031_s3 + $0x8] sm:$0xff] (!%p304_p3)   ;;  %vm803_vm4 = vsmask.f32 (!%p304_p3), 7424 }
   0x8   : > { %3035 = vmatprep.subr.bf16.mxu0 (!%p304_p3), %v3154_v34  ;;  %v3156_v45 = vld [vmem:[%s4031_s3 + $0x10] sm:$0xff] (!%p304_p3)   ;;  %s3208_s16 = smov (!%p304_p3), 16   ;;  %s3209_s17 = smov (!%p304_p3), 40   ;;  %v3158_v58 = vld [vmem:[%s4031_s3 + $0x18] sm:$0xff] (!%p304_p3)   ;;  %vm1700_vm5 = vcmask (!%p304_p3), 1043456   ;;  %vm1367_vm6 = vcmask (!%p304_p3), 64512  }
   0x9   : > { %3036 = vmatpush3.bf16.msra.mxu0 (!%p304_p3), %v3154_v34  ;;  %s3210_s20 = smov (!%p304_p3), 8   ;;  %s3211_s26 = smov (!%p304_p3), 32   ;;  %vm1400_vm7 = vcmask (!%p304_p3), 130048   ;;  %vm1433_vm8 = vcmask (!%p304_p3), 195584   ;;  %vm1466_vm9 = vcmask (!%p304_p3), 261120   ;;  %vm1499_vm10 = vcmask (!%p304_p3), 326656  }
   0xa   : > { %3037 = vmatprep.subr.bf16.mxu0 (!%p304_p3), %v3155_v40  ;;  %s3212_s27 = smov (!%p304_p3), 56   ;;  %s3213_s29 = smov (!%p304_p3), 64   ;;  %vm1532_vm11 = vcmask (!%p304_p3), 392192   ;;  %vm1565_vm12 = vcmask (!%p304_p3), 457728   ;;  %vm1598_vm13 = vcmask (!%p304_p3), 523264   ;;  %vm1667_vm14 = vcmask (!%p304_p3), 588800  }
   0xd   : > { %3038 = vmatpush3.bf16.msra.mxu0 (!%p304_p3), %v3155_v40 }
   0xe   : > { %s4042_s21 = smov (!%p380_p4, %s3196_s21), 1  ;;  %3039 = vmatprep.subr.bf16.mxu0 %v3156_v45 }
   0xf   : > { %s3270_s25 = sshll.u32 %s4042_s21, 7 }
  0x10   : > { %s3276_s28 = scalar_lea.vmem %s4029_s1, %s3270_s25  ;;  %s388_s7 = scalar_lea.vmem %s4028_s0, %s3270_s25 }
  0x11   : > { %v3145_v0 = vld [vmem:[%s3276_s28 + $0x8] sm:$0xff]   ;;  %v3146_v1 = vld [vmem:[%s3276_s28] sm:$0xff]   ;;  %v3147_v6 = vld [vmem:[%s3276_s28 + $0x10] sm:$0xff]   ;;  %3040 = vmatpush3.bf16.msra.mxu0 %v3156_v45  ;;  %s2867_s12 = sadd.s32 120, %s3270_s25 }
  0x12   : > { %v617_v2 = vshrl.u32 %v3145_v0, 16  ;;  %v620_v3 = vshll.u32 %v3145_v0, 16  ;;  %v610_v4 = vshrl.u32 %v3146_v1, 16  ;;  %v613_v5 = vshll.u32 %v3146_v1, 16  ;;  %v440_v7 = vld [vmem:[%s388_s7] sm:$0xf]  ;;  %3041 = vmatprep.subr.bf16.mxu0 %v3158_v58  ;;  %s416_s15 = scalar_lea.vmem %s4030_s2, %s2867_s12 }
  0x13   : > { %v441_v9 = vld [vmem:[%s388_s7 + $0x4] sm:$0xf]  ;;  %v458_v10 = vmul.bf16 0.0, %v440_v7  ;;  %v624_v13 = vshrl.u32 %v3147_v6, 16  ;;  %v627_v14 = vshll.u32 %v3147_v6, 16  ;;  %v3148_v50 = vld [vmem:[%s3276_s28 + $0x18] sm:$0xff]  }
  0x14   : > { %v619_v8 = vrot.slane %v617_v2, 7  ;;  %v612_v12 = vrot.slane %v610_v4, 7  ;;  %v459_v15 = vmul.bf16 0.0, %v441_v9  ;;  %v631_v4 = vshrl.u32 %v3148_v50, 16 }
  0x15   : > { %v626_v18 = vrot.slane %v624_v13, 7  ;;  %3042 = vmatpush3.bf16.msra.mxu0 %v3158_v58 }
  0x16   : > { %v622_v16 = vor.u32 %v620_v3, %v619_v8  ;;  %v615_v17 = vor.u32 %v613_v5, %v612_v12  ;;  %v786_v19 = vsel %vm3285_vm2, %v612_v12, 0  ;;  %v2759_v21 = vcombine.low %v458_v10, %v459_v15 }
  0x17   : > { %v629_v23 = vor.u32 %v627_v14, %v626_v18  ;;  %v787_v24 = vsel %vm3285_vm2, %v619_v8, 0  ;;  %v1033_v26 = vrot.slane %v786_v19, 1  ;;  %v824_v28 = vshll.u32 %v786_v19, 16 }
  0x18   : > { %v3293_v20 = vsel %vm3285_vm2, 0, %v622_v16  ;;  %v3299_v22 = vsel %vm3285_vm2, 0, %v615_v17  ;;  %v603_v31 = vshrl.u32 %v2759_v21, 16  ;;  %v606_v32 = vshll.u32 %v2759_v21, 16  ;;  %v3149_v16 = vld [vmem:[%s3276_s28 + $0x20] sm:$0xff]  }
  0x19   : > { %1177 = vrot.lane.b32.xlu1 %v3293_v20, %s3206_s8  ;;  %1175 = vrot.lane.b32.xlu0 %v3299_v22, %s3206_s8  ;;  %v1032_v25 = vrot.slane %v3299_v22, 1  ;;  %v819_v27 = vshll.u32 %v3299_v22, 16  ;;  %v3309_v29 = vsel %vm3285_vm2, 0, %v629_v23  ;;  %v817_v30 = vshrl.u32 %v3299_v22, 16 }
  0x1a   : > { %v1035_v35 = vrot.slane %v3293_v20, 1  ;;  %v1036_v36 = vrot.slane %v787_v24, 1  ;;  %v605_v37 = vrot.slane %v603_v31, 7  ;;  %v831_v39 = vshll.u32 %v3293_v20, 16 }
  0x1b   : > { %v821_v33 = vrot.slane %v819_v27, 1  ;;  %v1034_v38 = vsel %vm1028_vm3, %v1032_v25, %v1033_v26  ;;  %v826_v42 = vrot.slane %v824_v28, 1  ;;  %v829_v48 = vshrl.u32 %v3293_v20, 16 }
  0x1c   : > { %v608_v43 = vor.u32 %v606_v32, %v605_v37  ;;  %v785_v44 = vsel %vm3285_vm2, %v605_v37, 0  ;;  %v3332_v46 = vsel %vm1028_vm3, %v1035_v35, %v1036_v36  ;;  %v836_v49 = vshll.u32 %v787_v24, 16 }
  0x1d   : > { %1273 = vrot.lane.b32.xlu1 %v3309_v29, %s3207_s11  ;;  %1271 = vrot.lane.b32.xlu0 %v3293_v20, %s3207_s11  ;;  %v822_v41 = vor.u32 %v821_v33, %v817_v30  ;;  %v1030_v52 = vrot.slane %v785_v44, 1  ;;  %v833_v53 = vrot.slane %v831_v39, 1  ;;  %v843_v54 = vshll.u32 %v3309_v29, 16  ;;  %v3159_v33 = vld [vmem:[%s4031_s3 + $0x20] ss:$0 sps:$4 sm:$0xff]  }
  0x1e   : > { %v3336_v47 = vsel %vm3285_vm2, 0, %v608_v43  ;;  %v788_v56 = vsel %vm3285_vm2, %v626_v18, 0  ;;  %v838_v59 = vrot.slane %v836_v49, 1  ;;  %v841_v60 = vshrl.u32 %v3309_v29, 16  ;;  %3111 = vmatprep.subr.msk.bf16.mxu0 %vm1700_vm5, %v3159_v33  ;;  %v3150_v43 = vld [vmem:[%s3276_s28 + $0x28] sm:$0xff]  }
  0x1f   : > { %v1029_v51 = vrot.slane %v3336_v47, 1  ;;  %v827_v55 = vsel %vm803_vm4, %v822_v41, %v826_v42  ;;  %v807_v57 = vshll.u32 %v3336_v47, 16  ;;  %v834_v62 = vor.u32 %v833_v53, %v829_v48 }
  0x20   : > { %v845_v63 = vrot.slane %v843_v54, 1  ;;  %v848_v0 = vshll.u32 %v788_v56, 16  ;;  %v805_v1 = vshrl.u32 %v3336_v47, 16  ;;  %v812_v3 = vshll.u32 %v785_v44, 16 }
  0x21   : > { %1145 = vrot.lane.b32.xlu1 %v1034_v38, %s3208_s16  ;;  %1239 = vrot.lane.b32.xlu0 %v1034_v38, %s3209_s17  ;;  %v1031_v61 = vsel %vm1028_vm3, %v1029_v51, %v1030_v52  ;;  %v809_v2 = vrot.slane %v807_v57, 1  ;;  %v839_v5 = vsel %vm803_vm4, %v834_v62, %v838_v59  ;;  %v633_v10 = vrot.slane %v631_v4, 7 }
  0x22   : > { %v846_v6 = vor.u32 %v845_v63, %v841_v60  ;;  %v850_v7 = vrot.slane %v848_v0, 1  ;;  %v814_v9 = vrot.slane %v812_v3, 1  ;;  %v634_v12 = vshll.u32 %v3148_v50, 16 }
  0x23   : > { %v810_v8 = vor.u32 %v809_v2, %v805_v1  ;;  %v1038_v17 = vrot.slane %v3309_v29, 1  ;;  %v1039_v18 = vrot.slane %v788_v56, 1  ;;  %v638_v21 = vshrl.u32 %v3149_v16, 16  ;;  %v3151_v56 = vld [vmem:[%s3276_s28 + $0x30] sm:$0xff]  }
  0x24   : > { %v851_v13 = vsel %vm803_vm4, %v846_v6, %v850_v7  ;;  %v636_v15 = vor.u32 %v634_v12, %v633_v10  ;;  %v789_v23 = vsel %vm3285_vm2, %v633_v10, 0  ;;  %v641_v27 = vshll.u32 %v3149_v16, 16 }
  0x25   : > { %1241 = vrot.lane.b32.xlu1 %v3332_v46, %s3209_s17  ;;  %1113 = vrot.lane.b32.xlu0 %v827_v55, %s3210_s20  ;;  %v815_v14 = vsel %vm803_vm4, %v810_v8, %v814_v9  ;;  %v1040_v25 = vsel %vm1028_vm3, %v1038_v17, %v1039_v18  ;;  %v640_v26 = vrot.slane %v638_v21, 7  ;;  %v860_v28 = vshll.u32 %v789_v23, 16 }
  0x26   : > { %v3369_v19 = vsel %vm3285_vm2, 0, %v636_v15  ;;  %v1702_v37 = vsel %vm1700_vm5, %v3159_v33, 0  ;;  %v1042_v40 = vrot.slane %v789_v23, 1  ;;  %v645_v49 = vshrl.u32 %v3150_v43, 16  ;;  %v3152_v15 = vld [vmem:[%s3276_s28 + $0x38] sm:$0xff]  }
  0x27   : > { %v855_v24 = vshll.u32 %v3369_v19, 16  ;;  %v853_v30 = vshrl.u32 %v3369_v19, 16  ;;  %v643_v32 = vor.u32 %v641_v27, %v640_v26  ;;  %v862_v35 = vrot.slane %v860_v28, 1  ;;  %3044 = vmatpush3.bf16.msra.mxu0 %v1702_v37 }
  0x28   : > { %v1041_v39 = vrot.slane %v3369_v19, 1  ;;  %v790_v42 = vsel %vm3285_vm2, %v640_v26, 0  ;;  %v647_v52 = vrot.slane %v645_v49, 7  ;;  %v648_v53 = vshll.u32 %v3150_v43, 16 }
  0x29   : > { %1143 = vrot.lane.b32.xlu1 %v1031_v61, %s3208_s16  ;;  %1207 = vrot.lane.b32.xlu0 %v827_v55, %s3211_s26  ;;  %v857_v31 = vrot.slane %v855_v24, 1  ;;  %v3389_v36 = vsel %vm3285_vm2, 0, %v643_v32  ;;  %v872_v48 = vshll.u32 %v790_v42, 16  ;;  %v1045_v58 = vrot.slane %v790_v42, 1 }
  0x2a   : > { %v867_v41 = vshll.u32 %v3389_v36, 16  ;;  %v1043_v44 = vsel %vm1028_vm3, %v1041_v39, %v1042_v40  ;;  %v865_v45 = vshrl.u32 %v3389_v36, 16  ;;  %v650_v55 = vor.u32 %v648_v53, %v647_v52 }
  0x2b   : > { %v858_v34 = vor.u32 %v857_v31, %v853_v30  ;;  %v874_v51 = vrot.slane %v872_v48, 1  ;;  %v1044_v57 = vrot.slane %v3389_v36, 1  ;;  %v652_v60 = vshrl.u32 %v3151_v56, 16  ;;  %v3153_v31 = vld [vmem:[%s3276_s28 + $0x40] sm:$0xff]  }
  0x2c   : > { %v3420_v59 = vsel %vm3285_vm2, 0, %v650_v55  ;;  %v791_v63 = vsel %vm3285_vm2, %v647_v52, 0  ;;  %v655_v1 = vshll.u32 %v3151_v56, 16  ;;  %v659_v23 = vshrl.u32 %v3152_v15, 16  ;;  %v3157_v55 = vld [vmem:[%s3276_s28 + $0x48] sm:$0xff]  }
  0x2d   : > { %1209 = vrot.lane.b32.xlu1 %v839_v5, %s3211_s26  ;;  %1303 = vrot.lane.b32.xlu0 %v839_v5, %s3212_s27  ;;  %v863_v38 = vsel %vm803_vm4, %v858_v34, %v862_v35  ;;  %v879_v61 = vshll.u32 %v3420_v59, 16  ;;  %v1046_v62 = vsel %vm1028_vm3, %v1044_v57, %v1045_v58  ;;  %v654_v0 = vrot.slane %v652_v60, 7 }
  0x2e   : > { %v877_v2 = vshrl.u32 %v3420_v59, 16  ;;  %v884_v4 = vshll.u32 %v791_v63, 16  ;;  %v1047_v10 = vrot.slane %v3420_v59, 1  ;;  %v1048_v12 = vrot.slane %v791_v63, 1 }
  0x2f   : > { %v881_v3 = vrot.slane %v879_v61, 1  ;;  %v661_v26 = vrot.slane %v659_v23, 7  ;;  %v662_v27 = vshll.u32 %v3152_v15, 16  ;;  %v666_v35 = vshrl.u32 %v3153_v31, 16 }
  0x30   : > { %v886_v7 = vrot.slane %v884_v4, 1  ;;  %v1049_v16 = vsel %vm1028_vm3, %v1047_v10, %v1048_v12  ;;  %v673_v61 = vshrl.u32 %v3157_v55, 16 }
  0x31   : > { %1305 = vrot.lane.b32.xlu1 %v851_v13, %s3212_s27  ;;  %1111 = vrot.lane.b32.xlu0 %v815_v14, %s3210_s20  ;;  %v882_v6 = vor.u32 %v881_v3, %v877_v2  ;;  %v792_v14 = vsel %vm3285_vm2, %v654_v0, 0  ;;  %v664_v30 = vor.u32 %v662_v27, %v661_v26  ;;  %v793_v39 = vsel %vm3285_vm2, %v661_v26, 0 }
  0x32   : > { %v896_v21 = vshll.u32 %v792_v14, 16  ;;  %v1051_v33 = vrot.slane %v792_v14, 1  ;;  %v668_v40 = vrot.slane %v666_v35, 7  ;;  %v1054_v52 = vrot.slane %v793_v39, 1 }
  0x33   : > { %v887_v9 = vsel %vm803_vm4, %v882_v6, %v886_v7  ;;  %v3464_v34 = vsel %vm3285_vm2, 0, %v664_v30  ;;  %v676_v2 = vshll.u32 %v3157_v55, 16  ;;  %v3160_v7 = vld [vmem:[%s3276_s28 + $0x50] sm:$0xff]  }
  0x34   : > { %v903_v37 = vshll.u32 %v3464_v34, 16  ;;  %v901_v42 = vshrl.u32 %v3464_v34, 16  ;;  %v680_v15 = vshrl.u32 %v3160_v7, 16 }
  0x35   : > { %1115 = vrot.lane.b32.xlu1 %v839_v5, %s3210_s20  ;;  %1335 = vrot.lane.b32.xlu0 %v3332_v46, %s3213_s29  ;;  %v657_v5 = vor.u32 %v655_v1, %v654_v0  ;;  %v675_v1 = vrot.slane %v673_v61, 7 }
  0x36   : > { %v905_v43 = vrot.slane %v903_v37, 1 }
  0x37   : > { %v3435_v8 = vsel %vm3285_vm2, 0, %v657_v5  ;;  %v678_v6 = vor.u32 %v676_v2, %v675_v1  ;;  %v795_v23 = vsel %vm3285_vm2, %v675_v1, 0 }
  0x38   : > { %v889_v17 = vshrl.u32 %v3435_v8, 16  ;;  %v1050_v32 = vrot.slane %v3435_v8, 1  ;;  %v932_v30 = vshll.u32 %v795_v23, 16 }
  0x39   : > { %1117 = vrot.lane.b32.xlu1 %v851_v13, %s3210_s20  ;;  %1337 = vrot.lane.b32.xlu0 %v1040_v25, %s3213_s29  ;;  %v3517_v14 = vsel %vm3285_vm2, 0, %v678_v6 }
  0x3a   : > { %v925_v27 = vshrl.u32 %v3517_v14, 16 }
  0x3d   : > { %1149 = vrot.lane.b32.xlu1 %v1040_v25, %s3208_s16  ;;  %1147 = vrot.lane.b32.xlu0 %v3332_v46, %s3208_s16  ;;  %v869_v46 = vrot.slane %v867_v41, 1  ;;  %v669_v41 = vshll.u32 %v3153_v31, 16 }
  0x3f   : > { %v870_v50 = vor.u32 %v869_v46, %v865_v45  ;;  %v671_v45 = vor.u32 %v669_v41, %v668_v40  ;;  %v906_v46 = vor.u32 %v905_v43, %v901_v42  ;;  %v1060_v43 = vrot.slane %v795_v23, 1 }
  0x41   : > { %1181 = vrot.lane.b32.xlu1 %v3369_v19, %s3206_s8  ;;  %1179 = vrot.lane.b32.xlu0 %v3309_v29, %s3206_s8  ;;  %v875_v54 = vsel %vm803_vm4, %v870_v50, %v874_v51  ;;  %v3479_v49 = vsel %vm3285_vm2, 0, %v671_v45  ;;  %v1053_v51 = vrot.slane %v3464_v34, 1 }
  0x42   : > { %v915_v53 = vshll.u32 %v3479_v49, 16  ;;  %v913_v57 = vshrl.u32 %v3479_v49, 16  ;;  %v1056_v12 = vrot.slane %v3479_v49, 1 }
  0x43   : > { %v1055_v56 = vsel %vm1028_vm3, %v1053_v51, %v1054_v52  ;;  %v3161_v52 = vld [vmem:[%s3276_s28 + $0x58] sm:$0xff]  }
  0x44   : > { %v917_v58 = vrot.slane %v915_v53, 1 }
  0x45   : > { %1213 = vrot.lane.b32.xlu1 %v863_v38, %s3211_s26  ;;  %1211 = vrot.lane.b32.xlu0 %v851_v13, %s3211_s26  ;;  %v891_v13 = vshll.u32 %v3435_v8, 16 }
  0x47   : > { %v893_v18 = vrot.slane %v891_v13, 1 }
  0x49   : > { %1245 = vrot.lane.b32.xlu1 %v1043_v44, %s3209_s17  ;;  %1243 = vrot.lane.b32.xlu0 %v1040_v25, %s3209_s17  ;;  %v894_v24 = vor.u32 %v893_v18, %v889_v17  ;;  %v898_v25 = vrot.slane %v896_v21, 1  ;;  %v927_v17 = vshll.u32 %v3517_v14, 16 }
  0x4b   : > { %v899_v28 = vsel %vm803_vm4, %v894_v24, %v898_v25  ;;  %v682_v24 = vrot.slane %v680_v15, 7  ;;  %v683_v25 = vshll.u32 %v3160_v7, 16 }
  0x4d   : > { %1277 = vrot.lane.b32.xlu1 %v3389_v36, %s3207_s11  ;;  %1275 = vrot.lane.b32.xlu0 %v3369_v19, %s3207_s11 }
  0x51   : > { %1309 = vrot.lane.b32.xlu1 %v875_v54, %s3212_s27  ;;  %1307 = vrot.lane.b32.xlu0 %v863_v38, %s3212_s27 }
  0x55   : > { %1119 = vrot.lane.b32.xlu1 %v863_v38, %s3210_s20  ;;  %1339 = vrot.lane.b32.xlu0 %v1043_v44, %s3213_s29  ;;  %v1052_v38 = vsel %vm1028_vm3, %v1050_v32, %v1051_v33  ;;  %v685_v32 = vor.u32 %v683_v25, %v682_v24 }
  0x57   : > { %v3538_v41 = vsel %vm3285_vm2, 0, %v685_v32 }
  0x59   : > { %1121 = vrot.lane.b32.xlu1 %v875_v54, %s3210_s20  ;;  %1341 = vrot.lane.b32.xlu0 %v1046_v62, %s3213_s29 }
  0x5d   : > { %1153 = vrot.lane.b32.xlu1 %v1046_v62, %s3208_s16  ;;  %1151 = vrot.lane.b32.xlu0 %v1043_v44, %s3208_s16  ;;  %v908_v44 = vshll.u32 %v793_v39, 16 }
  0x5f   : > { %v910_v48 = vrot.slane %v908_v44, 1 }
  0x61   : > { %1185 = vrot.lane.b32.xlu1 %v3420_v59, %s3206_s8  ;;  %1183 = vrot.lane.b32.xlu0 %v3389_v36, %s3206_s8  ;;  %v911_v50 = vsel %vm803_vm4, %v906_v46, %v910_v48  ;;  %v3549_v46 = vsel %vm3285_vm2, %v682_v24, 0  ;;  %v939_v48 = vshll.u32 %v3538_v41, 16  ;;  %v3162_v24 = vld [vmem:[%s3276_s28 + $0x60] sm:$0xff]  }
  0x63   : > { %v941_v61 = vrot.slane %v939_v48, 1 }
  0x65   : > { %1217 = vrot.lane.b32.xlu1 %v887_v9, %s3211_s26  ;;  %1215 = vrot.lane.b32.xlu0 %v875_v54, %s3211_s26  ;;  %v794_v54 = vsel %vm3285_vm2, %v668_v40, 0 }
  0x66   : > { %v920_v60 = vshll.u32 %v794_v54, 16  ;;  %v1057_v13 = vrot.slane %v794_v54, 1 }
  0x68   : > { %v922_v63 = vrot.slane %v920_v60, 1  ;;  %v1058_v21 = vsel %vm1028_vm3, %v1056_v12, %v1057_v13  ;;  %v937_v60 = vshrl.u32 %v3538_v41, 16  ;;  %v690_v13 = vshll.u32 %v3161_v52, 16 }
  0x69   : > { %1249 = vrot.lane.b32.xlu1 %v1049_v16, %s3209_s17  ;;  %1247 = vrot.lane.b32.xlu0 %v1046_v62, %s3209_s17  ;;  %v918_v62 = vor.u32 %v917_v58, %v913_v57 }
  0x6a   : > { %v942_v6 = vor.u32 %v941_v61, %v937_v60 }
  0x6b   : > { %v3504_v4 = vsel %vm803_vm4, %v918_v62, %v922_v63  ;;  %v687_v63 = vshrl.u32 %v3161_v52, 16 }
  0x6d   : > { %1281 = vrot.lane.b32.xlu1 %v3435_v8, %s3207_s11  ;;  %1279 = vrot.lane.b32.xlu0 %v3420_v59, %s3207_s11  ;;  %v689_v12 = vrot.slane %v687_v63, 7 }
  0x6f   : > { %v692_v23 = vor.u32 %v690_v13, %v689_v12 }
  0x71   : > { %1313 = vrot.lane.b32.xlu1 %v899_v28, %s3212_s27  ;;  %1311 = vrot.lane.b32.xlu0 %v887_v9, %s3212_s27 }
  0x75   : > { %1123 = vrot.lane.b32.xlu1 %v887_v9, %s3210_s20  ;;  %1343 = vrot.lane.b32.xlu0 %v1049_v16, %s3213_s29 }
  0x79   : > { %1125 = vrot.lane.b32.xlu1 %v899_v28, %s3210_s20  ;;  %1345 = vrot.lane.b32.xlu0 %v1052_v38, %s3213_s29 }
  0x7d   : > { %1157 = vrot.lane.b32.xlu1 %v1052_v38, %s3208_s16  ;;  %1155 = vrot.lane.b32.xlu0 %v1049_v16, %s3208_s16 }
  0x81   : > { %1189 = vrot.lane.b32.xlu1 %v3464_v34, %s3206_s8  ;;  %1187 = vrot.lane.b32.xlu0 %v3435_v8, %s3206_s8 }
  0x85   : > { %1221 = vrot.lane.b32.xlu1 %v911_v50, %s3211_s26  ;;  %1219 = vrot.lane.b32.xlu0 %v899_v28, %s3211_s26  ;;  %v929_v28 = vrot.slane %v927_v17, 1 }
  0x87   : > { %v930_v37 = vor.u32 %v929_v28, %v925_v27  ;;  %v1062_v27 = vrot.slane %v3538_v41, 1  ;;  %v1063_v28 = vrot.slane %v3549_v46, 1 }
  0x89   : > { %1253 = vrot.lane.b32.xlu1 %v1055_v56, %s3209_s17  ;;  %1251 = vrot.lane.b32.xlu0 %v1052_v38, %s3209_s17  ;;  %v934_v38 = vrot.slane %v932_v30, 1  ;;  %v3607_v30 = vsel %vm3285_vm2, 0, %v692_v23 }
  0x8b   : > { %v1178_v0 = vpop.permute.xlu1 %1177  ;;  %v3497_v3 = vpop.permute.xlu0 %1175  ;;  %v935_v45 = vsel %vm803_vm4, %v930_v37, %v934_v38  ;;  %v1064_v37 = vsel %vm1028_vm3, %v1062_v27, %v1063_v28  ;;  %v797_v38 = vsel %vm3285_vm2, %v689_v12, 0 }
  0x8d   : > { %1285 = vrot.lane.b32.xlu1 %v3479_v49, %s3207_s11  ;;  %1283 = vrot.lane.b32.xlu0 %v3464_v34, %s3207_s11 }
  0x8f   : > { %v3506_v5 = vpop.permute.xlu1 %1273  ;;  %v3509_v9 = vpop.permute.xlu0 %1271 }
  0x91   : > { %1317 = vrot.lane.b32.xlu1 %v3504_v4, %s3212_s27  ;;  %1315 = vrot.lane.b32.xlu0 %v911_v50, %s3212_s27 }
  0x93   : > { %v1146_v10 = vpop.permute.xlu1 %1145  ;;  %v3519_v16 = vpop.permute.xlu0 %1239 }
  0x95   : > { %1127 = vrot.lane.b32.xlu1 %v911_v50, %s3210_s20  ;;  %1347 = vrot.lane.b32.xlu0 %v1055_v56, %s3213_s29 }
  0x97   : > { %v1242_v18 = vpop.permute.xlu1 %1241  ;;  %v1114_v26 = vpop.permute.xlu0 %1113 }
  0x98   : > { %v1371_v33 = vsel %vm1367_vm6, %v3299_v22, %v1114_v26  ;;  %v1059_v22 = vrot.slane %v3517_v14, 1 }
  0x99   : > { %1129 = vrot.lane.b32.xlu1 %v3504_v4, %s3210_s20  ;;  %1349 = vrot.lane.b32.xlu0 %v1058_v21, %s3213_s29  ;;  %v1404_v39 = vsel %vm1400_vm7, %v1371_v33, %v1146_v10  ;;  %v951_v33 = vshll.u32 %v3607_v30, 16 }
  0x9a   : > { %v1437_v44 = vsel %vm1433_vm8, %v1404_v39, %v1178_v0  ;;  %v3558_v55 = vsel %vm1028_vm3, %v1059_v22, %v1060_v43  ;;  %v949_v22 = vshrl.u32 %v3607_v30, 16 }
  0x9b   : > { %v1144_v31 = vpop.permute.xlu1 %1143  ;;  %v1208_v35 = vpop.permute.xlu0 %1207  ;;  %v953_v43 = vrot.slane %v951_v33, 1 }
  0x9d   : > { %1161 = vrot.lane.b32.xlu1 %v1058_v21, %s3208_s16  ;;  %1159 = vrot.lane.b32.xlu0 %v1055_v56, %s3208_s16  ;;  %v944_v56 = vshll.u32 %v3549_v46, 16 }
  0x9f   : > { %v1210_v40 = vpop.permute.xlu1 %1209  ;;  %v1304_v42 = vpop.permute.xlu0 %1303  ;;  %v946_v7 = vrot.slane %v944_v56, 1  ;;  %v1065_v56 = vrot.slane %v3607_v30, 1 }
  0xa0   : > { %v1470_v50 = vsel %vm1466_vm9, %v1437_v44, %v1210_v40  ;;  %v697_v40 = vshll.u32 %v3162_v24, 16  ;;  %v956_v44 = vshll.u32 %v797_v38, 16 }
  0xa1   : > { %1193 = vrot.lane.b32.xlu1 %v3517_v14, %s3206_s8  ;;  %1191 = vrot.lane.b32.xlu0 %v3479_v49, %s3206_s8  ;;  %v1503_v57 = vsel %vm1499_vm10, %v1470_v50, %v1242_v18  ;;  %v954_v50 = vor.u32 %v953_v43, %v949_v22  ;;  %v3164_v43 = vld [vmem:[%s3276_s28 + $0x70] sm:$0xff]  }
  0xa2   : > { %v1536_v2 = vsel %vm1532_vm11, %v1503_v57, %v3506_v5  ;;  %v1066_v57 = vrot.slane %v797_v38, 1  ;;  %v3168_v38 = vld [vmem:[%s3276_s28 + $0x10] sm:$0xff]  }
  0xa3   : > { %v1306_v51 = vpop.permute.xlu1 %1305  ;;  %v1112_v53 = vpop.permute.xlu0 %1111 }
  0xa4   : > { %v1369_v54 = vsel %vm1367_vm6, %v3336_v47, %v1112_v53  ;;  %v1569_v15 = vsel %vm1565_vm12, %v1536_v2, %v1306_v51  ;;  %v958_v51 = vrot.slane %v956_v44, 1  ;;  %v3163_v2 = vld [vmem:[%s3276_s28 + $0x68] sm:$0xff]  }
  0xa5   : > { %1225 = vrot.lane.b32.xlu1 %v935_v45, %s3211_s26  ;;  %v1402_v58 = vsel %vm1400_vm7, %v1369_v54, %v1144_v31  ;;  %1223 = vrot.lane.b32.xlu0 %v3504_v4, %s3211_s26  ;;  %v694_v31 = vshrl.u32 %v3162_v24, 16  ;;  %v701_v24 = vshrl.u32 %v3163_v2, 16 }
  0xa6   : > { %v1435_v47 = vsel %vm1433_vm8, %v1402_v58, %v3497_v3  ;;  %v2057_v58 = vld [vmem:[%s4032_s4] sm:$0xf]  ;;  %v3643_v61 = vsel %vm803_vm4, %v954_v50, %v958_v51 }
  0xa7   : > { %v3568_v62 = vpop.permute.xlu1 %1115  ;;  %v1468_v0 = vsel %vm1466_vm9, %v1435_v47, %v1208_v35  ;;  %v1336_v1 = vpop.permute.xlu0 %1335  ;;  %v696_v39 = vrot.slane %v694_v31, 7  ;;  %3112 = vmatprep.subr.msk.bf16.mxu1 %vm1700_vm5, %v2057_v58  ;;  %v2187_v63 = vsel %vm1700_vm5, %v2057_v58, 0  ;;  %v703_v33 = vrot.slane %v701_v24, 7  ;;  %v3171_v58 = vld [vmem:[%s3276_s28 + $0x28] sm:$0xff]  }
  0xa8   : > { %v1501_v4 = vsel %vm1499_vm10, %v1468_v0, %v3519_v16  ;;  %v1373_v60 = vsel %vm1367_vm6, %v3293_v20, %v3568_v62  ;;  %3078 = vmatpush3.bf16.msra.mxu1 %v2187_v63 }
  0xa9   : > { %1257 = vrot.lane.b32.xlu1 %v3558_v55, %s3209_s17  ;;  %1255 = vrot.lane.b32.xlu0 %v1058_v21, %s3209_s17  ;;  %v1534_v3 = vsel %vm1532_vm11, %v1501_v4, %v3509_v9  ;;  %v3593_v9 = vsel %vm803_vm4, %v942_v6, %v946_v7  ;;  %v699_v46 = vor.u32 %v697_v40, %v696_v39  ;;  %v3166_v4 = vld [vmem:[%s3276_s28] sm:$0xff]  }
  0xaa   : > { %v1567_v5 = vsel %vm1565_vm12, %v1534_v3, %v1304_v42  ;;  %v3167_v3 = vld [vmem:[%s3276_s28 + $0x8] sm:$0xff]   ;;  %v3657_v7 = vsel %vm1028_vm3, %v1065_v56, %v1066_v57  ;;  %3079 = vmatprep.mubr.msk.bf16.mxu1 %vm1367_vm6, %v3166_v4  ;;  %v3170_v56 = vld [vmem:[%s3276_s28 + $0x20] sm:$0xff]  }
  0xab   : > { %v3580_v10 = vpop.permute.xlu1 %1117  ;;  %v1338_v17 = vpop.permute.xlu0 %1337  ;;  %v1600_v16 = vsel %vm1598_vm13, %v1567_v5, %v1336_v1  ;;  %v3625_v53 = vsel %vm3285_vm2, 0, %v699_v46  ;;  %3080 = vmatmul.mubr.msk.bf16.vlgmr.msra.gmra.mrb[0].mxu1 %vm1367_vm6, %v3167_v3 }
  0xac   : > { %v1602_v18 = vsel %vm1598_vm13, %v1569_v15, %v1338_v17  ;;  %3045 = vmatprep.mubr.msk.bf16.mxu0 %vm1667_vm14, %v1600_v16  ;;  %v963_v47 = vshll.u32 %v3625_v53, 16  ;;  %v1375_v12 = vsel %vm1367_vm6, %v3309_v29, %v3580_v10  ;;  %v961_v15 = vshrl.u32 %v3625_v53, 16  ;;  %3083 = vmatprep.mubr.msk.bf16.mxu1 %vm1367_vm6, %v3168_v38 }
  0xad   : > { %1289 = vrot.lane.b32.xlu1 %v3538_v41, %s3207_s11  ;;  %1287 = vrot.lane.b32.xlu0 %v3517_v14, %s3207_s11  ;;  %v1068_v51 = vrot.slane %v3625_v53, 1 }
  0xae   : > { %3046 = vmatmul.mubr.msk.bf16.vlgmr.msra.gmra.mrb[0].mxu0 %vm1667_vm14, %v1602_v18  ;;  %v965_v17 = vrot.slane %v963_v47, 1 }
  0xaf   : > { %v3595_v21 = vpop.permute.xlu1 %1149  ;;  %v1148_v25 = vpop.permute.xlu0 %1147 }
  0xb0   : > { %v1406_v0 = vsel %vm1400_vm7, %v1373_v60, %v1148_v25  ;;  %v1408_v16 = vsel %vm1400_vm7, %v1375_v12, %v3595_v21  ;;  %v966_v28 = vor.u32 %v965_v17, %v961_v15  ;;  %v3173_v12 = vld [vmem:[%s3276_s28 + $0x38] sm:$0xff]  }
  0xb1   : > { %1321 = vrot.lane.b32.xlu1 %v3593_v9, %s3212_s27  ;;  %1319 = vrot.lane.b32.xlu0 %v935_v45, %s3212_s27 }
  0xb3   : > { %v3601_v26 = vpop.permute.xlu1 %1181  ;;  %v1180_v32 = vpop.permute.xlu0 %1179 }
  0xb4   : > { %v1439_v20 = vsel %vm1433_vm8, %v1406_v0, %v1180_v32  ;;  %v1441_v29 = vsel %vm1433_vm8, %v1408_v16, %v3601_v26 }
  0xb5   : > { %1131 = vrot.lane.b32.xlu1 %v935_v45, %s3210_s20  ;;  %1351 = vrot.lane.b32.xlu0 %v3558_v55, %s3213_s29 }
  0xb7   : > { %v1214_v35 = vpop.permute.xlu1 %1213  ;;  %v1212_v42 = vpop.permute.xlu0 %1211 }
  0xb8   : > { %v1472_v6 = vsel %vm1466_vm9, %v1439_v20, %v1212_v42  ;;  %v1474_v25 = vsel %vm1466_vm9, %v1441_v29, %v1214_v35  ;;  %v704_v35 = vshll.u32 %v3163_v2, 16  ;;  %v3169_v42 = vld [vmem:[%s3276_s28 + $0x18] sm:$0xff]  }
  0xb9   : > { %1133 = vrot.lane.b32.xlu1 %v3593_v9, %s3210_s20  ;;  %1353 = vrot.lane.b32.xlu0 %v1064_v37, %s3213_s29 }
  0xba   : > { %3084 = vmatmul.mubr.msk.bf16.gmra.mrb[4].mxu1 %vm1367_vm6, %v3169_v42 }
  0xbb   : > { %v1246_v45 = vpop.permute.xlu1 %1245  ;;  %v1244_v48 = vpop.permute.xlu0 %1243  ;;  %3087 = vmatprep.mubr.msk.bf16.mxu1 %vm1367_vm6, %v3170_v56 }
  0xbc   : > { %v1505_v13 = vsel %vm1499_vm10, %v1472_v6, %v1244_v48  ;;  %v1507_v21 = vsel %vm1499_vm10, %v1474_v25, %v1246_v45  ;;  %v706_v45 = vor.u32 %v704_v35, %v703_v33  ;;  %v708_v48 = vshrl.u32 %v3164_v43, 16  ;;  %v3172_v6 = vld [vmem:[%s3276_s28 + $0x30] sm:$0xff]   ;;  %v3165_v25 = vld [vmem:[%s3276_s28 + $0x78] sm:$0xff]  }
  0xbd   : > { %1165 = vrot.lane.b32.xlu1 %v1064_v37, %s3208_s16  ;;  %1163 = vrot.lane.b32.xlu0 %v3558_v55, %s3208_s16  ;;  %v3632_v55 = vsel %vm3285_vm2, %v696_v39, 0 }
  0xbe   : > { %v968_v5 = vshll.u32 %v3632_v55, 16  ;;  %v710_v47 = vrot.slane %v708_v48, 7 }
  0xbf   : > { %v1278_v52 = vpop.permute.xlu1 %1277  ;;  %v1276_v54 = vpop.permute.xlu0 %1275 }
  0xc0   : > { %v1538_v18 = vsel %vm1532_vm11, %v1505_v13, %v1276_v54  ;;  %v970_v26 = vrot.slane %v968_v5, 1  ;;  %v1540_v31 = vsel %vm1532_vm11, %v1507_v21, %v1278_v52  ;;  %v1069_v52 = vrot.slane %v3632_v55, 1 }
  0xc1   : > { %1197 = vrot.lane.b32.xlu1 %v3607_v30, %s3206_s8  ;;  %1195 = vrot.lane.b32.xlu0 %v3538_v41, %s3206_s8  ;;  %v3714_v54 = vsel %vm3285_vm2, 0, %v706_v45  ;;  %v711_v55 = vshll.u32 %v3164_v43, 16  ;;  %v715_v43 = vshrl.u32 %v3165_v25, 16 }
  0xc2   : > { %v975_v60 = vshll.u32 %v3714_v54, 16  ;;  %v3725_v0 = vsel %vm1028_vm3, %v1068_v51, %v1069_v52  ;;  %3088 = vmatmul.mubr.msk.bf16.gmra.mrb[8].mxu1 %vm1367_vm6, %v3171_v58  ;;  %v973_v2 = vshrl.u32 %v3714_v54, 16  ;;  %v1071_v24 = vrot.slane %v3714_v54, 1  ;;  %v460_v52 = vld [vmem:[%s416_s15] sm:$0xf] }
  0xc3   : > { %v1310_v1 = vpop.permute.xlu1 %1309  ;;  %v1308_v62 = vpop.permute.xlu0 %1307  ;;  %3091 = vmatprep.mubr.msk.bf16.mxu1 %vm1367_vm6, %v3172_v6 }
  0xc4   : > { %v1571_v10 = vsel %vm1565_vm12, %v1538_v18, %v1308_v62  ;;  %v1573_v39 = vsel %vm1565_vm12, %v1540_v31, %v1310_v1  ;;  %v799_v1 = vsel %vm3285_vm2, %v703_v33, 0  ;;  %v977_v4 = vrot.slane %v975_v60, 1 }
  0xc5   : > { %1229 = vrot.lane.b32.xlu1 %v3643_v61, %s3211_s26  ;;  %1227 = vrot.lane.b32.xlu0 %v3593_v9, %s3211_s26  ;;  %v980_v20 = vshll.u32 %v799_v1, 16  ;;  %v713_v62 = vor.u32 %v711_v55, %v710_v47  ;;  %v1072_v29 = vrot.slane %v799_v1, 1  ;;  %v717_v60 = vrot.slane %v715_v43, 7  ;;  %v3181_v43 = vld [vmem:[%s3276_s28 + $0x78] sm:$0xff]  }
  0xc6   : > { %v978_v13 = vor.u32 %v977_v4, %v973_v2  ;;  %v478_v1 = vmul.bf16 0.0, %v460_v52  ;;  %v3176_v2 = vld [vmem:[%s3276_s28 + $0x50] sm:$0xff]  }
  0xc7   : > { %v3672_v23 = vpop.permute.xlu1 %1119  ;;  %v1340_v9 = vpop.permute.xlu0 %1339  ;;  %v982_v15 = vrot.slane %v980_v20, 1  ;;  %v3744_v17 = vsel %vm3285_vm2, 0, %v713_v62  ;;  %v3773_v35 = vsel %vm1028_vm3, %v1071_v24, %v1072_v29  ;;  %v3177_v62 = vld [vmem:[%s3276_s28 + $0x58] sm:$0xff]  }
  0xc8   : > { %v1604_v27 = vsel %vm1598_vm13, %v1571_v10, %v1340_v9  ;;  %v1377_v10 = vsel %vm1367_vm6, %v3369_v19, %v3672_v23  ;;  %v3175_v19 = vld [vmem:[%s3276_s28 + $0x48] sm:$0xff]   ;;  %v985_v38 = vshrl.u32 %v3744_v17, 16 }
  0xc9   : > { %1261 = vrot.lane.b32.xlu1 %v3657_v7, %s3209_s17  ;;  %1259 = vrot.lane.b32.xlu0 %v1064_v37, %s3209_s17  ;;  %v3698_v37 = vsel %vm803_vm4, %v966_v28, %v970_v26  ;;  %v3757_v9 = vsel %vm803_vm4, %v978_v13, %v982_v15  ;;  %v3764_v28 = vsel %vm3285_vm2, %v710_v47, 0  ;;  %v3174_v26 = vld [vmem:[%s3276_s28 + $0x40] sm:$0xff]  }
  0xca   : > { %3049 = vmatprep.mubr.msk.bf16.mxu0 %vm1667_vm14, %v1604_v27  ;;  %3092 = vmatmul.mubr.msk.bf16.gmra.mrb[12].mxu1 %vm1367_vm6, %v3173_v12 }
  0xcb   : > { %v3685_v32 = vpop.permute.xlu1 %1121  ;;  %v1342_v40 = vpop.permute.xlu0 %1341  ;;  %3095 = vmatprep.mubr.msk.bf16.mxu1 %vm1367_vm6, %v3174_v26  ;;  %v801_v26 = vsel %vm3285_vm2, %v717_v60, 0 }
  0xcc   : > { %v1606_v22 = vsel %vm1598_vm13, %v1573_v39, %v1342_v40  ;;  %v1379_v40 = vsel %vm1367_vm6, %v3389_v36, %v3685_v32 }
  0xcd   : > { %1293 = vrot.lane.b32.xlu1 %v3625_v53, %s3207_s11  ;;  %1291 = vrot.lane.b32.xlu0 %v3607_v30, %s3207_s11 }
  0xce   : > { %3050 = vmatmul.mubr.msk.bf16.gmra.mrb[4].mxu0 %vm1667_vm14, %v1606_v22  ;;  %v992_v22 = vshll.u32 %v3764_v28, 16 }
  0xcf   : > { %v3701_v44 = vpop.permute.xlu1 %1153  ;;  %v1152_v46 = vpop.permute.xlu0 %1151 }
  0xd0   : > { %v1410_v27 = vsel %vm1400_vm7, %v1377_v10, %v1152_v46  ;;  %v1412_v45 = vsel %vm1400_vm7, %v1379_v40, %v3701_v44  ;;  %v994_v58 = vrot.slane %v992_v22, 1 }
  0xd1   : > { %1325 = vrot.lane.b32.xlu1 %v3698_v37, %s3212_s27  ;;  %1323 = vrot.lane.b32.xlu0 %v3643_v61, %s3212_s27 }
  0xd2   : > { %3096 = vmatmul.mubr.msk.bf16.gmra.mrb[16].mxu1 %vm1367_vm6, %v3175_v19 }
  0xd3   : > { %v3708_v50 = vpop.permute.xlu1 %1185  ;;  %v1184_v57 = vpop.permute.xlu0 %1183  ;;  %3099 = vmatprep.mubr.msk.bf16.mxu1 %vm1367_vm6, %v3176_v2 }
  0xd4   : > { %v1443_v31 = vsel %vm1433_vm8, %v1410_v27, %v1184_v57  ;;  %v1445_v36 = vsel %vm1433_vm8, %v1412_v45, %v3708_v50 }
  0xd5   : > { %1135 = vrot.lane.b32.xlu1 %v3643_v61, %s3210_s20  ;;  %1355 = vrot.lane.b32.xlu0 %v3657_v7, %s3213_s29 }
  0xd7   : > { %v1218_v63 = vpop.permute.xlu1 %1217  ;;  %v1216_v61 = vpop.permute.xlu0 %1215 }
  0xd8   : > { %v1476_v23 = vsel %vm1466_vm9, %v1443_v31, %v1216_v61  ;;  %v1478_v56 = vsel %vm1466_vm9, %v1445_v36, %v1218_v63  ;;  %v718_v63 = vshll.u32 %v3165_v25, 16  ;;  %v3179_v25 = vld [vmem:[%s3276_s28 + $0x68] sm:$0xff]  }
  0xd9   : > { %1137 = vrot.lane.b32.xlu1 %v3698_v37, %s3210_s20  ;;  %1357 = vrot.lane.b32.xlu0 %v3725_v0, %s3213_s29 }
  0xda   : > { %3100 = vmatmul.mubr.msk.bf16.gmra.mrb[20].mxu1 %vm1367_vm6, %v3177_v62 }
  0xdb   : > { %v1250_v3 = vpop.permute.xlu1 %1249  ;;  %v1248_v5 = vpop.permute.xlu0 %1247 }
  0xdc   : > { %v1509_v42 = vsel %vm1499_vm10, %v1476_v23, %v1248_v5  ;;  %v1511_v44 = vsel %vm1499_vm10, %v1478_v56, %v1250_v3  ;;  %v720_v5 = vor.u32 %v718_v63, %v717_v60 }
  0xdd   : > { %1169 = vrot.lane.b32.xlu1 %v3725_v0, %s3208_s16  ;;  %1167 = vrot.lane.b32.xlu0 %v3657_v7, %s3208_s16  ;;  %v987_v7 = vshll.u32 %v3744_v17, 16 }
  0xde   : > { %v3833_v24 = vsel %vm3285_vm2, 0, %v720_v5 }
  0xdf   : > { %v1282_v16 = vpop.permute.xlu1 %1281  ;;  %v1280_v18 = vpop.permute.xlu0 %1279  ;;  %v989_v39 = vrot.slane %v987_v7, 1  ;;  %v3178_v7 = vld [vmem:[%s3276_s28 + $0x60] sm:$0xff]   ;;  %v1080_v27 = vshll.u32 %v3833_v24, 16  ;;  %v1078_v19 = vshrl.u32 %v3833_v24, 16  ;;  %v1091_v52 = vrot.slane %v3833_v24, 1 }
  0xe0   : > { %v1542_v46 = vsel %vm1532_vm11, %v1509_v42, %v1280_v18  ;;  %v1544_v47 = vsel %vm1532_vm11, %v1511_v44, %v1282_v16  ;;  %v1074_v16 = vrot.slane %v3744_v17, 1  ;;  %v1075_v18 = vrot.slane %v3764_v28, 1  ;;  %3103 = vmatprep.mubr.msk.bf16.mxu1 %vm1367_vm6, %v3178_v7  ;;  %v3180_v42 = vld [vmem:[%s3276_s28 + $0x70] sm:$0xff]  }
  0xe1   : > { %1201 = vrot.lane.b32.xlu1 %v3714_v54, %s3206_s8  ;;  %1199 = vrot.lane.b32.xlu0 %v3625_v53, %s3206_s8  ;;  %v990_v50 = vor.u32 %v989_v39, %v985_v38  ;;  %v1082_v23 = vrot.slane %v1080_v27, 1  ;;  %v1085_v38 = vshll.u32 %v801_v26, 16 }
  0xe2   : > { %v1076_v28 = vsel %vm1028_vm3, %v1074_v16, %v1075_v18  ;;  %3104 = vmatmul.mubr.msk.bf16.gmra.mrb[24].mxu1 %vm1367_vm6, %v3179_v25 }
  0xe3   : > { %v1314_v21 = vpop.permute.xlu1 %1313  ;;  %v1312_v33 = vpop.permute.xlu0 %1311  ;;  %3107 = vmatprep.mubr.msk.bf16.mxu1 %vm1367_vm6, %v3180_v42  ;;  %v1083_v45 = vor.u32 %v1082_v23, %v1078_v19 }
  0xe4   : > { %v1575_v32 = vsel %vm1565_vm12, %v1542_v46, %v1312_v33  ;;  %v1577_v4 = vsel %vm1565_vm12, %v1544_v47, %v1314_v21  ;;  %v1087_v46 = vrot.slane %v1085_v38, 1 }
  0xe5   : > { %1233 = vrot.lane.b32.xlu1 %v3757_v9, %s3211_s26  ;;  %1231 = vrot.lane.b32.xlu0 %v3698_v37, %s3211_s26  ;;  %v461_v37 = vld [vmem:[%s416_s15 + $0x4] sm:$0xf] }
  0xe6   : > { %v479_v61 = vmul.bf16 0.0, %v461_v37  ;;  %v1092_v37 = vrot.slane %v801_v26, 1 }
  0xe7   : > { %v3790_v48 = vpop.permute.xlu1 %1123  ;;  %v1344_v51 = vpop.permute.xlu0 %1343 }
  0xe8   : > { %v1608_v57 = vsel %vm1598_vm13, %v1575_v32, %v1344_v51  ;;  %v2776_v12 = vcombine.low %v478_v1, %v479_v61  ;;  %v1381_v56 = vsel %vm1367_vm6, %v3420_v59, %v3790_v48  ;;  %v1093_v59 = vsel %vm1028_vm3, %v1091_v52, %v1092_v37 }
  0xe9   : > { %1265 = vrot.lane.b32.xlu1 %v3773_v35, %s3209_s17  ;;  %1263 = vrot.lane.b32.xlu0 %v3725_v0, %s3209_s17  ;;  %v3818_v0 = vsel %vm803_vm4, %v990_v50, %v994_v58 }
  0xea   : > { %3053 = vmatprep.mubr.msk.bf16.mxu0 %vm1667_vm14, %v1608_v57  ;;  %v722_v29 = vshrl.u32 %v2776_v12, 16  ;;  %v725_v33 = vshll.u32 %v2776_v12, 16  ;;  %3108 = vmatmul.mubr.msk.bf16.gmra.mrb[28].mxu1 %vm1367_vm6, %v3181_v43 }
  0xeb   : > { %v3805_v55 = vpop.permute.xlu1 %1125  ;;  %v1346_v20 = vpop.permute.xlu0 %1345 }
  0xec   : > { %v1610_v3 = vsel %vm1598_vm13, %v1577_v4, %v1346_v20  ;;  %v724_v31 = vrot.slane %v722_v29, 7  ;;  %v1383_v1 = vsel %vm1367_vm6, %v3435_v8, %v3805_v55 }
  0xed   : > { %1297 = vrot.lane.b32.xlu1 %v3744_v17, %s3207_s11  ;;  %1295 = vrot.lane.b32.xlu0 %v3714_v54, %s3207_s11 }
  0xee   : > { %3054 = vmatmul.mubr.msk.bf16.gmra.mrb[8].mxu0 %vm1667_vm14, %v1610_v3  ;;  %v727_v40 = vor.u32 %v725_v33, %v724_v31  ;;  %v802_v58 = vsel %vm3285_vm2, %v724_v31, 0 }
  0xef   : > { %v3820_v6 = vpop.permute.xlu1 %1157  ;;  %v1156_v13 = vpop.permute.xlu0 %1155  ;;  %v1102_v2 = vshll.u32 %v802_v58, 16  ;;  %v1109_v27 = vrot.slane %v802_v58, 1 }
  0xf0   : > { %v784_v32 = vsel %vm3285_vm2, 0, %v727_v40  ;;  %v1414_v44 = vsel %vm1400_vm7, %v1381_v56, %v1156_v13  ;;  %v1416_v4 = vsel %vm1400_vm7, %v1383_v1, %v3820_v6 }
  0xf1   : > { %1329 = vrot.lane.b32.xlu1 %v3818_v0, %s3212_s27  ;;  %1327 = vrot.lane.b32.xlu0 %v3757_v9, %s3212_s27  ;;  %v1097_v57 = vshll.u32 %v784_v32, 16  ;;  %v1095_v48 = vshrl.u32 %v784_v32, 16  ;;  %v1104_v13 = vrot.slane %v1102_v2, 1 }
  0xf3   : > { %v3827_v15 = vpop.permute.xlu1 %1189  ;;  %v1188_v10 = vpop.permute.xlu0 %1187  ;;  %v1099_v11 = vrot.slane %v1097_v57, 1 }
  0xf4   : > { %v1447_v60 = vsel %vm1433_vm8, %v1414_v44, %v1188_v10  ;;  %v1449_v3 = vsel %vm1433_vm8, %v1416_v4, %v3827_v15  ;;  %v1108_v10 = vrot.slane %v784_v32, 1 }
  0xf5   : > { %1139 = vrot.lane.b32.xlu1 %v3757_v9, %s3210_s20  ;;  %1359 = vrot.lane.b32.xlu0 %v3773_v35, %s3213_s29  ;;  %v1100_v6 = vor.u32 %v1099_v11, %v1095_v48 }
  0xf6   : > { %v1110_v26 = vsel %vm1028_vm3, %v1108_v10, %v1109_v27 }
  0xf7   : > { %v1222_v21 = vpop.permute.xlu1 %1221  ;;  %v1220_v9 = vpop.permute.xlu0 %1219  ;;  %v1105_v25 = vsel %vm803_vm4, %v1100_v6, %v1104_v13 }
  0xf8   : > { %v1480_v63 = vsel %vm1466_vm9, %v1447_v60, %v1220_v9  ;;  %v1482_v8 = vsel %vm1466_vm9, %v1449_v3, %v1222_v21 }
  0xf9   : > { %1141 = vrot.lane.b32.xlu1 %v3818_v0, %s3210_s20  ;;  %1361 = vrot.lane.b32.xlu0 %v1076_v28, %s3213_s29 }
  0xfb   : > { %v1254_v39 = vpop.permute.xlu1 %1253  ;;  %v1252_v22 = vpop.permute.xlu0 %1251 }
  0xfc   : > { %v1513_v61 = vsel %vm1499_vm10, %v1480_v63, %v1252_v22 }
  0xfd   : > { %1173 = vrot.lane.b32.xlu1 %v1076_v28, %s3208_s16  ;;  %1171 = vrot.lane.b32.xlu0 %v3773_v35, %s3208_s16  ;;  %v1088_v35 = vsel %vm803_vm4, %v1083_v45, %v1087_v46 }
  0xff   : > { %v1286_v36 = vpop.permute.xlu1 %1285  ;;  %v1284_v51 = vpop.permute.xlu0 %1283 }
 0x100   : > { %v1546_v20 = vsel %vm1532_vm11, %v1513_v61, %v1284_v51 }
 0x101   : > { %1205 = vrot.lane.b32.xlu1 %v3833_v24, %s3206_s8  ;;  %1203 = vrot.lane.b32.xlu0 %v3744_v17, %s3206_s8 }
 0x103   : > { %v1318_v50 = vpop.permute.xlu1 %1317  ;;  %v1316_v47 = vpop.permute.xlu0 %1315 }
 0x104   : > { %v1579_v5 = vsel %vm1565_vm12, %v1546_v20, %v1316_v47 }
 0x105   : > { %1237 = vrot.lane.b32.xlu1 %v1088_v35, %s3211_s26  ;;  %1235 = vrot.lane.b32.xlu0 %v3818_v0, %s3211_s26  ;;  %v1515_v0 = vsel %vm1499_vm10, %v1482_v8, %v1254_v39 }
 0x106   : > { %v1548_v16 = vsel %vm1532_vm11, %v1515_v0, %v1286_v36 }
 0x107   : > { %v1128_v62 = vpop.permute.xlu1 %1127  ;;  %v1348_v12 = vpop.permute.xlu0 %1347  ;;  %v1581_v18 = vsel %vm1565_vm12, %v1548_v16, %v1318_v50 }
 0x108   : > { %v1612_v55 = vsel %vm1598_vm13, %v1579_v5, %v1348_v12  ;;  %v1385_v40 = vsel %vm1367_vm6, %v3464_v34, %v1128_v62 }
 0x109   : > { %1269 = vrot.lane.b32.xlu1 %v1093_v59, %s3209_s17  ;;  %1267 = vrot.lane.b32.xlu0 %v1076_v28, %s3209_s17 }
 0x10a   : > { %3057 = vmatprep.mubr.msk.bf16.mxu0 %vm1667_vm14, %v1612_v55 }
 0x10b   : > { %v1130_v15 = vpop.permute.xlu1 %1129  ;;  %v1350_v29 = vpop.permute.xlu0 %1349 }
 0x10c   : > { %v1614_v7 = vsel %vm1598_vm13, %v1581_v18, %v1350_v29  ;;  %v1387_v36 = vsel %vm1367_vm6, %v3479_v49, %v1130_v15 }
 0x10d   : > { %1301 = vrot.lane.b32.xlu1 %v784_v32, %s3207_s11  ;;  %1299 = vrot.lane.b32.xlu0 %v3833_v24, %s3207_s11  ;;  %s3981_s11 = scalar_lea.vmem %s4033_s5, %s3270_s25  ;;  %s2758_s25 = sshll.u32 %s4042_s21, 2 }
 0x10e   : > { %3058 = vmatmul.mubr.msk.bf16.gmra.mrb[12].mxu0 %vm1667_vm14, %v1614_v7  ;;  %s4003_s18 = scalar_lea.vmem %s4034_s6, %s2758_s25 }
 0x10f   : > { %v1162_v21 = vpop.permute.xlu1 %1161  ;;  %v1160_v28 = vpop.permute.xlu0 %1159 }
 0x110   : > { %v1418_v42 = vsel %vm1400_vm7, %v1385_v40, %v1160_v28  ;;  %v1420_v51 = vsel %vm1400_vm7, %v1387_v36, %v1162_v21 }
 0x111   : > { %1333 = vrot.lane.b32.xlu1 %v1105_v25, %s3212_s27  ;;  %1331 = vrot.lane.b32.xlu0 %v1088_v35, %s3212_s27 }
 0x113   : > { %v1194_v31 = vpop.permute.xlu1 %1193  ;;  %v1192_v33 = vpop.permute.xlu0 %1191 }
 0x114   : > { %v1451_v43 = vsel %vm1433_vm8, %v1418_v42, %v1192_v33  ;;  %v1453_v34 = vsel %vm1433_vm8, %v1420_v51, %v1194_v31 }
 0x115   : > { %1365 = vrot.lane.b32.xlu1 %v1110_v26, %s3213_s29  ;;  %1363 = vrot.lane.b32.xlu0 %v1093_v59, %s3213_s29 }
 0x117   : > { %v1226_v24 = vpop.permute.xlu1 %1225  ;;  %v1224_v9 = vpop.permute.xlu0 %1223 }
 0x118   : > { %v1484_v46 = vsel %vm1466_vm9, %v1451_v43, %v1224_v9  ;;  %v1486_v57 = vsel %vm1466_vm9, %v1453_v34, %v1226_v24 }
 0x11b   : > { %v1258_v19 = vpop.permute.xlu1 %1257  ;;  %v1256_v23 = vpop.permute.xlu0 %1255 }
 0x11c   : > { %v1517_v32 = vsel %vm1499_vm10, %v1484_v46, %v1256_v23  ;;  %v1519_v50 = vsel %vm1499_vm10, %v1486_v57, %v1258_v19 }
 0x11f   : > { %v1290_v38 = vpop.permute.xlu1 %1289  ;;  %v1288_v39 = vpop.permute.xlu0 %1287 }
 0x120   : > { %v1550_v52 = vsel %vm1532_vm11, %v1517_v32, %v1288_v39  ;;  %v1552_v49 = vsel %vm1532_vm11, %v1519_v50, %v1290_v38 }
 0x123   : > { %v1322_v22 = vpop.permute.xlu1 %1321  ;;  %v1320_v45 = vpop.permute.xlu0 %1319 }
 0x124   : > { %v1583_v56 = vsel %vm1565_vm12, %v1550_v52, %v1320_v45  ;;  %v1585_v60 = vsel %vm1565_vm12, %v1552_v49, %v1322_v22 }
 0x127   : > { %v1132_v37 = vpop.permute.xlu1 %1131  ;;  %v1352_v35 = vpop.permute.xlu0 %1351 }
 0x128   : > { %v1616_v44 = vsel %vm1598_vm13, %v1583_v56, %v1352_v35  ;;  %v1389_v5 = vsel %vm1367_vm6, %v3517_v14, %v1132_v37 }
 0x129   : > { %3061 = vmatprep.mubr.msk.bf16.mxu0 %vm1667_vm14, %v1616_v44 }
 0x12b   : > { %v1134_v58 = vpop.permute.xlu1 %1133  ;;  %v1354_v47 = vpop.permute.xlu0 %1353 }
 0x12c   : > { %v1618_v63 = vsel %vm1598_vm13, %v1585_v60, %v1354_v47  ;;  %v1391_v13 = vsel %vm1367_vm6, %v3538_v41, %v1134_v58 }
 0x12d   : > { %3062 = vmatmul.mubr.msk.bf16.gmra.mrb[16].mxu0 %vm1667_vm14, %v1618_v63 }
 0x12f   : > { %v1166_v59 = vpop.permute.xlu1 %1165  ;;  %v1164_v48 = vpop.permute.xlu0 %1163 }
 0x130   : > { %v1422_v12 = vsel %vm1400_vm7, %v1389_v5, %v1164_v48  ;;  %v1424_v15 = vsel %vm1400_vm7, %v1391_v13, %v1166_v59 }
 0x133   : > { %v1198_v1 = vpop.permute.xlu1 %1197  ;;  %v1196_v61 = vpop.permute.xlu0 %1195 }
 0x134   : > { %v1455_v55 = vsel %vm1433_vm8, %v1422_v12, %v1196_v61  ;;  %v1457_v14 = vsel %vm1433_vm8, %v1424_v15, %v1198_v1 }
 0x137   : > { %v1230_v11 = vpop.permute.xlu1 %1229  ;;  %v1228_v2 = vpop.permute.xlu0 %1227 }
 0x138   : > { %v1488_v6 = vsel %vm1466_vm9, %v1455_v55, %v1228_v2  ;;  %v1490_v25 = vsel %vm1466_vm9, %v1457_v14, %v1230_v11 }
 0x13b   : > { %v1262_v4 = vpop.permute.xlu1 %1261  ;;  %v1260_v20 = vpop.permute.xlu0 %1259 }
 0x13c   : > { %v1521_v16 = vsel %vm1499_vm10, %v1488_v6, %v1260_v20  ;;  %v1523_v21 = vsel %vm1499_vm10, %v1490_v25, %v1262_v4 }
 0x13f   : > { %v1294_v62 = vpop.permute.xlu1 %1293  ;;  %v1292_v3 = vpop.permute.xlu0 %1291 }
 0x140   : > { %v1554_v18 = vsel %vm1532_vm11, %v1521_v16, %v1292_v3  ;;  %v1556_v41 = vsel %vm1532_vm11, %v1523_v21, %v1294_v62 }
 0x143   : > { %v1326_v8 = vpop.permute.xlu1 %1325  ;;  %v1324_v0 = vpop.permute.xlu0 %1323 }
 0x144   : > { %v1587_v7 = vsel %vm1565_vm12, %v1554_v18, %v1324_v0  ;;  %v1589_v26 = vsel %vm1565_vm12, %v1556_v41, %v1326_v8 }
 0x147   : > { %v1136_v29 = vpop.permute.xlu1 %1135  ;;  %v1356_v10 = vpop.permute.xlu0 %1355 }
 0x148   : > { %v1620_v27 = vsel %vm1598_vm13, %v1587_v7, %v1356_v10  ;;  %v1393_v45 = vsel %vm1367_vm6, %v3607_v30, %v1136_v29 }
 0x149   : > { %3065 = vmatprep.mubr.msk.bf16.mxu0 %vm1667_vm14, %v1620_v27 }
 0x14b   : > { %v1138_v28 = vpop.permute.xlu1 %1137  ;;  %v1358_v31 = vpop.permute.xlu0 %1357 }
 0x14c   : > { %v1622_v33 = vsel %vm1598_vm13, %v1589_v26, %v1358_v31  ;;  %v1395_v37 = vsel %vm1367_vm6, %v3625_v53, %v1138_v28 }
 0x14d   : > { %3066 = vmatmul.mubr.msk.bf16.gmra.mrb[20].mxu0 %vm1667_vm14, %v1622_v33 }
 0x14f   : > { %v1170_v24 = vpop.permute.xlu1 %1169  ;;  %v1168_v9 = vpop.permute.xlu0 %1167 }
 0x150   : > { %v1426_v46 = vsel %vm1400_vm7, %v1393_v45, %v1168_v9  ;;  %v1428_v56 = vsel %vm1400_vm7, %v1395_v37, %v1170_v24 }
 0x153   : > { %v1202_v19 = vpop.permute.xlu1 %1201  ;;  %v1200_v23 = vpop.permute.xlu0 %1199 }
 0x154   : > { %v1459_v32 = vsel %vm1433_vm8, %v1426_v46, %v1200_v23  ;;  %v1461_v30 = vsel %vm1433_vm8, %v1428_v56, %v1202_v19 }
 0x157   : > { %v1234_v38 = vpop.permute.xlu1 %1233  ;;  %v1232_v39 = vpop.permute.xlu0 %1231 }
 0x158   : > { %v1492_v52 = vsel %vm1466_vm9, %v1459_v32, %v1232_v39  ;;  %v1494_v49 = vsel %vm1466_vm9, %v1461_v30, %v1234_v38 }
 0x15b   : > { %v1266_v40 = vpop.permute.xlu1 %1265  ;;  %v1264_v42 = vpop.permute.xlu0 %1263 }
 0x15c   : > { %v1525_v34 = vsel %vm1499_vm10, %v1492_v52, %v1264_v42  ;;  %v1527_v60 = vsel %vm1499_vm10, %v1494_v49, %v1266_v40 }
 0x15f   : > { %v1298_v22 = vpop.permute.xlu1 %1297  ;;  %v1296_v43 = vpop.permute.xlu0 %1295 }
 0x160   : > { %v1558_v35 = vsel %vm1532_vm11, %v1525_v34, %v1296_v43  ;;  %v1560_v53 = vsel %vm1532_vm11, %v1527_v60, %v1298_v22 }
 0x163   : > { %v1330_v36 = vpop.permute.xlu1 %1329  ;;  %v1328_v51 = vpop.permute.xlu0 %1327 }
 0x164   : > { %v1591_v44 = vsel %vm1565_vm12, %v1558_v35, %v1328_v51  ;;  %v1593_v63 = vsel %vm1565_vm12, %v1560_v53, %v1330_v36 }
 0x167   : > { %v1140_v57 = vpop.permute.xlu1 %1139  ;;  %v1360_v50 = vpop.permute.xlu0 %1359 }
 0x168   : > { %v1624_v58 = vsel %vm1598_vm13, %v1591_v44, %v1360_v50  ;;  %v1397_v12 = vsel %vm1367_vm6, %v3714_v54, %v1140_v57 }
 0x169   : > { %3069 = vmatprep.mubr.msk.bf16.mxu0 %vm1667_vm14, %v1624_v58 }
 0x16b   : > { %v1142_v47 = vpop.permute.xlu1 %1141  ;;  %v1362_v59 = vpop.permute.xlu0 %1361 }
 0x16c   : > { %v1626_v48 = vsel %vm1598_vm13, %v1593_v63, %v1362_v59  ;;  %v1399_v8 = vsel %vm1367_vm6, %v3744_v17, %v1142_v47 }
 0x16d   : > { %3070 = vmatmul.mubr.msk.bf16.gmra.mrb[24].mxu0 %vm1667_vm14, %v1626_v48 }
 0x16f   : > { %v1174_v1 = vpop.permute.xlu1 %1173  ;;  %v1172_v61 = vpop.permute.xlu0 %1171 }
 0x170   : > { %v1432_v0 = vsel %vm1400_vm7, %v1399_v8, %v1174_v1  ;;  %v1430_v6 = vsel %vm1400_vm7, %v1397_v12, %v1172_v61 }
 0x173   : > { %v1206_v11 = vpop.permute.xlu1 %1205  ;;  %v1204_v2 = vpop.permute.xlu0 %1203 }
 0x174   : > { %v1465_v16 = vsel %vm1433_vm8, %v1432_v0, %v1206_v11  ;;  %v1463_v15 = vsel %vm1433_vm8, %v1430_v6, %v1204_v2 }
 0x177   : > { %v1238_v4 = vpop.permute.xlu1 %1237  ;;  %v1236_v20 = vpop.permute.xlu0 %1235 }
 0x178   : > { %v1498_v29 = vsel %vm1466_vm9, %v1465_v16, %v1238_v4  ;;  %v1496_v14 = vsel %vm1466_vm9, %v1463_v15, %v1236_v20 }
 0x17b   : > { %v1270_v62 = vpop.permute.xlu1 %1269  ;;  %v1268_v3 = vpop.permute.xlu0 %1267 }
 0x17c   : > { %v1531_v7 = vsel %vm1499_vm10, %v1498_v29, %v1270_v62  ;;  %v1529_v10 = vsel %vm1499_vm10, %v1496_v14, %v1268_v3 }
 0x17e   : > { %v3081_v51 = vpop.f32.mrb[0].mxu1 }
 0x17f   : > { %v1302_v5 = vpop.permute.xlu1 %1301  ;;  %v1300_v55 = vpop.permute.xlu0 %1299  ;;  %v2498_v35 = vmul.f32 %v3081_v51, %v3081_v51 }
 0x180   : > { %v1564_v33 = vsel %vm1532_vm11, %v1531_v7, %v1302_v5  ;;  %v1562_v24 = vsel %vm1532_vm11, %v1529_v10, %v1300_v55  ;;  %v2223_v52 = vpop.f32.mrb[1].mxu1 }
 0x181   : > { %v3047_v13 = vpop.f32.mrb[0].mxu0  ;;  %v2496_v37 = vmul.f32 %v2223_v52, %v2223_v52  ;;  %v3082_v34 = vpop.f32.mrb[2].mxu1 }
 0x182   : > { %v1738_v18 = vpop.f32.mrb[1].mxu0  ;;  %v2390_v9 = vmul.f32 %v3047_v13, %v3047_v13  ;;  %v2226_v56 = vpop.f32.mrb[3].mxu1  ;;  %v2499_v44 = vmul.f32 %v3082_v34, %v3082_v34 }
 0x183   : > { %v3048_v54 = vpop.f32.mrb[2].mxu0  ;;  %v1334_v17 = vpop.permute.xlu1 %1333  ;;  %v2388_v41 = vmul.f32 %v1738_v18, %v1738_v18  ;;  %v2458_v57 = vadd.f32 %v2226_v56, %v2223_v52  ;;  %v2497_v30 = vmul.f32 %v2226_v56, %v2226_v56 }
 0x184   : > { %v2909_v25 = vpack.c.bf16 %v3048_v54, %v3047_v13  ;;  %v1741_v27 = vpop.f32.mrb[3].mxu0  ;;  %v1332_v21 = vpop.permute.xlu0 %1331  ;;  %v1597_v19 = vsel %vm1565_vm12, %v1564_v33, %v1334_v17  ;;  %v2391_v43 = vmul.f32 %v3048_v54, %v3048_v54 }
 0x185   : > { %v2904_v28 = vpack.c.bf16 %v1741_v27, %v1738_v18  ;;  %v2350_v26 = vadd.f32 %v1741_v27, %v1738_v18  ;;  %v2389_v31 = vmul.f32 %v1741_v27, %v1741_v27  ;;  %v1595_v40 = vsel %vm1565_vm12, %v1562_v24, %v1332_v21 }
 0x186   : > { %2982 = vst [vmem:[%s3981_s11 + $0x8] sm:$0xff] %v2909_v25   ;;  %v2459_v50 = vadd.f32 %v3081_v51, %v2458_v57  ;;  %v2528_v49 = vadd.f32 %v2497_v30, %v2496_v37 }
 0x187   : > { %2905 = vst [vmem:[%s3981_s11] sm:$0xff] %v2904_v28   ;;  %v2351_v23 = vadd.f32 %v3047_v13, %v2350_v26  ;;  %v2420_v38 = vadd.f32 %v2389_v31, %v2388_v41  ;;  %v1366_v39 = vpop.permute.xlu1 %1365 }
 0x188   : > { %v1630_v42 = vsel %vm1598_vm13, %v1597_v19, %v1366_v39  ;;  %v1364_v22 = vpop.permute.xlu0 %1363  ;;  %v2529_v60 = vadd.f32 %v2528_v49, %v2498_v35  ;;  %v2460_v53 = vadd.f32 %v3082_v34, %v2459_v50 }
 0x189   : > { %v2421_v45 = vadd.f32 %v2420_v38, %v2390_v9  ;;  %v1628_v46 = vsel %vm1598_vm13, %v1595_v40, %v1364_v22  ;;  %v2352_v36 = vadd.f32 %v3048_v54, %v2351_v23 }
 0x18a   : > { %3073 = vmatprep.mubr.msk.bf16.mxu0 %vm1667_vm14, %v1628_v46  ;;  %v2530_v11 = vadd.f32 %v2529_v60, %v2499_v44 }
 0x18b   : > { %3074 = vmatmul.mubr.msk.bf16.gmra.mrb[28].mxu0 %vm1667_vm14, %v1630_v42  ;;  %v2422_v32 = vadd.f32 %v2421_v45, %v2391_v43 }
 0x18d   : > { %v3085_v63 = vpop.f32.mrb[4].mxu1 }
 0x18e   : > { %v2239_v61 = vpop.f32.mrb[5].mxu1  ;;  %v2502_v6 = vmul.f32 %v3085_v63, %v3085_v63 }
 0x18f   : > { %v2461_v20 = vadd.f32 %v2460_v53, %v2239_v61  ;;  %v2500_v62 = vmul.f32 %v2239_v61, %v2239_v61  ;;  %v3086_v3 = vpop.f32.mrb[6].mxu1 }
 0x190   : > { %v2242_v0 = vpop.f32.mrb[7].mxu1  ;;  %v2503_v54 = vmul.f32 %v3086_v3, %v3086_v3 }
 0x191   : > { %v2531_v13 = vadd.f32 %v2530_v11, %v2500_v62  ;;  %v2462_v16 = vadd.f32 %v2461_v20, %v2242_v0  ;;  %v2501_v15 = vmul.f32 %v2242_v0, %v2242_v0 }
 0x193   : > { %v2463_v17 = vadd.f32 %v3085_v63, %v2462_v16  ;;  %v2532_v7 = vadd.f32 %v2531_v13, %v2501_v15 }
 0x195   : > { %v2533_v21 = vadd.f32 %v2532_v7, %v2502_v6  ;;  %v3089_v41 = vpop.f32.mrb[8].mxu1  ;;  %v2464_v28 = vadd.f32 %v3086_v3, %v2463_v17 }
 0x196   : > { %v2255_v31 = vpop.f32.mrb[9].mxu1  ;;  %v2506_v38 = vmul.f32 %v3089_v41, %v3089_v41 }
 0x197   : > { %v2465_v33 = vadd.f32 %v2464_v28, %v2255_v31  ;;  %v2504_v24 = vmul.f32 %v2255_v31, %v2255_v31  ;;  %v2534_v9 = vadd.f32 %v2533_v21, %v2503_v54  ;;  %v3090_v19 = vpop.f32.mrb[10].mxu1 }
 0x198   : > { %v2258_v23 = vpop.f32.mrb[11].mxu1  ;;  %v2507_v22 = vmul.f32 %v3090_v19, %v3090_v19 }
 0x199   : > { %v2535_v39 = vadd.f32 %v2534_v9, %v2504_v24  ;;  %v2466_v40 = vadd.f32 %v2465_v33, %v2258_v23  ;;  %v2505_v42 = vmul.f32 %v2258_v23, %v2258_v23 }
 0x19b   : > { %v2467_v43 = vadd.f32 %v3089_v41, %v2466_v40  ;;  %v2536_v45 = vadd.f32 %v2535_v39, %v2505_v42 }
 0x19d   : > { %v2537_v46 = vadd.f32 %v2536_v45, %v2506_v38 }
 0x19f   : > { %v2538_v34 = vadd.f32 %v2537_v46, %v2507_v22 }
 0x1a1   : > { %v3051_v58 = vpop.f32.mrb[4].mxu0 }
 0x1a2   : > { %v1754_v47 = vpop.f32.mrb[5].mxu0  ;;  %v2394_v18 = vmul.f32 %v3051_v58, %v3051_v58 }
 0x1a3   : > { %v2353_v59 = vadd.f32 %v2352_v36, %v1754_v47  ;;  %v2392_v48 = vmul.f32 %v1754_v47, %v1754_v47  ;;  %v3052_v1 = vpop.f32.mrb[6].mxu0  ;;  %v3093_v36 = vpop.f32.mrb[12].mxu1 }
 0x1a4   : > { %v2919_v2 = vpack.c.bf16 %v3052_v1, %v3051_v58  ;;  %v1757_v4 = vpop.f32.mrb[7].mxu0  ;;  %v2395_v10 = vmul.f32 %v3052_v1, %v3052_v1  ;;  %v2271_v51 = vpop.f32.mrb[13].mxu1  ;;  %v2510_v57 = vmul.f32 %v3093_v36, %v3093_v36 }
 0x1a5   : > { %v2423_v5 = vadd.f32 %v2422_v32, %v2392_v48  ;;  %v2914_v12 = vpack.c.bf16 %v1757_v4, %v1754_v47  ;;  %v2354_v8 = vadd.f32 %v2353_v59, %v1757_v4  ;;  %v2393_v55 = vmul.f32 %v1757_v4, %v1757_v4  ;;  %v3094_v56 = vpop.f32.mrb[14].mxu1 }
 0x1a6   : > { %2984 = vst [vmem:[%s3981_s11 + $0x18] sm:$0xff] %v2919_v2   ;;  %v2468_v32 = vadd.f32 %v3090_v19, %v2467_v43  ;;  %v2508_v37 = vmul.f32 %v2271_v51, %v2271_v51  ;;  %v2274_v35 = vpop.f32.mrb[15].mxu1  ;;  %v2511_v49 = vmul.f32 %v3094_v56, %v3094_v56 }
 0x1a7   : > { %2983 = vst [vmem:[%s3981_s11 + $0x10] sm:$0xff] %v2914_v12   ;;  %v2355_v29 = vadd.f32 %v3051_v58, %v2354_v8  ;;  %v2424_v14 = vadd.f32 %v2423_v5, %v2393_v55  ;;  %v2509_v50 = vmul.f32 %v2274_v35, %v2274_v35  ;;  %v3097_v47 = vpop.f32.mrb[16].mxu1 }
 0x1a8   : > { %v2469_v52 = vadd.f32 %v2468_v32, %v2271_v51  ;;  %v2539_v30 = vadd.f32 %v2538_v34, %v2508_v37  ;;  %v2287_v59 = vpop.f32.mrb[17].mxu1  ;;  %v2514_v4 = vmul.f32 %v3097_v47, %v3097_v47 }
 0x1a9   : > { %v2425_v25 = vadd.f32 %v2424_v14, %v2394_v18  ;;  %v2356_v27 = vadd.f32 %v3052_v1, %v2355_v29  ;;  %v2512_v1 = vmul.f32 %v2287_v59, %v2287_v59  ;;  %v3098_v11 = vpop.f32.mrb[18].mxu1 }
 0x1aa   : > { %v2470_v44 = vadd.f32 %v2469_v52, %v2274_v35  ;;  %v2540_v60 = vadd.f32 %v2539_v30, %v2509_v50  ;;  %v2290_v2 = vpop.f32.mrb[19].mxu1  ;;  %v2515_v0 = vmul.f32 %v3098_v11, %v3098_v11 }
 0x1ab   : > { %v2426_v26 = vadd.f32 %v2425_v25, %v2395_v10  ;;  %v2513_v3 = vmul.f32 %v2290_v2, %v2290_v2 }
 0x1ac   : > { %v2471_v58 = vadd.f32 %v3093_v36, %v2470_v44  ;;  %v2541_v53 = vadd.f32 %v2540_v60, %v2510_v57 }
 0x1ad   : > { %v3101_v13 = vpop.f32.mrb[20].mxu1 }
 0x1ae   : > { %v2472_v63 = vadd.f32 %v3094_v56, %v2471_v58  ;;  %v2542_v61 = vadd.f32 %v2541_v53, %v2511_v49  ;;  %v2303_v14 = vpop.f32.mrb[21].mxu1  ;;  %v2518_v39 = vmul.f32 %v3101_v13, %v3101_v13 }
 0x1af   : > { %v2516_v10 = vmul.f32 %v2303_v14, %v2303_v14  ;;  %v3102_v25 = vpop.f32.mrb[22].mxu1 }
 0x1b0   : > { %v2473_v48 = vadd.f32 %v2472_v63, %v2287_v59  ;;  %v2543_v20 = vadd.f32 %v2542_v61, %v2512_v1  ;;  %v2306_v33 = vpop.f32.mrb[23].mxu1  ;;  %v2519_v46 = vmul.f32 %v3102_v25, %v3102_v25 }
 0x1b1   : > { %v2517_v19 = vmul.f32 %v2306_v33, %v2306_v33 }
 0x1b2   : > { %v2474_v62 = vadd.f32 %v2473_v48, %v2290_v2  ;;  %v2544_v12 = vadd.f32 %v2543_v20, %v2513_v3 }
 0x1b4   : > { %v2475_v5 = vadd.f32 %v3097_v47, %v2474_v62  ;;  %v2545_v6 = vadd.f32 %v2544_v12, %v2514_v4 }
 0x1b5   : > { %v3105_v36 = vpop.f32.mrb[24].mxu1 }
 0x1b6   : > { %v2476_v16 = vadd.f32 %v3098_v11, %v2475_v5  ;;  %v2546_v24 = vadd.f32 %v2545_v6, %v2515_v0  ;;  %v2319_v52 = vpop.f32.mrb[25].mxu1  ;;  %v2522_v49 = vmul.f32 %v3105_v36, %v3105_v36 }
 0x1b7   : > { %v2520_v56 = vmul.f32 %v2319_v52, %v2319_v52  ;;  %v3106_v35 = vpop.f32.mrb[26].mxu1 }
 0x1b8   : > { %v2477_v7 = vadd.f32 %v2476_v16, %v2303_v14  ;;  %v2547_v40 = vadd.f32 %v2546_v24, %v2516_v10  ;;  %v2322_v57 = vpop.f32.mrb[27].mxu1  ;;  %v2523_v53 = vmul.f32 %v3106_v35, %v3106_v35 }
 0x1b9   : > { %v2521_v50 = vmul.f32 %v2322_v57, %v2322_v57 }
 0x1ba   : > { %v2478_v9 = vadd.f32 %v2477_v7, %v2306_v33 }
 0x1bc   : > { %v2479_v42 = vadd.f32 %v3101_v13, %v2478_v9 }
 0x1bd   : > { %v3109_v63 = vpop.f32.mrb[28].mxu1 }
 0x1be   : > { %v2480_v32 = vadd.f32 %v3102_v25, %v2479_v42  ;;  %v2335_v48 = vpop.f32.mrb[29].mxu1  ;;  %v2526_v5 = vmul.f32 %v3109_v63, %v3109_v63 }
 0x1bf   : > { %v2524_v11 = vmul.f32 %v2335_v48, %v2335_v48  ;;  %v3110_v2 = vpop.f32.mrb[30].mxu1 }
 0x1c0   : > { %v2481_v34 = vadd.f32 %v2480_v32, %v2319_v52  ;;  %v2338_v4 = vpop.f32.mrb[31].mxu1 }
 0x1c1   : > { %v3055_v8 = vpop.f32.mrb[8].mxu0  ;;  %v2525_v3 = vmul.f32 %v2338_v4, %v2338_v4 }
 0x1c2   : > { %v1770_v55 = vpop.f32.mrb[9].mxu0  ;;  %v2398_v23 = vmul.f32 %v3055_v8, %v3055_v8  ;;  %v2482_v44 = vadd.f32 %v2481_v34, %v2322_v57 }
 0x1c3   : > { %v2357_v15 = vadd.f32 %v2356_v27, %v1770_v55  ;;  %v2396_v18 = vmul.f32 %v1770_v55, %v1770_v55  ;;  %v3056_v29 = vpop.f32.mrb[10].mxu0 }
 0x1c4   : > { %v2929_v54 = vpack.c.bf16 %v3056_v29, %v3055_v8  ;;  %v1773_v17 = vpop.f32.mrb[11].mxu0  ;;  %v2399_v22 = vmul.f32 %v3056_v29, %v3056_v29  ;;  %v2483_v60 = vadd.f32 %v3105_v36, %v2482_v44 }
 0x1c5   : > { %v2427_v21 = vadd.f32 %v2426_v26, %v2396_v18  ;;  %v2924_v41 = vpack.c.bf16 %v1773_v17, %v1770_v55  ;;  %v2358_v28 = vadd.f32 %v2357_v15, %v1773_v17  ;;  %v2397_v31 = vmul.f32 %v1773_v17, %v1773_v17 }
 0x1c6   : > { %2986 = vst [vmem:[%s3981_s11 + $0x28] sm:$0xff] %v2929_v54   ;;  %v2548_v26 = vadd.f32 %v2547_v40, %v2517_v19  ;;  %v2484_v59 = vadd.f32 %v3106_v35, %v2483_v60  ;;  %v2527_v55 = vmul.f32 %v3110_v2, %v3110_v2 }
 0x1c7   : > { %2985 = vst [vmem:[%s3981_s11 + $0x20] sm:$0xff] %v2924_v41   ;;  %v2359_v27 = vadd.f32 %v3055_v8, %v2358_v28  ;;  %v2428_v38 = vadd.f32 %v2427_v21, %v2397_v31 }
 0x1c8   : > { %v2549_v37 = vadd.f32 %v2548_v26, %v2518_v39  ;;  %v2485_v61 = vadd.f32 %v2484_v59, %v2335_v48 }
 0x1c9   : > { %v2429_v43 = vadd.f32 %v2428_v38, %v2398_v23  ;;  %v2360_v45 = vadd.f32 %v3056_v29, %v2359_v27 }
 0x1ca   : > { %v2550_v30 = vadd.f32 %v2549_v37, %v2519_v46  ;;  %v2486_v62 = vadd.f32 %v2485_v61, %v2338_v4 }
 0x1cb   : > { %v2430_v51 = vadd.f32 %v2429_v43, %v2399_v22 }
 0x1cc   : > { %v2551_v58 = vadd.f32 %v2550_v30, %v2520_v56  ;;  %v2487_v8 = vadd.f32 %v3109_v63, %v2486_v62 }
 0x1ce   : > { %v2552_v47 = vadd.f32 %v2551_v58, %v2521_v50  ;;  %v2488_v0 = vadd.f32 %v3110_v2, %v2487_v8 }
 0x1d0   : > { %v2553_v1 = vadd.f32 %v2552_v47, %v2522_v49  ;;  %v2489_v13 = vrot.slane %v2488_v0, 4 }
 0x1d2   : > { %v2554_v20 = vadd.f32 %v2553_v1, %v2523_v53  ;;  %v2490_v15 = vadd.f32 %v2489_v13, %v2488_v0 }
 0x1d4   : > { %v2555_v12 = vadd.f32 %v2554_v20, %v2524_v11  ;;  %v2491_v29 = vrot.slane %v2490_v15, 2 }
 0x1d6   : > { %v2556_v6 = vadd.f32 %v2555_v12, %v2525_v3  ;;  %v2492_v7 = vadd.f32 %v2491_v29, %v2490_v15 }
 0x1d8   : > { %v2557_v16 = vadd.f32 %v2556_v6, %v2526_v5  ;;  %v2493_v33 = vrot.slane %v2492_v7, 1 }
 0x1da   : > { %v2558_v18 = vadd.f32 %v2557_v16, %v2527_v55  ;;  %v2494_v38 = vadd.f32 %v2493_v33, %v2492_v7 }
 0x1dc   : > { %v2559_v14 = vrot.slane %v2558_v18, 4  ;;  %2495 = vst [vmem:[%s4003_s18 + $0x2] sm:$0x1] %v2494_v38 }
 0x1de   : > { %v2560_v10 = vadd.f32 %v2559_v14, %v2558_v18 }
 0x1e0   : > { %v2561_v24 = vrot.slane %v2560_v10, 2 }
 0x1e1   : > { %v3059_v54 = vpop.f32.mrb[12].mxu0 }
 0x1e2   : > { %v1786_v17 = vpop.f32.mrb[13].mxu0  ;;  %v2562_v39 = vadd.f32 %v2561_v24, %v2560_v10  ;;  %v2402_v40 = vmul.f32 %v3059_v54, %v3059_v54 }
 0x1e3   : > { %v2361_v25 = vadd.f32 %v2360_v45, %v1786_v17  ;;  %v2400_v21 = vmul.f32 %v1786_v17, %v1786_v17  ;;  %v3060_v41 = vpop.f32.mrb[14].mxu0 }
 0x1e4   : > { %v2939_v28 = vpack.c.bf16 %v3060_v41, %v3059_v54  ;;  %v1789_v31 = vpop.f32.mrb[15].mxu0  ;;  %v2563_v43 = vrot.slane %v2562_v39, 1  ;;  %v2403_v45 = vmul.f32 %v3060_v41, %v3060_v41 }
 0x1e5   : > { %v2431_v9 = vadd.f32 %v2430_v51, %v2400_v21  ;;  %v2934_v19 = vpack.c.bf16 %v1789_v31, %v1786_v17  ;;  %v2362_v23 = vadd.f32 %v2361_v25, %v1789_v31  ;;  %v2401_v27 = vmul.f32 %v1789_v31, %v1789_v31 }
 0x1e6   : > { %2988 = vst [vmem:[%s3981_s11 + $0x38] sm:$0xff] %v2939_v28   ;;  %v2564_v36 = vadd.f32 %v2563_v43, %v2562_v39 }
 0x1e7   : > { %2987 = vst [vmem:[%s3981_s11 + $0x30] sm:$0xff] %v2934_v19   ;;  %v2363_v42 = vadd.f32 %v3059_v54, %v2362_v23  ;;  %v2432_v22 = vadd.f32 %v2431_v9, %v2401_v27 }
 0x1e8   : > { %2565 = vst [vmem:[%s4003_s18 + $0x3] sm:$0x1] %v2564_v36 }
 0x1e9   : > { %v2433_v46 = vadd.f32 %v2432_v22, %v2402_v40  ;;  %v2364_v26 = vadd.f32 %v3060_v41, %v2363_v42 }
 0x1eb   : > { %v2434_v32 = vadd.f32 %v2433_v46, %v2403_v45 }
 0x200   : > { %v3063_v51 = vpop.f32.mrb[16].mxu0 }
 0x201   : > { %v1802_v52 = vpop.f32.mrb[17].mxu0  ;;  %v2406_v58 = vmul.f32 %v3063_v51, %v3063_v51 }
 0x202   : > { %v2365_v37 = vadd.f32 %v2364_v26, %v1802_v52  ;;  %v2404_v34 = vmul.f32 %v1802_v52, %v1802_v52  ;;  %v3064_v56 = vpop.f32.mrb[18].mxu0 }
 0x203   : > { %v2949_v35 = vpack.c.bf16 %v3064_v56, %v3063_v51  ;;  %v1805_v57 = vpop.f32.mrb[19].mxu0  ;;  %v2407_v47 = vmul.f32 %v3064_v56, %v3064_v56 }
 0x204   : > { %v2435_v30 = vadd.f32 %v2434_v32, %v2404_v34  ;;  %v2944_v44 = vpack.c.bf16 %v1805_v57, %v1802_v52  ;;  %v2366_v50 = vadd.f32 %v2365_v37, %v1805_v57  ;;  %v2405_v49 = vmul.f32 %v1805_v57, %v1805_v57 }
 0x205   : > { %2990 = vst [vmem:[%s3981_s11 + $0x48] sm:$0xff] %v2949_v35  }
 0x206   : > { %2989 = vst [vmem:[%s3981_s11 + $0x40] sm:$0xff] %v2944_v44   ;;  %v2367_v60 = vadd.f32 %v3063_v51, %v2366_v50  ;;  %v2436_v53 = vadd.f32 %v2435_v30, %v2405_v49 }
 0x208   : > { %v2437_v63 = vadd.f32 %v2436_v53, %v2406_v58  ;;  %v2368_v59 = vadd.f32 %v3064_v56, %v2367_v60 }
 0x20a   : > { %v2438_v48 = vadd.f32 %v2437_v63, %v2407_v47 }
 0x220   : > { %v3067_v1 = vpop.f32.mrb[20].mxu0 }
 0x221   : > { %v1818_v61 = vpop.f32.mrb[21].mxu0  ;;  %v2410_v55 = vmul.f32 %v3067_v1, %v3067_v1 }
 0x222   : > { %v2369_v11 = vadd.f32 %v2368_v59, %v1818_v61  ;;  %v2408_v2 = vmul.f32 %v1818_v61, %v1818_v61  ;;  %v3068_v4 = vpop.f32.mrb[22].mxu0 }
 0x223   : > { %v2959_v20 = vpack.c.bf16 %v3068_v4, %v3067_v1  ;;  %v1821_v62 = vpop.f32.mrb[23].mxu0  ;;  %v2411_v13 = vmul.f32 %v3068_v4, %v3068_v4 }
 0x224   : > { %v2439_v3 = vadd.f32 %v2438_v48, %v2408_v2  ;;  %v2954_v5 = vpack.c.bf16 %v1821_v62, %v1818_v61  ;;  %v2370_v12 = vadd.f32 %v2369_v11, %v1821_v62  ;;  %v2409_v8 = vmul.f32 %v1821_v62, %v1821_v62 }
 0x225   : > { %2992 = vst [vmem:[%s3981_s11 + $0x58] sm:$0xff] %v2959_v20  }
 0x226   : > { %2991 = vst [vmem:[%s3981_s11 + $0x50] sm:$0xff] %v2954_v5   ;;  %v2371_v0 = vadd.f32 %v3067_v1, %v2370_v12  ;;  %v2440_v6 = vadd.f32 %v2439_v3, %v2409_v8 }
 0x228   : > { %v2441_v16 = vadd.f32 %v2440_v6, %v2410_v55  ;;  %v2372_v15 = vadd.f32 %v3068_v4, %v2371_v0 }
 0x22a   : > { %v2442_v18 = vadd.f32 %v2441_v16, %v2411_v13 }
 0x240   : > { %v3071_v29 = vpop.f32.mrb[24].mxu0 }
 0x241   : > { %v1834_v14 = vpop.f32.mrb[25].mxu0  ;;  %v2414_v33 = vmul.f32 %v3071_v29, %v3071_v29 }
 0x242   : > { %v2373_v54 = vadd.f32 %v2372_v15, %v1834_v14  ;;  %v2412_v17 = vmul.f32 %v1834_v14, %v1834_v14  ;;  %v3072_v7 = vpop.f32.mrb[26].mxu0 }
 0x243   : > { %v2969_v10 = vpack.c.bf16 %v3072_v7, %v3071_v29  ;;  %v1837_v25 = vpop.f32.mrb[27].mxu0  ;;  %v2415_v19 = vmul.f32 %v3072_v7, %v3072_v7 }
 0x244   : > { %v2443_v21 = vadd.f32 %v2442_v18, %v2412_v17  ;;  %v2964_v41 = vpack.c.bf16 %v1837_v25, %v1834_v14  ;;  %v2374_v28 = vadd.f32 %v2373_v54, %v1837_v25  ;;  %v2413_v31 = vmul.f32 %v1837_v25, %v1837_v25 }
 0x245   : > { %2994 = vst [vmem:[%s3981_s11 + $0x68] sm:$0xff] %v2969_v10  }
 0x246   : > { %2993 = vst [vmem:[%s3981_s11 + $0x60] sm:$0xff] %v2964_v41   ;;  %v2375_v24 = vadd.f32 %v3071_v29, %v2374_v28  ;;  %v2444_v9 = vadd.f32 %v2443_v21, %v2413_v31 }
 0x248   : > { %v2445_v23 = vadd.f32 %v2444_v9, %v2414_v33  ;;  %v2376_v27 = vadd.f32 %v3072_v7, %v2375_v24 }
 0x24a   : > { %v2446_v38 = vadd.f32 %v2445_v23, %v2415_v19 }
 0x25e   : > { %v3075_v39 = vpop.f32.mrb[28].mxu0 }
 0x25f   : > { %v1850_v40 = vpop.f32.mrb[29].mxu0  ;;  %v2418_v52 = vmul.f32 %v3075_v39, %v3075_v39 }
 0x260   : > { %v2377_v42 = vadd.f32 %v2376_v27, %v1850_v40  ;;  %v2416_v22 = vmul.f32 %v1850_v40, %v1850_v40  ;;  %v3076_v43 = vpop.f32.mrb[30].mxu0 }
 0x261   : > { %v2979_v45 = vpack.c.bf16 %v3076_v43, %v3075_v39  ;;  %v1853_v46 = vpop.f32.mrb[31].mxu0  ;;  %v2419_v56 = vmul.f32 %v3076_v43, %v3076_v43 }
 0x262   : > { %v2447_v26 = vadd.f32 %v2446_v38, %v2416_v22  ;;  %v2974_v36 = vpack.c.bf16 %v1853_v46, %v1850_v40  ;;  %v2378_v32 = vadd.f32 %v2377_v42, %v1853_v46  ;;  %v2417_v51 = vmul.f32 %v1853_v46, %v1853_v46 }
 0x263   : > { %2996 = vst [vmem:[%s3981_s11 + $0x78] sm:$0xff] %v2979_v45  }
 0x264   : > { %2995 = vst [vmem:[%s3981_s11 + $0x70] sm:$0xff] %v2974_v36   ;;  %v2379_v37 = vadd.f32 %v3075_v39, %v2378_v32  ;;  %v2448_v34 = vadd.f32 %v2447_v26, %v2417_v51 }
 0x266   : > { %v2380_v35 = vadd.f32 %v3076_v43, %v2379_v37  ;;  %v2449_v57 = vadd.f32 %v2448_v34, %v2418_v52 }
 0x268   : > { %v2381_v30 = vrot.slane %v2380_v35, 4  ;;  %v2450_v44 = vadd.f32 %v2449_v57, %v2419_v56 }
 0x26a   : > { %v2382_v50 = vadd.f32 %v2381_v30, %v2380_v35  ;;  %v2451_v49 = vrot.slane %v2450_v44, 4 }
 0x26c   : > { %v2383_v58 = vrot.slane %v2382_v50, 2  ;;  %v2452_v60 = vadd.f32 %v2451_v49, %v2450_v44 }
 0x26e   : > { %v2384_v53 = vadd.f32 %v2383_v58, %v2382_v50  ;;  %v2453_v47 = vrot.slane %v2452_v60, 2 }
 0x270   : > { %v2385_v63 = vrot.slane %v2384_v53, 1  ;;  %v2454_v59 = vadd.f32 %v2453_v47, %v2452_v60 }
 0x272   : > { %v2386_v48 = vadd.f32 %v2385_v63, %v2384_v53  ;;  %v2455_v1 = vrot.slane %v2454_v59, 1 }
 0x274   : > { %2387 = vst [vmem:[%s4003_s18] sm:$0x1] %v2386_v48  ;;  %v2456_v61 = vadd.f32 %v2455_v1, %v2454_v59 }
 0x276   : > { %2457 = vst [vmem:[%s4003_s18 + $0x1] sm:$0x1] %v2456_v61 }
 0x277 PF: > { %s17_s23 = sadd.s32 1, %s3204_s23   ;;  %s4037_s21 = smov %s3200_s22 }
 0x278   : > { %p14_p5 = scmp.ge.s32.totalorder %s17_s23, 4   ;;  %s4038_s22 = smov %s4040_s24 }
 0x27a   :  { %16 = sbr.rel (!%p14_p5) target bundleno = 2 (0x2), region = 88 }

// kernel: double_conv.4
= control target key start
LH: loop header
LB: loop body
LE: loop exit
PB: predicated region body
PF: predicated region fallthrough
CT: control target
= control target key end

     0   :  { %s4162_s21 = smov 0   ;;  %s4164_s22 = smov 0   ;;  %s5384_s0 = inlined_call_operand.vmem [shape: bf16[2,16,16,128], index: 0, kind: input, shape index: {}, may-alias: {0,1,2}]   ;;  %s5385_s1 = inlined_call_operand.vmem [shape: bf16[2,16,16,128], index: 1, kind: input, shape index: {}, may-alias: {0,1,2}]   ;;  %s5386_s2 = inlined_call_operand.vmem [shape: bf16[2,16,16,128], index: 2, kind: input, shape index: {}, may-alias: {0,1,2}]   ;;  %s5387_s3 = inlined_call_operand.vmem [shape: bf16[1152,128], index: 3, kind: input, shape index: {}]   ;;  %s5388_s4 = inlined_call_operand.vmem [shape: f32[2,128], index: 4, kind: input, shape index: {}]   ;;  %s5389_s5 = inlined_call_operand.vmem [shape: bf16[2,16,16,128], index: 5, kind: output, shape index: {0}]   ;;  %s5390_s6 = inlined_call_operand.vmem [shape: f32[2,1,2,128], index: 6, kind: output, shape index: {1}]  }
   0x1   :  { %s4166_s23 = smov 0  }
   0x2 LB: > { %s29_s24 = sadd.s32 1, %s4121_s22  ;;  %p3131_p0 = scmp.ge.s32.totalorder %s4125_s23, 1  ;;  %s4125_s23 = sphi %s4166_s23, %s17_s23   ;;  %s4121_s22 = sphi %s4164_s22, %s5394_s22   ;;  %s4117_s21 = sphi %s4162_s21, %s5393_s21  }
   0x3   : > { %p31_p1 = scmp.ge.s32.totalorder %s29_s24, 2  ;;  %p303_p2 = scmp.lt.s32.totalorder %s4125_s23, 3 }
   0x5   : > { %s5396_s24 = smov (%p31_p1, %s29_s24), 0  ;;  %p304_p3 = pnand %p3131_p0, %p303_p2 }
   0x6   : > { %v4029_v0 = vld [vmem:[%s5387_s3 + $0xc0] sm:$0xff] (!%p304_p3)   ;;  %v4031_v2 = vld [vmem:[%s5387_s3 + $0xc8] sm:$0xff] (!%p304_p3)   ;;  %p380_p4 = scmp.lt.s32.totalorder (!%p304_p3), %s4117_s21, 1  ;;  %v4033_v4 = vld [vmem:[%s5387_s3 + $0xd0] sm:$0xff] (!%p304_p3)   ;;  %vm820_vm0 = vcmask (!%p304_p3), 1040384   ;;  %vm1100_vm2 = vcmask (!%p304_p3), 1046528  }
   0x7   : > { %307 = sbr.rel (%p304_p3) target bundleno = 564 (0x234), region = 40  ;;  %v4030_v1 = vld [vmem:[%s5387_s3 + $0x80] sm:$0xff] (!%p304_p3)   ;;  %3469 = vmatprep.subr.bf16.mxu0 (!%p304_p3), %v4029_v0  ;;  %3989 = vmatprep.subr.bf16.mxu1 (!%p304_p3), %v4029_v0  ;;  %v4032_v3 = vld [vmem:[%s5387_s3 + $0x88] sm:$0xff] (!%p304_p3)   ;;  %v4034_v5 = vld [vmem:[%s5387_s3 + $0x90] sm:$0xff] (!%p304_p3)   ;;  %vm821_vm1 = vsmask.f32 (!%p304_p3), 256 }
   0x8   : > { %3470 = vmatpush3.bf16.msra.mxu0 (!%p304_p3), %v4030_v1  ;;  %3997 = vmatpush3.bf16.msra.mxu1 (!%p304_p3), %v4030_v1  ;;  %v4035_v6 = vld [vmem:[%s5387_s3 + $0xd8] sm:$0xff] (!%p304_p3)   ;;  %v4037_v8 = vld [vmem:[%s5387_s3 + $0xe0] sm:$0xff] (!%p304_p3)   ;;  %v4039_v10 = vld [vmem:[%s5387_s3 + $0xe8] sm:$0xff] (!%p304_p3)   ;;  %vm859_vm4 = vsmask.f32 (!%p304_p3), 7424 }
   0x9   : > { %3471 = vmatprep.subr.bf16.mxu0 (!%p304_p3), %v4031_v2  ;;  %3990 = vmatprep.subr.bf16.mxu1 (!%p304_p3), %v4031_v2  ;;  %v4036_v7 = vld [vmem:[%s5387_s3 + $0x98] sm:$0xff] (!%p304_p3)   ;;  %v4038_v9 = vld [vmem:[%s5387_s3 + $0xa0] sm:$0xff] (!%p304_p3)   ;;  %v4040_v13 = vld [vmem:[%s5387_s3 + $0xa8] sm:$0xff] (!%p304_p3)  }
   0xa   : > { %v4231_v11 = vld [vmem:[%s5388_s4] ss:$0 sm:$0xff] (!%p304_p3)  ;;  %v4041_v19 = vld [vmem:[%s5387_s3 + $0xf0] sm:$0xff] (!%p304_p3)   ;;  %v4245_v24 = vld [vmem:[%s5388_s4 + $0x1] ss:$0 sm:$0xff] (!%p304_p3) }
   0xb   : > { %v4042_v40 = vld [vmem:[%s5387_s3 + $0xb0] sm:$0xff] (!%p304_p3)   ;;  %v4043_v41 = vld [vmem:[%s5387_s3 + $0xf8] sm:$0xff] (!%p304_p3)   ;;  %v4045_v60 = vld [vmem:[%s5387_s3 + $0x40] sm:$0xff] (!%p304_p3)  }
   0xc   : > { %3472 = vmatpush3.bf16.msra.mxu0 (!%p304_p3), %v4032_v3  ;;  %3998 = vmatpush3.bf16.msra.mxu1 (!%p304_p3), %v4032_v3  ;;  %v4044_v51 = vld [vmem:[%s5387_s3 + $0xb8] sm:$0xff] (!%p304_p3)   ;;  %v4046_v1 = vld [vmem:[%s5387_s3 + $0x140] sm:$0xff] (!%p304_p3)   ;;  %vm4286_vm3 = vmand (!%p304_p3), %vm820_vm0, %vm821_vm1 }
   0xd   : > { %3473 = vmatprep.subr.bf16.mxu0 (!%p304_p3), %v4033_v4  ;;  %3991 = vmatprep.subr.bf16.mxu1 (!%p304_p3), %v4033_v4 }
   0xe   : > { %s5398_s21 = smov (!%p380_p4, %s4117_s21), 1 }
   0xf   : > { %s4207_s17 = sshll.u32 %s5398_s21, 7 }
  0x10   : > { %3474 = vmatpush3.bf16.msra.mxu0 %v4034_v5  ;;  %3999 = vmatpush3.bf16.msra.mxu1 %v4034_v5  ;;  %s4216_s26 = scalar_lea.vmem %s5385_s1, %s4207_s17  ;;  %s388_s29 = scalar_lea.vmem %s5384_s0, %s4207_s17 }
  0x11   : > { %3475 = vmatprep.subr.bf16.mxu0 %v4035_v6  ;;  %3992 = vmatprep.subr.bf16.mxu1 %v4035_v6  ;;  %v3291_v12 = vld [vmem:[%s4216_s26] sm:$0xff]   ;;  %v3449_v18 = vld [vmem:[%s4216_s26 + $0x58] sm:$0xff]   ;;  %v3439_v50 = vld [vmem:[%s4216_s26 + $0x8] sm:$0xff]   ;;  %s3252_s12 = sadd.s32 120, %s4207_s17  ;;  %s5306_s19 = scalar_lea.vmem %s5389_s5, %s4207_s17 }
  0x12   : > { %v3292_v14 = vunpack.c.l.bf16 %v3291_v12  ;;  %v3293_v15 = vunpack.c.h.bf16 %v3291_v12  ;;  %v3450_v16 = vld [vmem:[%s4216_s26 + $0x60] sm:$0xff]   ;;  %v3336_v27 = vunpack.c.l.bf16 %v3449_v18  ;;  %v3337_v28 = vunpack.c.h.bf16 %v3449_v18  ;;  %v3451_v56 = vld [vmem:[%s4216_s26 + $0x68] sm:$0xff]   ;;  %s416_s15 = scalar_lea.vmem %s5386_s2, %s3252_s12  ;;  %s3140_s17 = sshll.u32 %s5398_s21, 1 }
  0x13   : > { %v3287_v17 = vld [vmem:[%s388_s29] sm:$0xff]   ;;  %v3340_v20 = vunpack.c.l.bf16 %v3450_v16  ;;  %v3341_v21 = vunpack.c.h.bf16 %v3450_v16  ;;  %v3296_v55 = vunpack.c.l.bf16 %v3439_v50  ;;  %v3297_v61 = vunpack.c.h.bf16 %v3439_v50  ;;  %s438_s27 = scalar_lea.vmem %s5390_s6, %s3140_s17 }
  0x14   : > { %3476 = vmatpush3.bf16.msra.mxu0 %v4036_v7  ;;  %4000 = vmatpush3.bf16.msra.mxu1 %v4036_v7  ;;  %v3288_v22 = vunpack.c.l.bf16 %v3287_v17  ;;  %v3289_v23 = vunpack.c.h.bf16 %v3287_v17  ;;  %v530_v25 = vmul.f32 %v3292_v14, %v4231_v11  ;;  %v531_v26 = vmul.f32 %v3293_v15, %v4231_v11 }
  0x15   : > { %3477 = vmatprep.subr.bf16.mxu0 %v4037_v8  ;;  %3993 = vmatprep.subr.bf16.mxu1 %v4037_v8  ;;  %v554_v29 = vmul.f32 %v3340_v20, %v4231_v11  ;;  %v555_v30 = vmul.f32 %v3341_v21, %v4231_v11  ;;  %v552_v35 = vmul.f32 %v3336_v27, %v4231_v11 }
  0x16   : > { %v451_v31 = vmul.f32 %v3288_v22, %v4231_v11  ;;  %v562_v32 = vadd.f32 %v4245_v24, %v530_v25  ;;  %v563_v33 = vadd.f32 %v4245_v24, %v531_v26  ;;  %v452_v34 = vmul.f32 %v3289_v23, %v4231_v11 }
  0x17   : > { %v586_v36 = vadd.f32 %v4245_v24, %v554_v29  ;;  %v587_v37 = vadd.f32 %v4245_v24, %v555_v30  ;;  %v553_v39 = vmul.f32 %v3337_v28, %v4231_v11  ;;  %v584_v45 = vadd.f32 %v4245_v24, %v552_v35 }
  0x18   : > { %3478 = vmatpush3.bf16.msra.mxu0 %v4038_v9  ;;  %4001 = vmatpush3.bf16.msra.mxu1 %v4038_v9  ;;  %v457_v38 = vadd.f32 %v4245_v24, %v451_v31  ;;  %v594_v42 = vmax.f32 %v562_v32, 0.0  ;;  %v595_v43 = vmax.f32 %v563_v33, 0.0  ;;  %v458_v44 = vadd.f32 %v4245_v24, %v452_v34 }
  0x19   : > { %3479 = vmatprep.subr.bf16.mxu0 %v4039_v10  ;;  %3994 = vmatprep.subr.bf16.mxu1 %v4039_v10  ;;  %v618_v46 = vmax.f32 %v586_v36, 0.0  ;;  %v619_v47 = vmax.f32 %v587_v37, 0.0  ;;  %v585_v49 = vadd.f32 %v4245_v24, %v553_v39  ;;  %v616_v54 = vmax.f32 %v584_v45, 0.0  ;;  %v4047_v37 = vld [vmem:[%s5387_s3] sm:$0xff]  }
  0x1a   : > { %v459_v48 = vmax.f32 %v457_v38, 0.0  ;;  %v626_v52 = vpack.c.bf16 %v595_v43, %v594_v42  ;;  %v460_v53 = vmax.f32 %v458_v44, 0.0  ;;  %v532_v2 = vmul.f32 %v3296_v55, %v4231_v11  ;;  %v4049_v42 = vld [vmem:[%s5387_s3 + $0x48] sm:$0xff]  }
  0x1b   : > { %v638_v57 = vpack.c.bf16 %v619_v47, %v618_v46  ;;  %v617_v59 = vmax.f32 %v585_v49, 0.0  ;;  %v533_v6 = vmul.f32 %v3297_v61, %v4231_v11  ;;  %v3344_v10 = vunpack.c.l.bf16 %v3451_v56 }
  0x1c   : > { %3480 = vmatpush3.bf16.msra.mxu0 %v4040_v13  ;;  %4002 = vmatpush3.bf16.msra.mxu1 %v4040_v13  ;;  %v463_v58 = vmul.f32 0.0, %v459_v48  ;;  %v666_v62 = vshrl.u32 %v626_v52, 16  ;;  %v669_v63 = vshll.u32 %v626_v52, 16  ;;  %v464_v0 = vmul.f32 0.0, %v460_v53  ;;  %v4054_v53 = vld [vmem:[%s5387_s3 + $0x148] sm:$0xff]  }
  0x1d   : > { %3481 = vmatprep.subr.bf16.mxu0 %v4041_v19  ;;  %3995 = vmatprep.subr.bf16.mxu1 %v4041_v19  ;;  %v750_v3 = vshrl.u32 %v638_v57, 16  ;;  %v753_v4 = vshll.u32 %v638_v57, 16  ;;  %v637_v5 = vpack.c.bf16 %v617_v59, %v616_v54  ;;  %v564_v9 = vadd.f32 %v4245_v24, %v532_v2  ;;  %v3440_v54 = vld [vmem:[%s4216_s26 + $0x10] sm:$0xff]  }
  0x1e   : > { %v668_v7 = vrot.slane %v666_v62, 7  ;;  %v465_v8 = vpack.c.bf16 %v464_v0, %v463_v58  ;;  %v565_v15 = vadd.f32 %v4245_v24, %v533_v6  ;;  %v3345_v25 = vunpack.c.h.bf16 %v3451_v56  ;;  %v4050_v56 = vld [vmem:[%s5387_s3 + $0x8] sm:$0xff]   ;;  %v4051_v0 = vld [vmem:[%s5387_s3 + $0x50] sm:$0xff]  }
  0x1f   : > { %v752_v12 = vrot.slane %v750_v3, 7  ;;  %v743_v13 = vshrl.u32 %v637_v5, 16  ;;  %v746_v14 = vshll.u32 %v637_v5, 16  ;;  %v596_v20 = vmax.f32 %v564_v9, 0.0  ;;  %v4056_v3 = vld [vmem:[%s5387_s3 + $0x108] sm:$0xff]  }
  0x20   : > { %3482 = vmatpush3.bf16.msra.mxu0 %v4042_v40  ;;  %4003 = vmatpush3.bf16.msra.mxu1 %v4042_v40  ;;  %v671_v16 = vor.u32 %v669_v63, %v668_v7  ;;  %v659_v18 = vshrl.u32 %v465_v8, 16  ;;  %v662_v19 = vshll.u32 %v465_v8, 16  ;;  %v597_v23 = vmax.f32 %v565_v15, 0.0 }
  0x21   : > { %3483 = vmatprep.subr.bf16.mxu0 %v4043_v41  ;;  %3996 = vmatprep.subr.bf16.mxu1 %v4043_v41  ;;  %v755_v21 = vor.u32 %v753_v4, %v752_v12  ;;  %v745_v22 = vrot.slane %v743_v13, 7  ;;  %v556_v28 = vmul.f32 %v3344_v10, %v4231_v11  ;;  %v4297_v29 = vsel %vm4286_vm3, %v668_v7, 0  ;;  %v4048_v41 = vld [vmem:[%s5387_s3 + $0x100] sm:$0xff]   ;;  %v3441_v10 = vld [vmem:[%s4216_s26 + $0x18] sm:$0xff]  }
  0x22   : > { %v4292_v26 = vsel %vm4286_vm3, 0, %v671_v16  ;;  %v661_v27 = vrot.slane %v659_v18, 7  ;;  %v627_v33 = vpack.c.bf16 %v597_v23, %v596_v20  ;;  %v557_v38 = vmul.f32 %v3345_v25, %v4231_v11  ;;  %v4052_v16 = vld [vmem:[%s5387_s3 + $0x10] sm:$0xff]   ;;  %v4053_v20 = vld [vmem:[%s5387_s3 + $0x58] sm:$0xff]  }
  0x23   : > { %1395 = vmatprep.mubr.bf16.mxu0 %v4292_v26  ;;  %v4302_v30 = vsel %vm4286_vm3, 0, %v755_v21  ;;  %v748_v31 = vor.u32 %v746_v14, %v745_v22  ;;  %v4306_v32 = vsel %vm4286_vm3, %v745_v22, 0  ;;  %v588_v47 = vadd.f32 %v4245_v24, %v556_v28  ;;  %v3453_v25 = vld [vmem:[%s4216_s26 + $0x78] sm:$0xff]  }
  0x24   : > { %3484 = vmatpush3.bf16.msra.mxu0 %v4044_v51  ;;  %4004 = vmatpush3.bf16.msra.mxu1 %v4044_v51  ;;  %v664_v34 = vor.u32 %v662_v19, %v661_v27  ;;  %v4311_v35 = vsel %vm4286_vm3, %v661_v27, 0  ;;  %v1138_v36 = vrot.slane %v4306_v32, 1  ;;  %v673_v43 = vshrl.u32 %v627_v33, 16 }
  0x25   : > { %3581 = vmatprep.subr.bf16.mxu1 %v4045_v60  ;;  %3693 = vmatprep.subr.bf16.mxu0 %v4046_v1  ;;  %v1102_v39 = vrot.slane %v4311_v35, 1  ;;  %v4321_v40 = vsel %vm4286_vm3, 0, %v748_v31  ;;  %v676_v44 = vshll.u32 %v627_v33, 16  ;;  %v589_v48 = vadd.f32 %v4245_v24, %v557_v38  ;;  %v3452_v60 = vld [vmem:[%s4216_s26 + $0x70] sm:$0xff]  }
  0x26   : > { %1491 = vmatprep.mubr.bf16.mxu1 %v4302_v30  ;;  %v4331_v45 = vsel %vm4286_vm3, 0, %v664_v34  ;;  %v1137_v46 = vrot.slane %v4321_v40, 1  ;;  %v675_v50 = vrot.slane %v673_v43, 7  ;;  %v1104_v51 = vrot.slane %v4292_v26, 1 }
  0x27   : > { %v1101_v49 = vrot.slane %v4331_v45, 1  ;;  %v1105_v52 = vrot.slane %v4297_v29, 1  ;;  %v620_v57 = vmax.f32 %v588_v47, 0.0  ;;  %v621_v58 = vmax.f32 %v589_v48, 0.0 }
  0x28   : > { %v4344_v55 = vsel %vm1100_vm2, %v1137_v46, %v1138_v36  ;;  %v4351_v59 = vsel %vm4286_vm3, %v752_v12, 0  ;;  %v678_v62 = vor.u32 %v676_v44, %v675_v50  ;;  %v1140_v63 = vrot.slane %v4302_v30, 1  ;;  %v4062_v12 = vld [vmem:[%s5387_s3 + $0x150] sm:$0xff]   ;;  %v4408_v46 = vld [vmem:[%s4216_s26 + $0x20] sm:$0xff]  }
  0x29   : > { %v1103_v61 = vsel %vm1100_vm2, %v1101_v49, %v1102_v39  ;;  %1492 = vmatmul.mubr.bf16.vlgmr.msra.gmra.mrb[0].mxu1 %v4344_v55  ;;  %v639_v1 = vpack.c.bf16 %v621_v58, %v620_v57  ;;  %v1141_v2 = vrot.slane %v4351_v59, 1  ;;  %v3300_v4 = vunpack.c.l.bf16 %v3440_v54  ;;  %v4064_v39 = vld [vmem:[%s5387_s3 + $0x110] sm:$0xff]  }
  0x2a   : > { %1396 = vmatmul.mubr.bf16.vlgmr.msra.gmra.mrb[0].mxu0 %v1103_v61  ;;  %3582 = vmatpush3.bf16.msra.mxu1 %v4047_v37  ;;  %v3301_v5 = vunpack.c.h.bf16 %v3440_v54  ;;  %v4366_v6 = vsel %vm4286_vm3, 0, %v678_v62  ;;  %v3348_v7 = vunpack.c.l.bf16 %v3452_v60  ;;  %v3349_v8 = vunpack.c.h.bf16 %v3452_v60  ;;  %v4057_v61 = vld [vmem:[%s5387_s3 + $0x60] sm:$0xff]  }
  0x2b   : > { %3694 = vmatpush3.bf16.msra.mxu0 %v4048_v41  ;;  %3583 = vmatprep.subr.bf16.mxu1 %v4049_v42  ;;  %v4370_v9 = vsel %vm4286_vm3, %v675_v50, 0  ;;  %v757_v13 = vshrl.u32 %v639_v1, 16  ;;  %v760_v14 = vshll.u32 %v639_v1, 16  ;;  %v4378_v15 = vsel %vm1100_vm2, %v1104_v51, %v1105_v52  ;;  %v4055_v52 = vld [vmem:[%s5387_s3 + $0x18] sm:$0xff]  }
  0x2c   : > { %1403 = vmatprep.mubr.bf16.mxu0 %v4366_v6  ;;  %3695 = vmatprep.subr.bf16.mxu0 %v4054_v53  ;;  %v534_v18 = vmul.f32 %v3300_v4, %v4231_v11  ;;  %v4385_v19 = vsel %vm1100_vm2, %v1140_v63, %v1141_v2  ;;  %v535_v21 = vmul.f32 %v3301_v5, %v4231_v11  ;;  %v1107_v31 = vrot.slane %v4366_v6, 1 }
  0x2d   : > { %v558_v22 = vmul.f32 %v3348_v7, %v4231_v11  ;;  %v559_v23 = vmul.f32 %v3349_v8, %v4231_v11  ;;  %v759_v27 = vrot.slane %v757_v13, 7  ;;  %v3304_v33 = vunpack.c.l.bf16 %v3441_v10 }
  0x2e   : > { %3584 = vmatpush3.bf16.msra.mxu1 %v4050_v56  ;;  %v566_v28 = vadd.f32 %v4245_v24, %v534_v18  ;;  %v567_v34 = vadd.f32 %v4245_v24, %v535_v21  ;;  %v3305_v38 = vunpack.c.h.bf16 %v3441_v10  ;;  %v1108_v43 = vrot.slane %v4370_v9, 1  ;;  %v4058_v10 = vld [vmem:[%s5387_s3 + $0x20] sm:$0xff]  }
  0x2f   : > { %3585 = vmatprep.subr.bf16.mxu1 %v4051_v0  ;;  %3696 = vmatpush3.bf16.msra.mxu0 %v4056_v3  ;;  %v590_v36 = vadd.f32 %v4245_v24, %v558_v22  ;;  %v591_v37 = vadd.f32 %v4245_v24, %v559_v23  ;;  %v762_v41 = vor.u32 %v760_v14, %v759_v27  ;;  %v4405_v44 = vsel %vm4286_vm3, %v759_v27, 0  ;;  %v4069_v3 = vld [vmem:[%s5387_s3 + $0x158] sm:$0xff]   ;;  %v4059_v14 = vld [vmem:[%s5387_s3 + $0x68] sm:$0xff]   ;;  %v4071_v21 = vld [vmem:[%s5387_s3 + $0x160] sm:$0xff]  }
  0x30   : > { %v598_v42 = vmax.f32 %v566_v28, 0.0  ;;  %3697 = vmatprep.subr.bf16.mxu0 %v4062_v12  ;;  %v599_v47 = vmax.f32 %v567_v34, 0.0  ;;  %v1144_v50 = vrot.slane %v4405_v44, 1  ;;  %v536_v53 = vmul.f32 %v3304_v33, %v4231_v11  ;;  %v4070_v12 = vld [vmem:[%s5387_s3 + $0x118] sm:$0xff]  }
  0x31   : > { %v622_v48 = vmax.f32 %v590_v36, 0.0  ;;  %v623_v49 = vmax.f32 %v591_v37, 0.0  ;;  %v4413_v51 = vsel %vm4286_vm3, 0, %v762_v41  ;;  %v537_v54 = vmul.f32 %v3305_v38, %v4231_v11  ;;  %v4073_v37 = vld [vmem:[%s5387_s3 + $0x120] sm:$0xff]  }
  0x32   : > { %1404 = vmatmul.mubr.bf16.gmra.mrb[4].mxu0 %v4378_v15  ;;  %3586 = vmatpush3.bf16.msra.mxu1 %v4052_v16  ;;  %v3352_v56 = vunpack.c.l.bf16 %v3453_v25  ;;  %v628_v57 = vpack.c.bf16 %v599_v47, %v598_v42  ;;  %v1143_v60 = vrot.slane %v4413_v51, 1  ;;  %v3353_v62 = vunpack.c.h.bf16 %v3453_v25 }
  0x33   : > { %1499 = vmatprep.mubr.bf16.mxu1 %v4413_v51  ;;  %3587 = vmatprep.subr.bf16.mxu1 %v4053_v20  ;;  %v640_v58 = vpack.c.bf16 %v623_v49, %v622_v48  ;;  %v568_v63 = vadd.f32 %v4245_v24, %v536_v53  ;;  %v569_v0 = vadd.f32 %v4245_v24, %v537_v54  ;;  %v3308_v2 = vunpack.c.l.bf16 %v4408_v46  ;;  %v4061_v53 = vld [vmem:[%s5387_s3 + $0x70] sm:$0xff]  }
  0x34   : > { %1500 = vmatmul.mubr.bf16.gmra.mrb[4].mxu1 %v4385_v19  ;;  %v560_v1 = vmul.f32 %v3352_v56, %v4231_v11  ;;  %3698 = vmatpush3.bf16.msra.mxu0 %v4064_v39  ;;  %v680_v4 = vshrl.u32 %v628_v57, 16  ;;  %v683_v5 = vshll.u32 %v628_v57, 16  ;;  %v4441_v13 = vsel %vm1100_vm2, %v1107_v31, %v1108_v43  ;;  %v4060_v31 = vld [vmem:[%s5387_s3 + $0x28] sm:$0xff]  }
  0x35   : > { %v764_v7 = vshrl.u32 %v640_v58, 16  ;;  %v767_v8 = vshll.u32 %v640_v58, 16  ;;  %v600_v16 = vmax.f32 %v568_v63, 0.0  ;;  %v601_v18 = vmax.f32 %v569_v0, 0.0  ;;  %3699 = vmatprep.subr.bf16.mxu0 %v4069_v3  ;;  %v4065_v63 = vld [vmem:[%s5387_s3 + $0x78] sm:$0xff]   ;;  %v4075_v3 = vld [vmem:[%s5387_s3 + $0x168] sm:$0xff]  }
  0x36   : > { %3588 = vmatpush3.bf16.msra.mxu1 %v4055_v52  ;;  %v561_v20 = vmul.f32 %v3353_v62, %v4231_v11  ;;  %v682_v22 = vrot.slane %v680_v4, 7  ;;  %v592_v25 = vadd.f32 %v4245_v24, %v560_v1  ;;  %v3309_v27 = vunpack.c.h.bf16 %v4408_v46  ;;  %v4076_v4 = vld [vmem:[%s5387_s3 + $0x128] sm:$0xff]  }
  0x37   : > { %v766_v23 = vrot.slane %v764_v7, 7  ;;  %3589 = vmatprep.subr.bf16.mxu1 %v4057_v61  ;;  %v4453_v28 = vsel %vm1100_vm2, %v1143_v60, %v1144_v50  ;;  %v629_v33 = vpack.c.bf16 %v601_v18, %v600_v16  ;;  %v538_v36 = vmul.f32 %v3308_v2, %v4231_v11  ;;  %v4063_v61 = vld [vmem:[%s5387_s3 + $0x30] sm:$0xff]   ;;  %v3443_v18 = vld [vmem:[%s4216_s26 + $0x28] sm:$0xff]  }
  0x38   : > { %v593_v34 = vadd.f32 %v4245_v24, %v561_v20  ;;  %3700 = vmatpush3.bf16.msra.mxu0 %v4070_v12  ;;  %v685_v38 = vor.u32 %v683_v5, %v682_v22  ;;  %v624_v41 = vmax.f32 %v592_v25, 0.0  ;;  %v4465_v42 = vsel %vm4286_vm3, %v682_v22, 0  ;;  %v4066_v25 = vld [vmem:[%s5387_s3 + $0x38] sm:$0xff]  }
  0x39   : > { %v769_v39 = vor.u32 %v767_v8, %v766_v23  ;;  %3701 = vmatprep.subr.bf16.mxu0 %v4071_v21  ;;  %v687_v43 = vshrl.u32 %v629_v33, 16  ;;  %v690_v46 = vshll.u32 %v629_v33, 16  ;;  %v1111_v48 = vrot.slane %v4465_v42, 1 }
  0x3a   : > { %3590 = vmatpush3.bf16.msra.mxu1 %v4058_v10  ;;  %v625_v47 = vmax.f32 %v593_v34, 0.0  ;;  %v4470_v49 = vsel %vm4286_vm3, 0, %v685_v38  ;;  %v4478_v52 = vsel %vm4286_vm3, %v766_v23, 0  ;;  %v539_v54 = vmul.f32 %v3309_v27, %v4231_v11 }
  0x3b   : > { %v4474_v50 = vsel %vm4286_vm3, 0, %v769_v39  ;;  %3591 = vmatprep.subr.bf16.mxu1 %v4059_v14  ;;  %1411 = vmatprep.mubr.bf16.mxu0 %v4470_v49  ;;  %v689_v56 = vrot.slane %v687_v43, 7  ;;  %v1110_v58 = vrot.slane %v4470_v49, 1  ;;  %v1147_v62 = vrot.slane %v4478_v52, 1 }
  0x3c   : > { %1507 = vmatprep.mubr.bf16.mxu1 %v4474_v50  ;;  %v641_v57 = vpack.c.bf16 %v625_v47, %v624_v41  ;;  %v1146_v60 = vrot.slane %v4474_v50, 1  ;;  %1412 = vmatmul.mubr.bf16.gmra.mrb[8].mxu0 %v4441_v13  ;;  %v570_v0 = vadd.f32 %v4245_v24, %v538_v36  ;;  %v571_v1 = vadd.f32 %v4245_v24, %v539_v54  ;;  %v3444_v41 = vld [vmem:[%s4216_s26 + $0x30] sm:$0xff]  }
  0x3d   : > { %1508 = vmatmul.mubr.bf16.gmra.mrb[8].mxu1 %v4453_v28  ;;  %v861_v2 = vshrl.u32 %v4331_v45, 16  ;;  %v692_v5 = vor.u32 %v690_v46, %v689_v56  ;;  %3702 = vmatpush3.bf16.msra.mxu0 %v4073_v37  ;;  %v4507_v10 = vsel %vm1100_vm2, %v1110_v58, %v1111_v48  ;;  %v863_v16 = vshll.u32 %v4331_v45, 16  ;;  %v4067_v37 = vld [vmem:[%s5387_s3 + $0x1c0] sm:$0xff]   ;;  %v4079_v58 = vld [vmem:[%s5387_s3 + $0x170] sm:$0xff]  }
  0x3e   : > { %3592 = vmatpush3.bf16.msra.mxu1 %v4060_v31  ;;  %v771_v7 = vshrl.u32 %v641_v57, 16  ;;  %v774_v8 = vshll.u32 %v641_v57, 16  ;;  %v602_v12 = vmax.f32 %v570_v0, 0.0  ;;  %v603_v14 = vmax.f32 %v571_v1, 0.0  ;;  %3703 = vmatprep.subr.bf16.mxu0 %v4075_v3 }
  0x3f   : > { %3593 = vmatprep.subr.bf16.mxu1 %v4061_v53  ;;  %v4513_v20 = vsel %vm4286_vm3, 0, %v692_v5  ;;  %v868_v22 = vshll.u32 %v4311_v35, 16  ;;  %v4520_v23 = vsel %vm4286_vm3, %v689_v56, 0  ;;  %v865_v31 = vrot.slane %v863_v16, 1 }
  0x40   : > { %v4515_v21 = vrot.slane %v771_v7, 7  ;;  %1419 = vmatprep.mubr.bf16.mxu0 %v4513_v20  ;;  %v630_v27 = vpack.c.bf16 %v603_v14, %v602_v12  ;;  %v1113_v33 = vrot.slane %v4513_v20, 1  ;;  %v1114_v34 = vrot.slane %v4520_v23, 1  ;;  %v3445_v12 = vld [vmem:[%s4216_s26 + $0x38] sm:$0xff]  }
  0x41   : > { %v870_v35 = vrot.slane %v868_v22, 1  ;;  %v3312_v38 = vunpack.c.l.bf16 %v3443_v18  ;;  %v3313_v39 = vunpack.c.h.bf16 %v3443_v18  ;;  %3704 = vmatpush3.bf16.msra.mxu0 %v4076_v4  ;;  %v4534_v43 = vsel %vm1100_vm2, %v1146_v60, %v1147_v62  ;;  %v4080_v60 = vld [vmem:[%s5387_s3 + $0x130] sm:$0xff]   ;;  %v4083_v22 = vld [vmem:[%s5387_s3 + $0x178] sm:$0xff]  }
  0x42   : > { %v776_v36 = vor.u32 %v774_v8, %v4515_v21  ;;  %3594 = vmatpush3.bf16.msra.mxu1 %v4063_v61  ;;  %v694_v46 = vshrl.u32 %v630_v27, 16  ;;  %v697_v47 = vshll.u32 %v630_v27, 16  ;;  %v866_v48 = vor.u32 %v865_v31, %v861_v2  ;;  %3705 = vmatprep.subr.bf16.mxu0 %v4079_v58  ;;  %v4068_v27 = vld [vmem:[%s5387_s3 + $0x180] sm:$0xff]   ;;  %v4072_v58 = vld [vmem:[%s5387_s3 + $0x1c8] sm:$0xff]  }
  0x43   : > { %3595 = vmatprep.subr.bf16.mxu1 %v4065_v63  ;;  %v540_v54 = vmul.f32 %v3312_v38, %v4231_v11  ;;  %v541_v56 = vmul.f32 %v3313_v39, %v4231_v11  ;;  %v873_v57 = vshrl.u32 %v4292_v26, 16  ;;  %v875_v63 = vshll.u32 %v4292_v26, 16 }
  0x44   : > { %v4538_v53 = vsel %vm4286_vm3, 0, %v776_v36  ;;  %1420 = vmatmul.mubr.bf16.gmra.mrb[12].mxu0 %v4507_v10  ;;  %v696_v61 = vrot.slane %v694_v46, 7  ;;  %v871_v62 = vsel %vm859_vm4, %v866_v48, %v870_v35  ;;  %v880_v0 = vshll.u32 %v4297_v29, 16 }
  0x45   : > { %1515 = vmatprep.mubr.bf16.mxu1 %v4538_v53  ;;  %v572_v1 = vadd.f32 %v4245_v24, %v540_v54  ;;  %v573_v2 = vadd.f32 %v4245_v24, %v541_v56  ;;  %v3316_v3 = vunpack.c.l.bf16 %v3444_v41  ;;  %v3317_v4 = vunpack.c.h.bf16 %v3444_v41  ;;  %3706 = vmatpush3.bf16.msra.mxu0 %v4080_v60 }
  0x46   : > { %1516 = vmatmul.mubr.bf16.gmra.mrb[12].mxu1 %v4534_v43  ;;  %v699_v5 = vor.u32 %v697_v47, %v696_v61  ;;  %v4558_v7 = vsel %vm1100_vm2, %v1113_v33, %v1114_v34  ;;  %v877_v8 = vrot.slane %v875_v63, 1  ;;  %v882_v16 = vrot.slane %v880_v0, 1  ;;  %3707 = vmatprep.subr.bf16.mxu0 %v4083_v22  ;;  %v4084_v47 = vld [vmem:[%s5387_s3 + $0x138] sm:$0xff]   ;;  %v4597_v63 = vld [vmem:[%s5387_s3 + $0x200] sm:$0xff]   ;;  %v4077_v22 = vld [vmem:[%s5387_s3 + $0x1d0] sm:$0xff]  }
  0x47   : > { %3596 = vmatpush3.bf16.msra.mxu1 %v4066_v25  ;;  %1652 = vmatprep.mubr.bf16.mxu1 %v871_v62  ;;  %v604_v14 = vmax.f32 %v572_v1, 0.0  ;;  %v605_v29 = vmax.f32 %v573_v2, 0.0  ;;  %v542_v18 = vmul.f32 %v3316_v3, %v4231_v11  ;;  %v4574_v33 = vsel %vm4286_vm3, %v696_v61, 0  ;;  %v4074_v2 = vld [vmem:[%s5387_s3 + $0x188] sm:$0xff]  }
  0x48   : > { %3805 = vmatprep.subr.bf16.mxu1 %v4067_v37  ;;  %v4567_v25 = vsel %vm4286_vm3, 0, %v699_v5  ;;  %v878_v31 = vor.u32 %v877_v8, %v873_v57  ;;  %v543_v34 = vmul.f32 %v3317_v4, %v4231_v11  ;;  %v885_v37 = vshrl.u32 %v4366_v6, 16 }
  0x49   : > { %1427 = vmatprep.mubr.bf16.mxu0 %v4567_v25  ;;  %v631_v36 = vpack.c.bf16 %v605_v29, %v604_v14  ;;  %v574_v35 = vadd.f32 %v4245_v24, %v542_v18  ;;  %v887_v38 = vshll.u32 %v4366_v6, 16  ;;  %v892_v41 = vshll.u32 %v4370_v9, 16  ;;  %3708 = vmatpush3.bf16.msra.mxu0 %v4084_v47 }
  0x4a   : > { %v575_v39 = vadd.f32 %v4245_v24, %v543_v34  ;;  %v3320_v46 = vunpack.c.l.bf16 %v3445_v12  ;;  %v4587_v56 = vsel %vm859_vm4, %v878_v31, %v882_v16  ;;  %v1117_v60 = vrot.slane %v4574_v33, 1  ;;  %3941 = vmatprep.subr.bf16.mxu0 %v4597_v63 }
  0x4b   : > { %v701_v48 = vshrl.u32 %v631_v36, 16  ;;  %v704_v54 = vshll.u32 %v631_v36, 16  ;;  %v606_v57 = vmax.f32 %v574_v35, 0.0  ;;  %v889_v61 = vrot.slane %v887_v38, 1 }
  0x4c   : > { %1428 = vmatmul.mubr.bf16.gmra.mrb[16].mxu0 %v4558_v7  ;;  %v607_v9 = vmax.f32 %v575_v39, 0.0  ;;  %v3321_v62 = vunpack.c.h.bf16 %v3445_v12  ;;  %v1116_v1 = vrot.slane %v4567_v25, 1  ;;  %v544_v3 = vmul.f32 %v3320_v46, %v4231_v11 }
  0x4d   : > { %v703_v0 = vrot.slane %v701_v48, 7  ;;  %v899_v4 = vshll.u32 %v4470_v49, 16  ;;  %v894_v8 = vrot.slane %v892_v41, 1  ;;  %v890_v29 = vor.u32 %v889_v61, %v885_v37  ;;  %v4078_v48 = vld [vmem:[%s5387_s3 + $0x190] sm:$0xff]  }
  0x4e   : > { %1653 = vmatmul.mubr.bf16.vlgmr.msra.gmra.mrb[16].mxu1 %v4331_v45  ;;  %v632_v5 = vpack.c.bf16 %v607_v9, %v606_v57  ;;  %v545_v12 = vmul.f32 %v3321_v62, %v4231_v11  ;;  %v3446_v45 = vld [vmem:[%s4216_s26 + $0x40] sm:$0xff]   ;;  %v576_v16 = vadd.f32 %v4245_v24, %v544_v3  ;;  %v897_v18 = vshrl.u32 %v4470_v49, 16  ;;  %v4081_v9 = vld [vmem:[%s5387_s3 + $0x1d8] sm:$0xff]  }
  0x4f   : > { %3806 = vmatpush3.bf16.msra.mxu1 %v4068_v27  ;;  %1660 = vmatprep.mubr.bf16.mxu1 %v4587_v56  ;;  %v706_v14 = vor.u32 %v704_v54, %v703_v0  ;;  %v4617_v34 = vsel %vm4286_vm3, %v703_v0, 0  ;;  %v901_v36 = vrot.slane %v899_v4, 1  ;;  %v4624_v37 = vsel %vm1100_vm2, %v1116_v1, %v1117_v60  ;;  %v3447_v60 = vld [vmem:[%s4216_s26 + $0x48] sm:$0xff]  }
  0x50   : > { %3807 = vmatprep.subr.bf16.mxu1 %v4072_v58  ;;  %v708_v27 = vshrl.u32 %v632_v5, 16  ;;  %v711_v31 = vshll.u32 %v632_v5, 16  ;;  %v577_v38 = vadd.f32 %v4245_v24, %v545_v12  ;;  %v608_v39 = vmax.f32 %v576_v16, 0.0 }
  0x51   : > { %v4621_v35 = vsel %vm4286_vm3, 0, %v706_v14  ;;  %v904_v46 = vshll.u32 %v4465_v42, 16  ;;  %v3324_v47 = vunpack.c.l.bf16 %v3446_v45  ;;  %v4633_v54 = vsel %vm859_vm4, %v890_v29, %v894_v8 }
  0x52   : > { %1435 = vmatprep.mubr.bf16.mxu0 %v4621_v35  ;;  %v710_v41 = vrot.slane %v708_v27, 7  ;;  %v609_v57 = vmax.f32 %v577_v38, 0.0  ;;  %v3325_v58 = vunpack.c.h.bf16 %v3446_v45  ;;  %v1120_v42 = vrot.slane %v4617_v34, 1 }
  0x53   : > { %3808 = vmatpush3.bf16.msra.mxu1 %v4074_v2  ;;  %v902_v62 = vor.u32 %v901_v36, %v897_v18  ;;  %v911_v0 = vshll.u32 %v4513_v20, 16  ;;  %v1119_v1 = vrot.slane %v4621_v35, 1  ;;  %v546_v3 = vmul.f32 %v3324_v47, %v4231_v11  ;;  %v4085_v18 = vld [vmem:[%s5387_s3 + $0x1e0] sm:$0xff]  }
  0x54   : > { %3809 = vmatprep.subr.bf16.mxu1 %v4077_v22  ;;  %1436 = vmatmul.mubr.bf16.gmra.mrb[20].mxu0 %v4624_v37  ;;  %v713_v61 = vor.u32 %v711_v31, %v710_v41  ;;  %v633_v2 = vpack.c.bf16 %v609_v57, %v608_v39  ;;  %v547_v4 = vmul.f32 %v3325_v58, %v4231_v11  ;;  %v906_v8 = vrot.slane %v904_v46, 1 }
  0x55   : > { %v909_v12 = vshrl.u32 %v4513_v20, 16  ;;  %v3328_v45 = vunpack.c.l.bf16 %v3447_v60  ;;  %v4658_v11 = vsel %vm4286_vm3, %v710_v41, 0  ;;  %v578_v16 = vadd.f32 %v4245_v24, %v546_v3  ;;  %v4672_v41 = vld [vmem:[%s5388_s4] ss:$0 sm:$0xff]  ;;  %v4088_v3 = vld [vmem:[%s5387_s3 + $0x1e8] sm:$0xff]  }
  0x56   : > { %1661 = vmatmul.mubr.bf16.gmra.mrb[20].mxu1 %v4292_v26  ;;  %v4648_v5 = vsel %vm4286_vm3, 0, %v713_v61  ;;  %v4082_v26 = vld [vmem:[%s5387_s3 + $0x198] sm:$0xff]   ;;  %v715_v14 = vshrl.u32 %v633_v2, 16  ;;  %v718_v29 = vshll.u32 %v633_v2, 16  ;;  %v579_v22 = vadd.f32 %v4245_v24, %v547_v4  ;;  %v3448_v24 = vld [vmem:[%s4216_s26 + $0x50] sm:$0xff]  }
  0x57   : > { %1668 = vmatprep.mubr.bf16.mxu1 %v4633_v54  ;;  %3810 = vmatpush3.bf16.msra.mxu1 %v4078_v48  ;;  %v913_v27 = vrot.slane %v911_v0, 1  ;;  %v916_v31 = vshll.u32 %v4520_v23, 16  ;;  %v3329_v36 = vunpack.c.h.bf16 %v3447_v60  ;;  %v4667_v38 = vsel %vm1100_vm2, %v1119_v1, %v1120_v42  ;;  %v4087_v42 = vld [vmem:[%s5387_s3 + $0x1a0] sm:$0xff]  }
  0x58   : > { %1443 = vmatprep.mubr.bf16.mxu0 %v4648_v5  ;;  %3811 = vmatprep.subr.bf16.mxu1 %v4081_v9  ;;  %v717_v39 = vrot.slane %v715_v14, 7  ;;  %v610_v46 = vmax.f32 %v578_v16, 0.0  ;;  %v548_v47 = vmul.f32 %v4672_v41, %v3328_v45  ;;  %v611_v48 = vmax.f32 %v579_v22, 0.0  ;;  %v4684_v9 = vld [vmem:[%s5388_s4 + $0x1] ss:$0 sm:$0xff] }
  0x59   : > { %v549_v57 = vmul.f32 %v4672_v41, %v3329_v36  ;;  %v4678_v23 = vsel %vm859_vm4, %v902_v62, %v906_v8  ;;  %v1123_v60 = vrot.slane %v4658_v11, 1  ;;  %v1122_v0 = vrot.slane %v4648_v5, 1 }
  0x5a   : > { %v720_v58 = vor.u32 %v718_v29, %v717_v39  ;;  %v580_v61 = vadd.f32 %v4684_v9, %v548_v47  ;;  %v634_v62 = vpack.c.bf16 %v611_v48, %v610_v46  ;;  %v914_v1 = vor.u32 %v913_v27, %v909_v12  ;;  %v4090_v27 = vld [vmem:[%s5387_s3 + $0x1a8] sm:$0xff]   ;;  %v4091_v47 = vld [vmem:[%s5387_s3 + $0x1f0] sm:$0xff]  }
  0x5b   : > { %3812 = vmatpush3.bf16.msra.mxu1 %v4082_v26  ;;  %v581_v2 = vadd.f32 %v4684_v9, %v549_v57  ;;  %v918_v8 = vrot.slane %v916_v31, 1  ;;  %v3332_v26 = vunpack.c.l.bf16 %v3448_v24  ;;  %v923_v16 = vshll.u32 %v4567_v25, 16 }
  0x5c   : > { %3813 = vmatprep.subr.bf16.mxu1 %v4085_v18  ;;  %1444 = vmatmul.mubr.bf16.gmra.mrb[24].mxu0 %v4667_v38  ;;  %v4699_v4 = vsel %vm4286_vm3, 0, %v720_v58  ;;  %v612_v45 = vmax.f32 %v580_v61, 0.0  ;;  %v722_v12 = vshrl.u32 %v634_v62, 16  ;;  %v725_v14 = vshll.u32 %v634_v62, 16 }
  0x5d   : > { %1451 = vmatprep.mubr.bf16.mxu0 %v4699_v4  ;;  %v613_v29 = vmax.f32 %v581_v2, 0.0  ;;  %v3333_v18 = vunpack.c.h.bf16 %v3448_v24  ;;  %v550_v22 = vmul.f32 %v4672_v41, %v3332_v26  ;;  %v4709_v31 = vsel %vm1100_vm2, %v1122_v0, %v1123_v60 }
  0x5e   : > { %1669 = vmatmul.mubr.bf16.gmra.mrb[24].mxu1 %v4366_v6  ;;  %v724_v36 = vrot.slane %v722_v12, 7  ;;  %v4715_v48 = vsel %vm859_vm4, %v914_v1, %v918_v8  ;;  %v921_v57 = vshrl.u32 %v4567_v25, 16  ;;  %v4722_v60 = vsel %vm4286_vm3, %v717_v39, 0  ;;  %v4093_v8 = vld [vmem:[%s5387_s3 + $0x1b0] sm:$0xff]  }
  0x5f   : > { %1676 = vmatprep.mubr.bf16.mxu1 %v4678_v23  ;;  %3814 = vmatpush3.bf16.msra.mxu1 %v4087_v42  ;;  %v635_v46 = vpack.c.bf16 %v613_v29, %v612_v45  ;;  %v551_v24 = vmul.f32 %v4672_v41, %v3333_v18  ;;  %v582_v58 = vadd.f32 %v4684_v9, %v550_v22  ;;  %v925_v62 = vrot.slane %v923_v16, 1 }
  0x60   : > { %3815 = vmatprep.subr.bf16.mxu1 %v4088_v3  ;;  %v727_v61 = vor.u32 %v725_v14, %v724_v36  ;;  %v928_v2 = vshll.u32 %v4574_v33, 16  ;;  %v4094_v33 = vld [vmem:[%s5387_s3 + $0x1f8] sm:$0xff]   ;;  %v1125_v26 = vrot.slane %v4699_v4, 1  ;;  %v1126_v12 = vrot.slane %v4722_v60, 1 }
  0x61   : > { %v729_v42 = vshrl.u32 %v635_v46, 16  ;;  %v732_v0 = vshll.u32 %v635_v46, 16  ;;  %v583_v3 = vadd.f32 %v4684_v9, %v551_v24  ;;  %v614_v1 = vmax.f32 %v582_v58, 0.0  ;;  %v4096_v46 = vld [vmem:[%s5387_s3 + $0x1b8] sm:$0xff]  }
  0x62   : > { %v4732_v45 = vsel %vm4286_vm3, 0, %v727_v61  ;;  %v926_v16 = vor.u32 %v925_v62, %v921_v57  ;;  %v930_v18 = vrot.slane %v928_v2, 1  ;;  %v850_v57 = vsel %vm4286_vm3, %v724_v36, 0 }
  0x63   : > { %3816 = vmatpush3.bf16.msra.mxu1 %v4090_v27  ;;  %v731_v39 = vrot.slane %v729_v42, 7  ;;  %v615_v14 = vmax.f32 %v583_v3, 0.0  ;;  %v935_v27 = vshll.u32 %v4621_v35, 16  ;;  %v933_v42 = vshrl.u32 %v4621_v35, 16 }
  0x64   : > { %1452 = vmatmul.mubr.bf16.gmra.mrb[28].mxu0 %v4709_v31  ;;  %3817 = vmatprep.subr.bf16.mxu1 %v4091_v47  ;;  %v4747_v47 = vsel %vm1100_vm2, %v1125_v26, %v1126_v12  ;;  %v940_v3 = vshll.u32 %v4617_v34, 16  ;;  %v1129_v36 = vrot.slane %v850_v57, 1  ;;  %v947_v12 = vshll.u32 %v4648_v5, 16 }
  0x65   : > { %1459 = vmatprep.mubr.bf16.mxu0 %v4732_v45  ;;  %v734_v29 = vor.u32 %v732_v0, %v731_v39  ;;  %v636_v22 = vpack.c.bf16 %v615_v14, %v614_v1  ;;  %v4757_v0 = vsel %vm859_vm4, %v926_v16, %v930_v18  ;;  %v937_v2 = vrot.slane %v935_v27, 1 }
  0x66   : > { %1677 = vmatmul.mubr.bf16.gmra.mrb[28].mxu1 %v4470_v49  ;;  %v1128_v1 = vrot.slane %v4732_v45, 1  ;;  %v942_v26 = vrot.slane %v940_v3, 1  ;;  %v945_v18 = vshrl.u32 %v4648_v5, 16  ;;  %v952_v27 = vshll.u32 %v4658_v11, 16 }
  0x67   : > { %1684 = vmatprep.mubr.bf16.mxu1 %v4715_v48  ;;  %3818 = vmatpush3.bf16.msra.mxu1 %v4093_v8  ;;  %v736_v24 = vshrl.u32 %v636_v22, 16  ;;  %v4751_v58 = vsel %vm4286_vm3, 0, %v734_v29  ;;  %v739_v61 = vshll.u32 %v636_v22, 16  ;;  %v851_v29 = vsel %vm4286_vm3, %v731_v39, 0 }
  0x68   : > { %3819 = vmatprep.subr.bf16.mxu1 %v4094_v33  ;;  %v938_v33 = vor.u32 %v937_v2, %v933_v42  ;;  %v4767_v14 = vsel %vm1100_vm2, %v1128_v1, %v1129_v36  ;;  %v949_v22 = vrot.slane %v947_v12, 1  ;;  %v959_v42 = vshll.u32 %v4699_v4, 16 }
  0x69   : > { %v738_v62 = vrot.slane %v736_v24, 7  ;;  %v1132_v24 = vrot.slane %v851_v29, 1  ;;  %v957_v1 = vshrl.u32 %v4699_v4, 16 }
  0x6a   : > { %v4776_v16 = vsel %vm859_vm4, %v938_v33, %v942_v26  ;;  %v950_v39 = vor.u32 %v949_v22, %v945_v18  ;;  %v961_v36 = vrot.slane %v959_v42, 1  ;;  %v971_v18 = vshll.u32 %v4732_v45, 16 }
  0x6b   : > { %3820 = vmatpush3.bf16.msra.mxu1 %v4096_v46  ;;  %v741_v8 = vor.u32 %v739_v61, %v738_v62  ;;  %v1131_v46 = vrot.slane %v4751_v58, 1  ;;  %v954_v61 = vrot.slane %v952_v27, 1  ;;  %v852_v11 = vsel %vm4286_vm3, %v738_v62, 0 }
  0x6c   : > { %1460 = vmatmul.mubr.bf16.gmra.mrb[32].mxu0 %v4747_v47  ;;  %v1135_v26 = vrot.slane %v852_v11, 1  ;;  %v962_v62 = vor.u32 %v961_v36, %v957_v1  ;;  %v969_v27 = vshrl.u32 %v4732_v45, 16  ;;  %v983_v42 = vshll.u32 %v4751_v58, 16 }
  0x6d   : > { %1467 = vmatprep.mubr.bf16.mxu0 %v4751_v58  ;;  %v4771_v34 = vsel %vm4286_vm3, 0, %v741_v8  ;;  %v4787_v2 = vsel %vm1100_vm2, %v1131_v46, %v1132_v24  ;;  %v4792_v3 = vsel %vm859_vm4, %v950_v39, %v954_v61  ;;  %v964_v8 = vshll.u32 %v4722_v60, 16 }
  0x6e   : > { %1685 = vmatmul.mubr.bf16.gmra.mrb[32].mxu1 %v4513_v20  ;;  %v1134_v33 = vrot.slane %v4771_v34, 1  ;;  %v973_v46 = vrot.slane %v971_v18, 1  ;;  %v976_v24 = vshll.u32 %v850_v57, 16  ;;  %v981_v36 = vshrl.u32 %v4751_v58, 16  ;;  %v4089_v57 = vld [vmem:[%s5387_s3 + $0x208] sm:$0xff]  }
  0x6f   : > { %1692 = vmatprep.mubr.bf16.mxu1 %v4757_v0  ;;  %v966_v12 = vrot.slane %v964_v8, 1  ;;  %v985_v8 = vrot.slane %v983_v42, 1  ;;  %v1000_v18 = vshll.u32 %v852_v11, 16  ;;  %v4097_v11 = vld [vmem:[%s5387_s3 + $0x220] sm:$0xff]   ;;  %v1005_v42 = vshrl.u32 %v4321_v40, 16 }
  0x70   : > { %v4803_v22 = vsel %vm1100_vm2, %v1134_v33, %v1135_v26  ;;  %v974_v39 = vor.u32 %v973_v46, %v969_v27  ;;  %v978_v61 = vrot.slane %v976_v24, 1  ;;  %v988_v33 = vshll.u32 %v851_v29, 16  ;;  %v4095_v27 = vld [vmem:[%s5387_s3 + $0x218] sm:$0xff]  }
  0x71   : > { %v4806_v60 = vsel %vm859_vm4, %v962_v62, %v966_v12  ;;  %v986_v26 = vor.u32 %v985_v8, %v981_v36  ;;  %v995_v62 = vshll.u32 %v4771_v34, 16  ;;  %v1002_v24 = vrot.slane %v1000_v18, 1  ;;  %v4100_v18 = vld [vmem:[%s5387_s3 + $0x238] sm:$0xff]  }
  0x72   : > { %v4815_v1 = vsel %vm859_vm4, %v974_v39, %v978_v61  ;;  %v990_v29 = vrot.slane %v988_v33, 1  ;;  %v1007_v39 = vshll.u32 %v4321_v40, 16  ;;  %v1012_v8 = vshll.u32 %v4306_v32, 16  ;;  %v4098_v33 = vld [vmem:[%s5387_s3 + $0x228] sm:$0xff]   ;;  %v4099_v32 = vld [vmem:[%s5387_s3 + $0x230] sm:$0xff]  }
  0x73   : > { %v997_v12 = vrot.slane %v995_v62, 1  ;;  %v1017_v62 = vshrl.u32 %v4302_v30, 16 }
  0x74   : > { %1468 = vmatmul.mubr.bf16.gmra.mrb[36].mxu0 %v4767_v14  ;;  %v1009_v36 = vrot.slane %v1007_v39, 1  ;;  %v1029_v39 = vshrl.u32 %v4413_v51, 16 }
  0x75   : > { %1475 = vmatprep.mubr.bf16.mxu0 %v4771_v34 }
  0x76   : > { %1693 = vmatmul.mubr.bf16.gmra.mrb[36].mxu1 %v4567_v25 }
  0x77   : > { %1700 = vmatprep.mubr.bf16.mxu1 %v4776_v16 }
  0x7c   : > { %1476 = vmatmul.mubr.bf16.gmra.mrb[40].mxu0 %v4787_v2 }
  0x7d   : > { %1483 = vmatprep.mubr.bf16.mxu0 %v4321_v40 }
  0x7e   : > { %1701 = vmatmul.mubr.bf16.gmra.mrb[40].mxu1 %v4621_v35 }
  0x7f   : > { %1708 = vmatprep.mubr.bf16.mxu1 %v4792_v3 }
  0x84   : > { %1484 = vmatmul.mubr.bf16.gmra.mrb[44].mxu0 %v4803_v22 }
  0x85   : > { %1941 = vmatprep.mubr.bf16.mxu0 %v4378_v15  ;;  %v4092_v15 = vld [vmem:[%s5387_s3 + $0x210] sm:$0xff]  }
  0x86   : > { %1709 = vmatmul.mubr.bf16.gmra.mrb[44].mxu1 %v4648_v5 }
  0x87   : > { %1716 = vmatprep.mubr.bf16.mxu1 %v4806_v60 }
  0x8c   : > { %1942 = vmatmul.mubr.bf16.vlgmr.msra.gmra.mrb[48].mxu0 %v4587_v56  ;;  %v4831_v56 = vsel %vm859_vm4, %v986_v26, %v990_v29  ;;  %v1019_v26 = vshll.u32 %v4302_v30, 16 }
  0x8d   : > { %3942 = vmatpush3.bf16.msra.mxu0 %v4597_v63  ;;  %1949 = vmatprep.mubr.bf16.mxu0 %v4441_v13  ;;  %v993_v63 = vshrl.u32 %v4771_v34, 16 }
  0x8e   : > { %1717 = vmatmul.mubr.bf16.gmra.mrb[48].mxu1 %v4699_v4  ;;  %3943 = vmatprep.subr.bf16.mxu0 %v4089_v57 }
  0x8f   : > { %1724 = vmatprep.mubr.bf16.mxu1 %v4815_v1  ;;  %v998_v46 = vor.u32 %v997_v12, %v993_v63  ;;  %v1021_v63 = vrot.slane %v1019_v26, 1  ;;  %v1024_v12 = vshll.u32 %v4351_v59, 16 }
  0x91   : > { %3944 = vmatpush3.bf16.msra.mxu0 %v4089_v57  ;;  %v4846_v61 = vsel %vm859_vm4, %v998_v46, %v1002_v24  ;;  %v1010_v57 = vor.u32 %v1009_v36, %v1005_v42  ;;  %v1026_v46 = vrot.slane %v1024_v12, 1  ;;  %v1031_v24 = vshll.u32 %v4413_v51, 16 }
  0x92   : > { %3945 = vmatprep.subr.bf16.mxu0 %v4092_v15  ;;  %v1036_v42 = vshll.u32 %v4405_v44, 16  ;;  %v1048_v44 = vshll.u32 %v4478_v52, 16  ;;  %v1180_v52 = vrot.slane %v4538_v53, 1 }
  0x94   : > { %1950 = vmatmul.mubr.bf16.gmra.mrb[52].mxu0 %v4633_v54 }
  0x95   : > { %1957 = vmatprep.mubr.bf16.mxu0 %v4507_v10  ;;  %3946 = vmatpush3.bf16.msra.mxu0 %v4092_v15  ;;  %v1014_v15 = vrot.slane %v1012_v8, 1  ;;  %v1038_v8 = vrot.slane %v1036_v42, 1 }
  0x96   : > { %1725 = vmatmul.mubr.bf16.gmra.mrb[52].mxu1 %v4732_v45  ;;  %3947 = vmatprep.subr.bf16.mxu0 %v4095_v27 }
  0x97   : > { %1732 = vmatprep.mubr.bf16.mxu1 %v4831_v56  ;;  %v4862_v29 = vsel %vm859_vm4, %v1010_v57, %v1014_v15  ;;  %v1041_v15 = vshrl.u32 %v4474_v50, 16 }
  0x99   : > { %3948 = vmatpush3.bf16.msra.mxu0 %v4095_v27  ;;  %v1022_v27 = vor.u32 %v1021_v63, %v1017_v62  ;;  %v1050_v62 = vrot.slane %v1048_v44, 1 }
  0x9a   : > { %3949 = vmatprep.subr.bf16.mxu0 %v4097_v11 }
  0x9b   : > { %v4875_v59 = vsel %vm859_vm4, %v1022_v27, %v1026_v46 }
  0x9c   : > { %1958 = vmatmul.mubr.bf16.gmra.mrb[56].mxu0 %v4678_v23 }
  0x9d   : > { %1965 = vmatprep.mubr.bf16.mxu0 %v4558_v7  ;;  %3950 = vmatpush3.bf16.msra.mxu0 %v4097_v11  ;;  %v1033_v11 = vrot.slane %v1031_v24, 1 }
  0x9e   : > { %1733 = vmatmul.mubr.bf16.gmra.mrb[56].mxu1 %v4751_v58  ;;  %3951 = vmatprep.subr.bf16.mxu0 %v4098_v33 }
  0x9f   : > { %1740 = vmatprep.mubr.bf16.mxu1 %v4846_v61  ;;  %v1034_v36 = vor.u32 %v1033_v11, %v1029_v39 }
  0xa1   : > { %3952 = vmatpush3.bf16.msra.mxu0 %v4098_v33  ;;  %v1043_v33 = vshll.u32 %v4474_v50, 16  ;;  %v4885_v57 = vsel %vm859_vm4, %v1034_v36, %v1038_v8 }
  0xa2   : > { %3953 = vmatprep.subr.bf16.mxu0 %v4099_v32 }
  0xa3   : > { %v1045_v26 = vrot.slane %v1043_v33, 1 }
  0xa4   : > { %1966 = vmatmul.mubr.bf16.gmra.mrb[60].mxu0 %v4715_v48 }
  0xa5   : > { %1973 = vmatprep.mubr.bf16.mxu0 %v4624_v37  ;;  %3954 = vmatpush3.bf16.msra.mxu0 %v4099_v32  ;;  %v1046_v32 = vor.u32 %v1045_v26, %v1041_v15 }
  0xa6   : > { %1741 = vmatmul.mubr.bf16.gmra.mrb[60].mxu1 %v4771_v34  ;;  %3955 = vmatprep.subr.bf16.mxu0 %v4100_v18 }
  0xa7   : > { %1748 = vmatprep.mubr.bf16.mxu1 %v4862_v29  ;;  %v4894_v63 = vsel %vm859_vm4, %v1046_v32, %v1050_v62 }
  0xa9   : > { %3956 = vmatpush3.bf16.msra.mxu0 %v4100_v18 }
  0xac   : > { %1974 = vmatmul.mubr.bf16.gmra.mrb[64].mxu0 %v4757_v0 }
  0xad   : > { %1981 = vmatprep.mubr.bf16.mxu0 %v4667_v38 }
  0xae   : > { %1749 = vmatmul.mubr.bf16.gmra.mrb[64].mxu1 %v4321_v40 }
  0xaf   : > { %1756 = vmatprep.mubr.bf16.mxu1 %v4875_v59 }
  0xb4   : > { %1982 = vmatmul.mubr.bf16.gmra.mrb[68].mxu0 %v4776_v16 }
  0xb5   : > { %1989 = vmatprep.mubr.bf16.mxu0 %v4709_v31 }
  0xb6   : > { %1757 = vmatmul.mubr.bf16.gmra.mrb[68].mxu1 %v4302_v30 }
  0xb7   : > { %1764 = vmatprep.mubr.bf16.mxu1 %v4885_v57 }
  0xbc   : > { %1990 = vmatmul.mubr.bf16.gmra.mrb[72].mxu0 %v4792_v3 }
  0xbd   : > { %1997 = vmatprep.mubr.bf16.mxu0 %v4747_v47 }
  0xbe   : > { %1765 = vmatmul.mubr.bf16.gmra.mrb[72].mxu1 %v4413_v51 }
  0xbf   : > { %1772 = vmatprep.mubr.bf16.mxu1 %v4894_v63 }
  0xc4   : > { %1998 = vmatmul.mubr.bf16.gmra.mrb[76].mxu0 %v4806_v60 }
  0xc5   : > { %2005 = vmatprep.mubr.bf16.mxu0 %v4767_v14 }
  0xc6   : > { %1773 = vmatmul.mubr.bf16.gmra.mrb[76].mxu1 %v4474_v50 }
  0xc7   : > { %2262 = vmatprep.mubr.bf16.mxu1 %v4633_v54 }
  0xcc   : > { %2006 = vmatmul.mubr.bf16.gmra.mrb[80].mxu0 %v4815_v1 }
  0xcd   : > { %2013 = vmatprep.mubr.bf16.mxu0 %v4787_v2 }
  0xce   : > { %2263 = vmatmul.mubr.bf16.vlgmr.msra.gmra.mrb[80].mxu1 %v4366_v6  ;;  %v857_v6 = vsel %vm4286_vm3, %v4515_v21, 0 }
  0xcf   : > { %2270 = vmatprep.mubr.bf16.mxu1 %v4678_v23  ;;  %v1173_v54 = vshll.u32 %v857_v6, 16 }
  0xd1   : > { %v1175_v12 = vrot.slane %v1173_v54, 1 }
  0xd4   : > { %2014 = vmatmul.mubr.bf16.gmra.mrb[84].mxu0 %v4831_v56 }
  0xd5   : > { %2021 = vmatprep.mubr.bf16.mxu0 %v4803_v22 }
  0xd6   : > { %2271 = vmatmul.mubr.bf16.gmra.mrb[84].mxu1 %v4470_v49  ;;  %v1168_v49 = vshll.u32 %v4538_v53, 16 }
  0xd7   : > { %2278 = vmatprep.mubr.bf16.mxu1 %v4715_v48 }
  0xdc   : > { %2022 = vmatmul.mubr.bf16.gmra.mrb[88].mxu0 %v4846_v61 }
  0xdd   : > { %2029 = vmatprep.mubr.bf16.mxu0 %v4344_v55 }
  0xde   : > { %2279 = vmatmul.mubr.bf16.gmra.mrb[88].mxu1 %v4513_v20  ;;  %v1181_v20 = vrot.slane %v857_v6, 1 }
  0xdf   : > { %2286 = vmatprep.mubr.bf16.mxu1 %v4757_v0 }
  0xe0   : > { %v4935_v23 = vsel %vm1100_vm2, %v1180_v52, %v1181_v20 }
  0xe4   : > { %2030 = vmatmul.mubr.bf16.gmra.mrb[92].mxu0 %v4862_v29 }
  0xe5   : > { %2037 = vmatprep.mubr.bf16.mxu0 %v4385_v19 }
  0xe6   : > { %2287 = vmatmul.mubr.bf16.gmra.mrb[92].mxu1 %v4567_v25  ;;  %v1166_v25 = vshrl.u32 %v4538_v53, 16 }
  0xe7   : > { %2294 = vmatprep.mubr.bf16.mxu1 %v4776_v16 }
  0xec   : > { %2038 = vmatmul.mubr.bf16.gmra.mrb[96].mxu0 %v4875_v59 }
  0xed   : > { %2045 = vmatprep.mubr.bf16.mxu0 %v4453_v28 }
  0xee   : > { %2295 = vmatmul.mubr.bf16.gmra.mrb[96].mxu1 %v4621_v35  ;;  %v1170_v35 = vrot.slane %v1168_v49, 1 }
  0xef   : > { %2302 = vmatprep.mubr.bf16.mxu1 %v4792_v3 }
  0xf4   : > { %2046 = vmatmul.mubr.bf16.gmra.mrb[100].mxu0 %v4885_v57 }
  0xf5   : > { %2053 = vmatprep.mubr.bf16.mxu0 %v4534_v43 }
  0xf6   : > { %2303 = vmatmul.mubr.bf16.gmra.mrb[100].mxu1 %v4648_v5 }
  0xf7   : > { %2310 = vmatprep.mubr.bf16.mxu1 %v4806_v60  ;;  %v1171_v60 = vor.u32 %v1170_v35, %v1166_v25 }
  0xfc   : > { %v3557_v21 = vpop.f32.mrb[0].mxu1  ;;  %2054 = vmatmul.mubr.bf16.gmra.mrb[104].mxu0 %v4894_v63 }
  0xfd   : > { %v3485_v5 = vpop.f32.mrb[0].mxu0  ;;  %v3558_v48 = vpop.f32.mrb[1].mxu1  ;;  %2061 = vmatprep.mubr.bf16.mxu0 %v4935_v23 }
  0xfe   : > { %2311 = vmatmul.mubr.bf16.gmra.mrb[104].mxu1 %v4699_v4  ;;  %v3486_v0 = vpop.f32.mrb[1].mxu0  ;;  %v4939_v16 = vadd.f32 %v3558_v48, %v3557_v21  ;;  %v3560_v3 = vpop.f32.mrb[2].mxu1  ;;  %v4951_v4 = vsel %vm859_vm4, %v1171_v60, %v1175_v12 }
  0xff   : > { %v4942_v18 = vadd.f32 %v3486_v0, %v3485_v5  ;;  %v3488_v27 = vpop.f32.mrb[2].mxu0  ;;  %v3561_v46 = vpop.f32.mrb[3].mxu1  ;;  %2318 = vmatprep.mubr.bf16.mxu1 %v4815_v1  ;;  %v3355_v1 = vld [vmem:[%s416_s15] sm:$0xff]  }
 0x100   : > { %v3489_v24 = vpop.f32.mrb[3].mxu0  ;;  %v4945_v39 = vadd.f32 %v3561_v46, %v3560_v3  ;;  %v3356_v49 = vunpack.c.l.bf16 %v3355_v1  ;;  %v3357_v52 = vunpack.c.h.bf16 %v3355_v1 }
 0x101   : > { %v4948_v11 = vadd.f32 %v3489_v24, %v3488_v27 }
 0x102   : > { %v648_v25 = vmul.f32 %v4672_v41, %v3357_v52 }
 0x104   : > { %2062 = vmatmul.mubr.bf16.gmra.mrb[108].mxu0 %v4951_v4  ;;  %v650_v48 = vadd.f32 %v4684_v9, %v648_v25 }
 0x105   : > { %v3491_v42 = vpop.f32.mrb[4].mxu0  ;;  %3957 = vmatprep.mubr.bf16.mxu0 %v4441_v13  ;;  %v647_v13 = vmul.f32 %v4672_v41, %v3356_v49 }
 0x106   : > { %2319 = vmatmul.mubr.bf16.gmra.mrb[108].mxu1 %v4732_v45  ;;  %v3492_v36 = vpop.f32.mrb[5].mxu0  ;;  %v652_v27 = vmax.f32 %v650_v48, 0.0 }
 0x107   : > { %v3563_v8 = vpop.f32.mrb[4].mxu1  ;;  %v4959_v33 = vadd.f32 %v3492_v36, %v3491_v42  ;;  %v3494_v15 = vpop.f32.mrb[6].mxu0  ;;  %2326 = vmatprep.mubr.bf16.mxu1 %v4831_v56  ;;  %v649_v5 = vadd.f32 %v4684_v9, %v647_v13 }
 0x108   : > { %v3564_v26 = vpop.f32.mrb[5].mxu1  ;;  %v3495_v44 = vpop.f32.mrb[7].mxu0  ;;  %v656_v36 = vmul.f32 0.0, %v652_v27 }
 0x109   : > { %v4962_v32 = vadd.f32 %v3564_v26, %v3563_v8  ;;  %v3566_v62 = vpop.f32.mrb[6].mxu1  ;;  %v4964_v6 = vadd.f32 %v3495_v44, %v3494_v15 }
 0x10a   : > { %v3567_v45 = vpop.f32.mrb[7].mxu1 }
 0x10b   : > { %v4966_v20 = vadd.f32 %v3567_v45, %v3566_v62 }
 0x10c   : > { %3958 = vmatmul.mubr.bf16.vlgmr.msra.gmra.mrb[112].mxu0 %v4507_v10 }
 0x10d   : > { %3961 = vmatprep.mubr.bf16.mxu0 %v4558_v7 }
 0x10e   : > { %2327 = vmatmul.mubr.bf16.gmra.mrb[112].mxu1 %v4751_v58 }
 0x10f   : > { %2334 = vmatprep.mubr.bf16.mxu1 %v4846_v61  ;;  %v3497_v56 = vpop.f32.mrb[8].mxu0  ;;  %v651_v61 = vmax.f32 %v649_v5, 0.0 }
 0x110   : > { %v3569_v35 = vpop.f32.mrb[8].mxu1  ;;  %v3498_v54 = vpop.f32.mrb[9].mxu0 }
 0x111   : > { %v3570_v21 = vpop.f32.mrb[9].mxu1  ;;  %v4976_v0 = vadd.f32 %v3498_v54, %v3497_v56  ;;  %v3500_v3 = vpop.f32.mrb[10].mxu0  ;;  %v655_v42 = vmul.f32 0.0, %v651_v61 }
 0x112   : > { %v4978_v10 = vadd.f32 %v3570_v21, %v3569_v35  ;;  %v3572_v41 = vpop.f32.mrb[10].mxu1  ;;  %v3501_v60 = vpop.f32.mrb[11].mxu0 }
 0x113   : > { %v3573_v58 = vpop.f32.mrb[11].mxu1  ;;  %v4980_v12 = vadd.f32 %v3501_v60, %v3500_v3 }
 0x114   : > { %v4982_v7 = vadd.f32 %v3573_v58, %v3572_v41  ;;  %3962 = vmatmul.mubr.bf16.gmra.mrb[116].mxu0 %v4624_v37 }
 0x115   : > { %3965 = vmatprep.mubr.bf16.mxu0 %v4667_v38  ;;  %v657_v38 = vpack.c.bf16 %v656_v36, %v655_v42 }
 0x116   : > { %2335 = vmatmul.mubr.bf16.gmra.mrb[116].mxu1 %v4771_v34 }
 0x117   : > { %2342 = vmatprep.mubr.bf16.mxu1 %v4862_v29  ;;  %v3503_v9 = vpop.f32.mrb[12].mxu0  ;;  %v778_v13 = vshrl.u32 %v657_v38, 16  ;;  %v781_v3 = vshll.u32 %v657_v38, 16 }
 0x118   : > { %v3504_v24 = vpop.f32.mrb[13].mxu0 }
 0x119   : > { %v3575_v46 = vpop.f32.mrb[12].mxu1  ;;  %v4988_v1 = vadd.f32 %v3504_v24, %v3503_v9  ;;  %v3506_v15 = vpop.f32.mrb[14].mxu0 }
 0x11a   : > { %v3576_v8 = vpop.f32.mrb[13].mxu1  ;;  %v3507_v44 = vpop.f32.mrb[15].mxu0 }
 0x11b   : > { %v4990_v26 = vadd.f32 %v3576_v8, %v3575_v46  ;;  %v3578_v37 = vpop.f32.mrb[14].mxu1  ;;  %v4992_v62 = vadd.f32 %v3507_v44, %v3506_v15 }
 0x11c   : > { %v3579_v34 = vpop.f32.mrb[15].mxu1  ;;  %3966 = vmatmul.mubr.bf16.gmra.mrb[120].mxu0 %v4709_v31 }
 0x11d   : > { %v4994_v49 = vadd.f32 %v3579_v34, %v3578_v37  ;;  %3969 = vmatprep.mubr.bf16.mxu0 %v4747_v47 }
 0x11e   : > { %2343 = vmatmul.mubr.bf16.gmra.mrb[120].mxu1 %v4321_v40 }
 0x11f   : > { %2350 = vmatprep.mubr.bf16.mxu1 %v4875_v59  ;;  %v3509_v29 = vpop.f32.mrb[16].mxu0  ;;  %v780_v59 = vrot.slane %v778_v13, 7 }
 0x120   : > { %v3510_v45 = vpop.f32.mrb[17].mxu0 }
 0x121   : > { %v3597_v52 = vpop.f32.mrb[16].mxu1  ;;  %v5000_v25 = vadd.f32 %v3510_v45, %v3509_v29  ;;  %v3512_v35 = vpop.f32.mrb[18].mxu0  ;;  %v783_v27 = vor.u32 %v781_v3, %v780_v59 }
 0x122   : > { %v3598_v56 = vpop.f32.mrb[17].mxu1  ;;  %v3513_v5 = vpop.f32.mrb[19].mxu0 }
 0x123   : > { %v3599_v54 = vadd.f32 %v3598_v56, %v3597_v52  ;;  %v3600_v21 = vpop.f32.mrb[18].mxu1  ;;  %v5002_v48 = vadd.f32 %v3513_v5, %v3512_v35 }
 0x124   : > { %v3601_v31 = vpop.f32.mrb[19].mxu1  ;;  %3970 = vmatmul.mubr.bf16.gmra.mrb[124].mxu0 %v4767_v14 }
 0x125   : > { %v5005_v40 = vadd.f32 %v3599_v54, %v4942_v18  ;;  %v3602_v47 = vadd.f32 %v3601_v31, %v3600_v21  ;;  %3973 = vmatprep.mubr.bf16.mxu0 %v4787_v2 }
 0x126   : > { %2351 = vmatmul.mubr.bf16.gmra.mrb[124].mxu1 %v4302_v30 }
 0x127   : > { %v5011_v41 = vadd.f32 %v3602_v47, %v4948_v11  ;;  %2358 = vmatprep.mubr.bf16.mxu1 %v4885_v57  ;;  %v3515_v60 = vpop.f32.mrb[20].mxu0  ;;  %v5024_v57 = vsel %vm4286_vm3, 0, %v783_v27 }
 0x128   : > { %v3516_v61 = vpop.f32.mrb[21].mxu0 }
 0x129   : > { %v3603_v58 = vpop.f32.mrb[20].mxu1  ;;  %v5014_v18 = vadd.f32 %v3516_v61, %v3515_v60  ;;  %v3518_v46 = vpop.f32.mrb[22].mxu0 }
 0x12a   : > { %v3604_v9 = vpop.f32.mrb[21].mxu1  ;;  %v3519_v42 = vpop.f32.mrb[23].mxu0 }
 0x12b   : > { %v3605_v14 = vadd.f32 %v3604_v9, %v3603_v58  ;;  %v3606_v24 = vpop.f32.mrb[22].mxu1  ;;  %v5016_v36 = vadd.f32 %v3519_v42, %v3518_v46  ;;  %v1199_v9 = vrot.slane %v5024_v57, 1 }
 0x12c   : > { %v3607_v30 = vpop.f32.mrb[23].mxu1  ;;  %3974 = vmatmul.mubr.bf16.gmra.mrb[128].mxu0 %v4803_v22  ;;  %v858_v22 = vsel %vm4286_vm3, %v780_v59, 0 }
 0x12d   : > { %v5019_v2 = vadd.f32 %v3605_v14, %v4959_v33  ;;  %v3608_v11 = vadd.f32 %v3607_v30, %v3606_v24  ;;  %3977 = vmatprep.mubr.bf16.mxu0 %v4344_v55  ;;  %v1187_v33 = vshll.u32 %v5024_v57, 16  ;;  %v1192_v56 = vshll.u32 %v858_v22, 16 }
 0x12e   : > { %2359 = vmatmul.mubr.bf16.gmra.mrb[128].mxu1 %v4413_v51  ;;  %v1200_v46 = vrot.slane %v858_v22, 1 }
 0x12f   : > { %v5029_v8 = vadd.f32 %v3608_v11, %v4964_v6  ;;  %2366 = vmatprep.mubr.bf16.mxu1 %v4894_v63  ;;  %v3521_v15 = vpop.f32.mrb[24].mxu0  ;;  %v1185_v63 = vshrl.u32 %v5024_v57, 16  ;;  %v1189_v13 = vrot.slane %v1187_v33, 1  ;;  %v1194_v31 = vrot.slane %v1192_v56, 1 }
 0x130   : > { %v3522_v44 = vpop.f32.mrb[25].mxu0 }
 0x131   : > { %v3609_v37 = vpop.f32.mrb[24].mxu1  ;;  %v5035_v34 = vadd.f32 %v3522_v44, %v3521_v15  ;;  %v3524_v29 = vpop.f32.mrb[26].mxu0  ;;  %v1190_v5 = vor.u32 %v1189_v13, %v1185_v63 }
 0x132   : > { %v3610_v38 = vpop.f32.mrb[25].mxu1  ;;  %v3525_v55 = vpop.f32.mrb[27].mxu0 }
 0x133   : > { %v3611_v51 = vadd.f32 %v3610_v38, %v3609_v37  ;;  %v3612_v52 = vpop.f32.mrb[26].mxu1  ;;  %v5037_v45 = vadd.f32 %v3525_v55, %v3524_v29 }
 0x134   : > { %v3613_v6 = vpop.f32.mrb[27].mxu1  ;;  %3978 = vmatmul.mubr.bf16.gmra.mrb[132].mxu0 %v4385_v19 }
 0x135   : > { %v5041_v35 = vadd.f32 %v3611_v51, %v4976_v0  ;;  %v3614_v54 = vadd.f32 %v3613_v6, %v3612_v52  ;;  %3981 = vmatprep.mubr.bf16.mxu0 %v4453_v28 }
 0x136   : > { %2367 = vmatmul.mubr.bf16.gmra.mrb[132].mxu1 %v4474_v50 }
 0x137   : > { %v5047_v17 = vadd.f32 %v3614_v54, %v4980_v12  ;;  %2374 = vmatprep.mubr.bf16.mxu1 %v4951_v4  ;;  %v3527_v21 = vpop.f32.mrb[28].mxu0  ;;  %v1195_v12 = vsel %vm859_vm4, %v1190_v5, %v1194_v31 }
 0x138   : > { %v3528_v59 = vpop.f32.mrb[29].mxu0 }
 0x139   : > { %v3615_v47 = vpop.f32.mrb[28].mxu1  ;;  %v5050_v3 = vadd.f32 %v3528_v59, %v3527_v21  ;;  %v3530_v60 = vpop.f32.mrb[30].mxu0 }
 0x13a   : > { %v3616_v0 = vpop.f32.mrb[29].mxu1  ;;  %v3531_v61 = vpop.f32.mrb[31].mxu0 }
 0x13b   : > { %v3617_v58 = vadd.f32 %v3616_v0, %v3615_v47  ;;  %v3618_v19 = vpop.f32.mrb[30].mxu1  ;;  %v5052_v50 = vadd.f32 %v3531_v61, %v3530_v60 }
 0x13c   : > { %v3619_v28 = vpop.f32.mrb[31].mxu1  ;;  %3982 = vmatmul.mubr.bf16.gmra.mrb[136].mxu0 %v4534_v43  ;;  %v1201_v43 = vsel %vm1100_vm2, %v1199_v9, %v1200_v46 }
 0x13d   : > { %v5056_v27 = vadd.f32 %v3617_v58, %v4988_v1  ;;  %v3620_v4 = vadd.f32 %v3619_v28, %v3618_v19  ;;  %3985 = vmatprep.mubr.bf16.mxu0 %v4935_v23 }
 0x13e   : > { %2375 = vmatmul.mubr.bf16.gmra.mrb[136].mxu1 %v4538_v53 }
 0x13f   : > { %v5063_v14 = vadd.f32 %v3620_v4, %v4992_v62  ;;  %2382 = vmatprep.mubr.bf16.mxu1 %v1195_v12  ;;  %v3533_v24 = vpop.f32.mrb[32].mxu0 }
 0x140   : > { %v3534_v30 = vpop.f32.mrb[33].mxu0 }
 0x141   : > { %v3621_v42 = vpop.f32.mrb[32].mxu1  ;;  %v5065_v11 = vadd.f32 %v3534_v30, %v3533_v24  ;;  %v3536_v15 = vpop.f32.mrb[34].mxu0 }
 0x142   : > { %v3622_v1 = vpop.f32.mrb[33].mxu1  ;;  %v3537_v37 = vpop.f32.mrb[35].mxu0 }
 0x143   : > { %v3623_v33 = vadd.f32 %v3622_v1, %v3621_v42  ;;  %v3624_v53 = vpop.f32.mrb[34].mxu1  ;;  %v5068_v23 = vadd.f32 %v3537_v37, %v3536_v15 }
 0x144   : > { %v3625_v44 = vpop.f32.mrb[35].mxu1  ;;  %3986 = vmatmul.mubr.bf16.gmra.mrb[140].mxu0 %v1201_v43 }
 0x145   : > { %v5071_v22 = vadd.f32 %v3623_v33, %v5000_v25  ;;  %v3626_v62 = vadd.f32 %v3625_v44, %v3624_v53 }
 0x146   : > { %2383 = vmatmul.mubr.bf16.gmra.mrb[140].mxu1 %v5024_v57 }
 0x147   : > { %v5075_v38 = vadd.f32 %v3626_v62, %v5002_v48  ;;  %v3539_v29 = vpop.f32.mrb[36].mxu0 }
 0x148   : > { %v3540_v52 = vpop.f32.mrb[37].mxu0 }
 0x149   : > { %v3627_v51 = vpop.f32.mrb[36].mxu1  ;;  %v5077_v55 = vadd.f32 %v3540_v52, %v3539_v29  ;;  %v3542_v63 = vpop.f32.mrb[38].mxu0 }
 0x14a   : > { %v3628_v6 = vpop.f32.mrb[37].mxu1  ;;  %v3543_v54 = vpop.f32.mrb[39].mxu0 }
 0x14b   : > { %v3629_v13 = vadd.f32 %v3628_v6, %v3627_v51  ;;  %v3630_v56 = vpop.f32.mrb[38].mxu1  ;;  %v5079_v21 = vadd.f32 %v3543_v54, %v3542_v63 }
 0x14c   : > { %v3631_v25 = vpop.f32.mrb[39].mxu1 }
 0x14d   : > { %v5082_v5 = vadd.f32 %v3629_v13, %v5014_v18  ;;  %v3632_v57 = vadd.f32 %v3631_v25, %v3630_v56 }
 0x14f   : > { %v5085_v48 = vadd.f32 %v3632_v57, %v5016_v36  ;;  %v3545_v31 = vpop.f32.mrb[40].mxu0 }
 0x150   : > { %v3546_v59 = vpop.f32.mrb[41].mxu0 }
 0x151   : > { %v3633_v47 = vpop.f32.mrb[40].mxu1  ;;  %v5087_v0 = vadd.f32 %v3546_v59, %v3545_v31  ;;  %v3548_v58 = vpop.f32.mrb[42].mxu0 }
 0x152   : > { %v3634_v60 = vpop.f32.mrb[41].mxu1  ;;  %v3549_v28 = vpop.f32.mrb[43].mxu0 }
 0x153   : > { %v3635_v19 = vadd.f32 %v3634_v60, %v3633_v47  ;;  %v3636_v61 = vpop.f32.mrb[42].mxu1  ;;  %v5089_v12 = vadd.f32 %v3549_v28, %v3548_v58 }
 0x154   : > { %v3637_v4 = vpop.f32.mrb[43].mxu1 }
 0x155   : > { %v5092_v18 = vadd.f32 %v3635_v19, %v5035_v34  ;;  %v3638_v9 = vadd.f32 %v3637_v4, %v3636_v61 }
 0x157   : > { %v5095_v36 = vadd.f32 %v3638_v9, %v5037_v45  ;;  %v3551_v46 = vpop.f32.mrb[44].mxu0 }
 0x158   : > { %v3552_v42 = vpop.f32.mrb[45].mxu0 }
 0x159   : > { %v3639_v24 = vpop.f32.mrb[44].mxu1  ;;  %v5097_v30 = vadd.f32 %v3552_v42, %v3551_v46  ;;  %v3554_v15 = vpop.f32.mrb[46].mxu0 }
 0x15a   : > { %v3640_v1 = vpop.f32.mrb[45].mxu1  ;;  %v3555_v53 = vpop.f32.mrb[47].mxu0 }
 0x15b   : > { %v3641_v43 = vadd.f32 %v3640_v1, %v3639_v24  ;;  %v3642_v33 = vpop.f32.mrb[46].mxu1  ;;  %v5099_v37 = vadd.f32 %v3555_v53, %v3554_v15 }
 0x15c   : > { %v3643_v44 = vpop.f32.mrb[47].mxu1 }
 0x15d   : > { %v5102_v34 = vadd.f32 %v3641_v43, %v5050_v3  ;;  %v3644_v62 = vadd.f32 %v3643_v44, %v3642_v33 }
 0x15f   : > { %v5105_v45 = vadd.f32 %v3644_v62, %v5052_v50  ;;  %v3709_v29 = vpop.f32.mrb[48].mxu0 }
 0x160   : > { %v3710_v52 = vpop.f32.mrb[49].mxu0 }
 0x161   : > { %v3645_v51 = vpop.f32.mrb[48].mxu1  ;;  %v3711_v63 = vadd.f32 %v3710_v52, %v3709_v29  ;;  %v3712_v13 = vpop.f32.mrb[50].mxu0 }
 0x162   : > { %v3646_v6 = vpop.f32.mrb[49].mxu1  ;;  %v3713_v25 = vpop.f32.mrb[51].mxu0 }
 0x163   : > { %v3647_v56 = vadd.f32 %v3646_v6, %v3645_v51  ;;  %v3648_v54 = vpop.f32.mrb[50].mxu1  ;;  %v5108_v57 = vadd.f32 %v3711_v63, %v5005_v40  ;;  %v3714_v47 = vadd.f32 %v3713_v25, %v3712_v13 }
 0x164   : > { %v3649_v31 = vpop.f32.mrb[51].mxu1 }
 0x165   : > { %v5111_v3 = vadd.f32 %v3647_v56, %v5065_v11  ;;  %v3650_v59 = vadd.f32 %v3649_v31, %v3648_v54  ;;  %v5114_v50 = vadd.f32 %v3714_v47, %v5011_v41 }
 0x167   : > { %v5117_v60 = vadd.f32 %v3650_v59, %v5068_v23  ;;  %v3715_v58 = vpop.f32.mrb[52].mxu0 }
 0x168   : > { %v3716_v61 = vpop.f32.mrb[53].mxu0 }
 0x169   : > { %v3651_v19 = vpop.f32.mrb[52].mxu1  ;;  %v3717_v4 = vadd.f32 %v3716_v61, %v3715_v58  ;;  %v3718_v9 = vpop.f32.mrb[54].mxu0 }
 0x16a   : > { %v3652_v28 = vpop.f32.mrb[53].mxu1  ;;  %v3719_v24 = vpop.f32.mrb[55].mxu0 }
 0x16b   : > { %v3653_v40 = vadd.f32 %v3652_v28, %v3651_v19  ;;  %v3654_v46 = vpop.f32.mrb[54].mxu1  ;;  %v5120_v42 = vadd.f32 %v3717_v4, %v5019_v2  ;;  %v3720_v1 = vadd.f32 %v3719_v24, %v3718_v9 }
 0x16c   : > { %v3655_v11 = vpop.f32.mrb[55].mxu1 }
 0x16d   : > { %v5123_v41 = vadd.f32 %v3653_v40, %v5077_v55  ;;  %v3656_v15 = vadd.f32 %v3655_v11, %v3654_v46  ;;  %v5126_v23 = vadd.f32 %v3720_v1, %v5029_v8 }
 0x16f   : > { %v5129_v43 = vadd.f32 %v3656_v15, %v5079_v21  ;;  %v3721_v33 = vpop.f32.mrb[56].mxu0 }
 0x170   : > { %v3722_v44 = vpop.f32.mrb[57].mxu0 }
 0x171   : > { %v3657_v53 = vpop.f32.mrb[56].mxu1  ;;  %v3723_v29 = vadd.f32 %v3722_v44, %v3721_v33  ;;  %v3724_v51 = vpop.f32.mrb[58].mxu0 }
 0x172   : > { %v3658_v62 = vpop.f32.mrb[57].mxu1  ;;  %v3725_v6 = vpop.f32.mrb[59].mxu0 }
 0x173   : > { %v3659_v2 = vadd.f32 %v3658_v62, %v3657_v53  ;;  %v3660_v52 = vpop.f32.mrb[58].mxu1  ;;  %v5132_v63 = vadd.f32 %v3723_v29, %v5041_v35  ;;  %v3726_v13 = vadd.f32 %v3725_v6, %v3724_v51 }
 0x174   : > { %v3661_v55 = vpop.f32.mrb[59].mxu1 }
 0x175   : > { %v5135_v8 = vadd.f32 %v3659_v2, %v5087_v0  ;;  %v3662_v56 = vadd.f32 %v3661_v55, %v3660_v52  ;;  %v5138_v21 = vadd.f32 %v3726_v13, %v5047_v17 }
 0x177   : > { %v5141_v54 = vadd.f32 %v3662_v56, %v5089_v12  ;;  %v3727_v25 = vpop.f32.mrb[60].mxu0 }
 0x178   : > { %v3728_v47 = vpop.f32.mrb[61].mxu0 }
 0x179   : > { %v3663_v31 = vpop.f32.mrb[60].mxu1  ;;  %v3729_v58 = vadd.f32 %v3728_v47, %v3727_v25  ;;  %v3730_v19 = vpop.f32.mrb[62].mxu0 }
 0x17a   : > { %v3664_v59 = vpop.f32.mrb[61].mxu1  ;;  %v3731_v28 = vpop.f32.mrb[63].mxu0 }
 0x17b   : > { %v3665_v35 = vadd.f32 %v3664_v59, %v3663_v31  ;;  %v3666_v61 = vpop.f32.mrb[62].mxu1  ;;  %v5144_v4 = vadd.f32 %v3729_v58, %v5056_v27  ;;  %v3732_v9 = vadd.f32 %v3731_v28, %v3730_v19 }
 0x17c   : > { %v3667_v0 = vpop.f32.mrb[63].mxu1 }
 0x17d   : > { %v5147_v17 = vadd.f32 %v3665_v35, %v5097_v30  ;;  %v3668_v40 = vadd.f32 %v3667_v0, %v3666_v61  ;;  %v5150_v12 = vadd.f32 %v3732_v9, %v5063_v14 }
 0x17f   : > { %v5153_v46 = vadd.f32 %v3668_v40, %v5099_v37  ;;  %v3733_v24 = vpop.f32.mrb[64].mxu0 }
 0x180   : > { %v3734_v1 = vpop.f32.mrb[65].mxu0 }
 0x181   : > { %v3669_v11 = vpop.f32.mrb[64].mxu1  ;;  %v3735_v33 = vadd.f32 %v3734_v1, %v3733_v24  ;;  %v3736_v53 = vpop.f32.mrb[66].mxu0 }
 0x182   : > { %v3670_v15 = vpop.f32.mrb[65].mxu1  ;;  %v3737_v62 = vpop.f32.mrb[67].mxu0 }
 0x183   : > { %v3671_v27 = vadd.f32 %v3670_v15, %v3669_v11  ;;  %v3672_v44 = vpop.f32.mrb[66].mxu1  ;;  %v5156_v29 = vadd.f32 %v3735_v33, %v5071_v22  ;;  %v3738_v51 = vadd.f32 %v3737_v62, %v3736_v53 }
 0x184   : > { %v3673_v30 = vpop.f32.mrb[67].mxu1 }
 0x185   : > { %v5159_v14 = vadd.f32 %v3671_v27, %v4939_v16  ;;  %v3674_v2 = vadd.f32 %v3673_v30, %v3672_v44  ;;  %v5162_v37 = vadd.f32 %v3738_v51, %v5075_v38 }
 0x187   : > { %v5165_v52 = vadd.f32 %v3674_v2, %v4945_v39  ;;  %v3739_v6 = vpop.f32.mrb[68].mxu0 }
 0x188   : > { %v3740_v13 = vpop.f32.mrb[69].mxu0 }
 0x189   : > { %v3675_v55 = vpop.f32.mrb[68].mxu1  ;;  %v3741_v25 = vadd.f32 %v3740_v13, %v3739_v6  ;;  %v3742_v31 = vpop.f32.mrb[70].mxu0 }
 0x18a   : > { %v3676_v56 = vpop.f32.mrb[69].mxu1  ;;  %v3743_v59 = vpop.f32.mrb[71].mxu0 }
 0x18b   : > { %v3677_v22 = vadd.f32 %v3676_v56, %v3675_v55  ;;  %v3678_v47 = vpop.f32.mrb[70].mxu1  ;;  %v5168_v58 = vadd.f32 %v3741_v25, %v5082_v5  ;;  %v3744_v19 = vadd.f32 %v3743_v59, %v3742_v31 }
 0x18c   : > { %v3679_v16 = vpop.f32.mrb[71].mxu1 }
 0x18d   : > { %v5171_v38 = vadd.f32 %v3677_v22, %v4962_v32  ;;  %v3680_v35 = vadd.f32 %v3679_v16, %v3678_v47  ;;  %v5174_v39 = vadd.f32 %v3744_v19, %v5085_v48 }
 0x18f   : > { %v5177_v61 = vadd.f32 %v3680_v35, %v4966_v20  ;;  %v3745_v28 = vpop.f32.mrb[72].mxu0 }
 0x190   : > { %v3746_v9 = vpop.f32.mrb[73].mxu0 }
 0x191   : > { %v3681_v0 = vpop.f32.mrb[72].mxu1  ;;  %v3747_v24 = vadd.f32 %v3746_v9, %v3745_v28  ;;  %v3748_v11 = vpop.f32.mrb[74].mxu0 }
 0x192   : > { %v3682_v40 = vpop.f32.mrb[73].mxu1  ;;  %v3749_v15 = vpop.f32.mrb[75].mxu0 }
 0x193   : > { %v3683_v5 = vadd.f32 %v3682_v40, %v3681_v0  ;;  %v3684_v1 = vpop.f32.mrb[74].mxu1  ;;  %v5180_v33 = vadd.f32 %v3747_v24, %v5092_v18  ;;  %v3750_v53 = vadd.f32 %v3749_v15, %v3748_v11 }
 0x194   : > { %v3685_v32 = vpop.f32.mrb[75].mxu1 }
 0x195   : > { %v5183_v48 = vadd.f32 %v3683_v5, %v4978_v10  ;;  %v3686_v27 = vadd.f32 %v3685_v32, %v3684_v1  ;;  %v5186_v20 = vadd.f32 %v3750_v53, %v5095_v36 }
 0x197   : > { %v5189_v44 = vadd.f32 %v3686_v27, %v4982_v7  ;;  %v3751_v62 = vpop.f32.mrb[76].mxu0 }
 0x198   : > { %v3752_v51 = vpop.f32.mrb[77].mxu0 }
 0x199   : > { %v3687_v30 = vpop.f32.mrb[76].mxu1  ;;  %v3753_v6 = vadd.f32 %v3752_v51, %v3751_v62  ;;  %v3754_v55 = vpop.f32.mrb[78].mxu0 }
 0x19a   : > { %v3688_v2 = vpop.f32.mrb[77].mxu1  ;;  %v3755_v56 = vpop.f32.mrb[79].mxu0 }
 0x19b   : > { %v3689_v18 = vadd.f32 %v3688_v2, %v3687_v30  ;;  %v3690_v13 = vpop.f32.mrb[78].mxu1  ;;  %v5192_v25 = vadd.f32 %v3753_v6, %v5102_v34  ;;  %v3756_v31 = vadd.f32 %v3755_v56, %v3754_v55 }
 0x19c   : > { %v3691_v10 = vpop.f32.mrb[79].mxu1 }
 0x19d   : > { %v5195_v36 = vadd.f32 %v3689_v18, %v4990_v26  ;;  %v3692_v22 = vadd.f32 %v3691_v10, %v3690_v13  ;;  %v5198_v7 = vadd.f32 %v3756_v31, %v5105_v45 }
 0x19f   : > { %v5201_v47 = vadd.f32 %v3692_v22, %v4994_v49  ;;  %v3757_v59 = vpop.f32.mrb[80].mxu0 }
 0x1a0   : > { %v3758_v19 = vpop.f32.mrb[81].mxu0 }
 0x1a1   : > { %v3821_v16 = vpop.f32.mrb[80].mxu1  ;;  %v3759_v35 = vadd.f32 %v3758_v19, %v3757_v59  ;;  %v3760_v0 = vpop.f32.mrb[82].mxu0 }
 0x1a2   : > { %v3822_v28 = vpop.f32.mrb[81].mxu1  ;;  %v3761_v40 = vpop.f32.mrb[83].mxu0 }
 0x1a3   : > { %v3823_v34 = vadd.f32 %v3822_v28, %v3821_v16  ;;  %v3824_v9 = vpop.f32.mrb[82].mxu1  ;;  %v5204_v24 = vadd.f32 %v3759_v35, %v5111_v3  ;;  %v3762_v26 = vadd.f32 %v3761_v40, %v3760_v0 }
 0x1a4   : > { %v3825_v11 = vpop.f32.mrb[83].mxu1 }
 0x1a5   : > { %v3826_v5 = vadd.f32 %v3825_v11, %v3824_v9  ;;  %v5207_v45 = vadd.f32 %v3823_v34, %v5108_v57  ;;  %v5210_v49 = vadd.f32 %v3762_v26, %v5117_v60 }
 0x1a7   : > { %v5213_v1 = vadd.f32 %v3826_v5, %v5114_v50  ;;  %v3763_v15 = vpop.f32.mrb[84].mxu0 }
 0x1a8   : > { %v3764_v53 = vpop.f32.mrb[85].mxu0 }
 0x1a9   : > { %v3827_v32 = vpop.f32.mrb[84].mxu1  ;;  %v3765_v27 = vadd.f32 %v3764_v53, %v3763_v15  ;;  %v3766_v30 = vpop.f32.mrb[86].mxu0 }
 0x1aa   : > { %v3828_v62 = vpop.f32.mrb[85].mxu1  ;;  %v3767_v2 = vpop.f32.mrb[87].mxu0 }
 0x1ab   : > { %v3829_v3 = vadd.f32 %v3828_v62, %v3827_v32  ;;  %v3830_v51 = vpop.f32.mrb[86].mxu1  ;;  %v5216_v6 = vadd.f32 %v3765_v27, %v5123_v41  ;;  %v3768_v57 = vadd.f32 %v3767_v2, %v3766_v30 }
 0x1ac   : > { %v3831_v55 = vpop.f32.mrb[87].mxu1 }
 0x1ad   : > { %v3832_v18 = vadd.f32 %v3831_v55, %v3830_v51  ;;  %v5219_v60 = vadd.f32 %v3829_v3, %v5120_v42  ;;  %v5222_v50 = vadd.f32 %v3768_v57, %v5129_v43 }
 0x1af   : > { %v5225_v13 = vadd.f32 %v3832_v18, %v5126_v23  ;;  %v3769_v56 = vpop.f32.mrb[88].mxu0 }
 0x1b0   : > { %v3770_v31 = vpop.f32.mrb[89].mxu0 }
 0x1b1   : > { %v3833_v10 = vpop.f32.mrb[88].mxu1  ;;  %v3771_v22 = vadd.f32 %v3770_v31, %v3769_v56  ;;  %v3772_v16 = vpop.f32.mrb[90].mxu0 }
 0x1b2   : > { %v3834_v59 = vpop.f32.mrb[89].mxu1  ;;  %v3773_v35 = vpop.f32.mrb[91].mxu0 }
 0x1b3   : > { %v3835_v41 = vadd.f32 %v3834_v59, %v3833_v10  ;;  %v3836_v19 = vpop.f32.mrb[90].mxu1  ;;  %v5228_v28 = vadd.f32 %v3771_v22, %v5135_v8  ;;  %v3774_v42 = vadd.f32 %v3773_v35, %v3772_v16 }
 0x1b4   : > { %v3837_v0 = vpop.f32.mrb[91].mxu1 }
 0x1b5   : > { %v3838_v34 = vadd.f32 %v3837_v0, %v3836_v19  ;;  %v5231_v43 = vadd.f32 %v3835_v41, %v5132_v63  ;;  %v5234_v23 = vadd.f32 %v3774_v42, %v5141_v54 }
 0x1b7   : > { %v5237_v9 = vadd.f32 %v3838_v34, %v5138_v21  ;;  %v3775_v40 = vpop.f32.mrb[92].mxu0 }
 0x1b8   : > { %v3776_v11 = vpop.f32.mrb[93].mxu0 }
 0x1b9   : > { %v3839_v26 = vpop.f32.mrb[92].mxu1  ;;  %v3777_v5 = vadd.f32 %v3776_v11, %v3775_v40  ;;  %v3778_v32 = vpop.f32.mrb[94].mxu0 }
 0x1ba   : > { %v3840_v15 = vpop.f32.mrb[93].mxu1  ;;  %v3779_v27 = vpop.f32.mrb[95].mxu0 }
 0x1bb   : > { %v3841_v8 = vadd.f32 %v3840_v15, %v3839_v26  ;;  %v3842_v53 = vpop.f32.mrb[94].mxu1  ;;  %v5240_v62 = vadd.f32 %v3777_v5, %v5147_v17  ;;  %v3780_v63 = vadd.f32 %v3779_v27, %v3778_v32 }
 0x1bc   : > { %v3843_v30 = vpop.f32.mrb[95].mxu1 }
 0x1bd   : > { %v3844_v3 = vadd.f32 %v3843_v30, %v3842_v53  ;;  %v5243_v54 = vadd.f32 %v3841_v8, %v5144_v4  ;;  %v5246_v21 = vadd.f32 %v3780_v63, %v5153_v46 }
 0x1bf   : > { %v5249_v51 = vadd.f32 %v3844_v3, %v5150_v12  ;;  %v3781_v2 = vpop.f32.mrb[96].mxu0 }
 0x1c0   : > { %v3782_v55 = vpop.f32.mrb[97].mxu0 }
 0x1c1   : > { %v3845_v57 = vpop.f32.mrb[96].mxu1  ;;  %v3783_v18 = vadd.f32 %v3782_v55, %v3781_v2  ;;  %v3784_v10 = vpop.f32.mrb[98].mxu0 }
 0x1c2   : > { %v3846_v56 = vpop.f32.mrb[97].mxu1  ;;  %v3785_v22 = vpop.f32.mrb[99].mxu0 }
 0x1c3   : > { %v3847_v17 = vadd.f32 %v3846_v56, %v3845_v57  ;;  %v3848_v31 = vpop.f32.mrb[98].mxu1  ;;  %v5252_v59 = vadd.f32 %v3783_v18, %v5159_v14  ;;  %v3786_v4 = vadd.f32 %v3785_v22, %v3784_v10 }
 0x1c4   : > { %v3849_v16 = vpop.f32.mrb[99].mxu1 }
 0x1c5   : > { %v3850_v41 = vadd.f32 %v3849_v16, %v3848_v31  ;;  %v5255_v46 = vadd.f32 %v3847_v17, %v5156_v29  ;;  %v5258_v12 = vadd.f32 %v3786_v4, %v5165_v52 }
 0x1c7   : > { %v5261_v19 = vadd.f32 %v3850_v41, %v5162_v37  ;;  %v3787_v35 = vpop.f32.mrb[100].mxu0 }
 0x1c8   : > { %v3788_v0 = vpop.f32.mrb[101].mxu0 }
 0x1c9   : > { %v3851_v42 = vpop.f32.mrb[100].mxu1  ;;  %v3789_v34 = vadd.f32 %v3788_v0, %v3787_v35  ;;  %v3790_v26 = vpop.f32.mrb[102].mxu0 }
 0x1ca   : > { %v3852_v40 = vpop.f32.mrb[101].mxu1  ;;  %v3791_v5 = vpop.f32.mrb[103].mxu0 }
 0x1cb   : > { %v3853_v14 = vadd.f32 %v3852_v40, %v3851_v42  ;;  %v3854_v11 = vpop.f32.mrb[102].mxu1  ;;  %v5264_v15 = vadd.f32 %v3789_v34, %v5171_v38  ;;  %v3792_v29 = vadd.f32 %v3791_v5, %v3790_v26 }
 0x1cc   : > { %v3855_v32 = vpop.f32.mrb[103].mxu1 }
 0x1cd   : > { %v3856_v8 = vadd.f32 %v3855_v32, %v3854_v11  ;;  %v5267_v52 = vadd.f32 %v3853_v14, %v5168_v58  ;;  %v5270_v37 = vadd.f32 %v3792_v29, %v5177_v61 }
 0x1cf   : > { %v5273_v53 = vadd.f32 %v3856_v8, %v5174_v39  ;;  %v3793_v27 = vpop.f32.mrb[104].mxu0 }
 0x1d0   : > { %v3794_v30 = vpop.f32.mrb[105].mxu0 }
 0x1d1   : > { %v3857_v63 = vpop.f32.mrb[104].mxu1  ;;  %v3795_v3 = vadd.f32 %v3794_v30, %v3793_v27  ;;  %v3796_v57 = vpop.f32.mrb[106].mxu0 }
 0x1d2   : > { %v3858_v2 = vpop.f32.mrb[105].mxu1  ;;  %v3797_v18 = vpop.f32.mrb[107].mxu0 }
 0x1d3   : > { %v3859_v38 = vadd.f32 %v3858_v2, %v3857_v63  ;;  %v3860_v55 = vpop.f32.mrb[106].mxu1  ;;  %v5276_v56 = vadd.f32 %v3795_v3, %v5183_v48  ;;  %v3798_v58 = vadd.f32 %v3797_v18, %v3796_v57 }
 0x1d4   : > { %v3861_v10 = vpop.f32.mrb[107].mxu1 }
 0x1d5   : > { %v3862_v17 = vadd.f32 %v3861_v10, %v3860_v55  ;;  %v5279_v61 = vadd.f32 %v3859_v38, %v5180_v33  ;;  %v5282_v39 = vadd.f32 %v3798_v58, %v5189_v44 }
 0x1d7   : > { %v5285_v31 = vadd.f32 %v3862_v17, %v5186_v20  ;;  %v3799_v22 = vpop.f32.mrb[108].mxu0 }
 0x1d8   : > { %v3800_v16 = vpop.f32.mrb[109].mxu0 }
 0x1d9   : > { %v3863_v4 = vpop.f32.mrb[108].mxu1  ;;  %v3801_v41 = vadd.f32 %v3800_v16, %v3799_v22  ;;  %v3802_v42 = vpop.f32.mrb[110].mxu0 }
 0x1da   : > { %v3864_v35 = vpop.f32.mrb[109].mxu1  ;;  %v3803_v34 = vpop.f32.mrb[111].mxu0 }
 0x1db   : > { %v3865_v48 = vadd.f32 %v3864_v35, %v3863_v4  ;;  %v3866_v0 = vpop.f32.mrb[110].mxu1  ;;  %v5288_v40 = vadd.f32 %v3801_v41, %v5195_v36  ;;  %v3804_v33 = vadd.f32 %v3803_v34, %v3802_v42 }
 0x1dc   : > { %v3867_v26 = vpop.f32.mrb[111].mxu1 }
 0x1dd   : > { %v3868_v44 = vadd.f32 %v3867_v26, %v3866_v0  ;;  %v5291_v14 = vadd.f32 %v3865_v48, %v5192_v25  ;;  %v5294_v20 = vadd.f32 %v3804_v33, %v5201_v47 }
 0x1df   : > { %v5297_v11 = vadd.f32 %v3868_v44, %v5198_v7  ;;  %v3959_v5 = vpop.f32.mrb[112].mxu0 }
 0x1e0   : > { %v2650_v32 = vadd.f32 %v3959_v5, %v5219_v60  ;;  %v2521_v8 = vpop.f32.mrb[113].mxu0 }
 0x1e1   : > { %v3869_v29 = vpop.f32.mrb[112].mxu1  ;;  %v2648_v27 = vadd.f32 %v2521_v8, %v5207_v45  ;;  %v3960_v63 = vpop.f32.mrb[114].mxu0 }
 0x1e2   : > { %v3870_v36 = vpop.f32.mrb[113].mxu1  ;;  %v2651_v25 = vadd.f32 %v3960_v63, %v5225_v13  ;;  %v2524_v2 = vpop.f32.mrb[115].mxu0  ;;  %v2880_v10 = vmul.f32 %v2650_v32, %v2650_v32 }
 0x1e3   : > { %v3871_v30 = vadd.f32 %v3870_v36, %v3869_v29  ;;  %v3872_v3 = vpop.f32.mrb[114].mxu1  ;;  %v2649_v47 = vadd.f32 %v2524_v2, %v5213_v1  ;;  %v2878_v38 = vmul.f32 %v2648_v27, %v2648_v27 }
 0x1e4   : > { %v3873_v7 = vpop.f32.mrb[115].mxu1  ;;  %v3366_v60 = vpack.c.bf16 %v2651_v25, %v2650_v32  ;;  %v2881_v35 = vmul.f32 %v2651_v25, %v2651_v25 }
 0x1e5   : > { %v3874_v57 = vadd.f32 %v3873_v7, %v3872_v3  ;;  %v5310_v45 = vadd.f32 %v3871_v30, %v5204_v24  ;;  %v3361_v55 = vpack.c.bf16 %v2649_v47, %v2648_v27  ;;  %v2840_v18 = vadd.f32 %v2649_v47, %v2648_v27 }
 0x1e6   : > { %v2879_v13 = vmul.f32 %v2649_v47, %v2649_v47  ;;  %3454 = vst [vmem:[%s5306_s19 + $0x8] sm:$0xff] %v3366_v60  }
 0x1e7   : > { %v5314_v58 = vadd.f32 %v3874_v57, %v5210_v49  ;;  %3362 = vst [vmem:[%s5306_s19] sm:$0xff] %v3361_v55   ;;  %v2841_v17 = vadd.f32 %v2840_v18, %v2650_v32  ;;  %v3963_v4 = vpop.f32.mrb[116].mxu0 }
 0x1e8   : > { %v2910_v22 = vadd.f32 %v2879_v13, %v2878_v38  ;;  %v2654_v1 = vadd.f32 %v3963_v4, %v5243_v54  ;;  %v2537_v41 = vpop.f32.mrb[117].mxu0 }
 0x1e9   : > { %v3875_v16 = vpop.f32.mrb[116].mxu1  ;;  %v2652_v48 = vadd.f32 %v2537_v41, %v5231_v43  ;;  %v2842_v0 = vadd.f32 %v2841_v17, %v2651_v25  ;;  %v3964_v34 = vpop.f32.mrb[118].mxu0 }
 0x1ea   : > { %v2911_v24 = vadd.f32 %v2910_v22, %v2880_v10  ;;  %v3876_v42 = vpop.f32.mrb[117].mxu1  ;;  %v2655_v26 = vadd.f32 %v3964_v34, %v5249_v51  ;;  %v2540_v44 = vpop.f32.mrb[119].mxu0  ;;  %v2884_v2 = vmul.f32 %v2654_v1, %v2654_v1 }
 0x1eb   : > { %v3877_v33 = vadd.f32 %v3876_v42, %v3875_v16  ;;  %v3878_v49 = vpop.f32.mrb[118].mxu1  ;;  %v2843_v5 = vadd.f32 %v2842_v0, %v2652_v48  ;;  %v2882_v29 = vmul.f32 %v2652_v48, %v2652_v48  ;;  %v2653_v54 = vadd.f32 %v2540_v44, %v5237_v9 }
 0x1ec   : > { %v2912_v32 = vadd.f32 %v2911_v24, %v2881_v35  ;;  %v3879_v8 = vpop.f32.mrb[119].mxu1  ;;  %v3376_v36 = vpack.c.bf16 %v2655_v26, %v2654_v1  ;;  %v2885_v55 = vmul.f32 %v2655_v26, %v2655_v26 }
 0x1ed   : > { %v3880_v27 = vadd.f32 %v3879_v8, %v3878_v49  ;;  %v5322_v63 = vadd.f32 %v3877_v33, %v5216_v6  ;;  %v3371_v30 = vpack.c.bf16 %v2653_v54, %v2652_v48  ;;  %v2844_v3 = vadd.f32 %v2843_v5, %v2653_v54 }
 0x1ee   : > { %v2913_v43 = vadd.f32 %v2912_v32, %v2882_v29  ;;  %v2883_v25 = vmul.f32 %v2653_v54, %v2653_v54  ;;  %3456 = vst [vmem:[%s5306_s19 + $0x18] sm:$0xff] %v3376_v36  }
 0x1ef   : > { %v5326_v51 = vadd.f32 %v3880_v27, %v5222_v50  ;;  %3455 = vst [vmem:[%s5306_s19 + $0x10] sm:$0xff] %v3371_v30   ;;  %v2845_v7 = vadd.f32 %v2844_v3, %v2654_v1  ;;  %v3967_v60 = vpop.f32.mrb[120].mxu0 }
 0x1f0   : > { %v2914_v47 = vadd.f32 %v2913_v43, %v2883_v25  ;;  %v2658_v9 = vadd.f32 %v3967_v60, %v5267_v52  ;;  %v2553_v38 = vpop.f32.mrb[121].mxu0 }
 0x1f1   : > { %v3881_v57 = vpop.f32.mrb[120].mxu1  ;;  %v2656_v13 = vadd.f32 %v2553_v38, %v5255_v46  ;;  %v2846_v10 = vadd.f32 %v2845_v7, %v2655_v26  ;;  %v3968_v17 = vpop.f32.mrb[122].mxu0 }
 0x1f2   : > { %v2915_v6 = vadd.f32 %v2914_v47, %v2884_v2  ;;  %v3882_v18 = vpop.f32.mrb[121].mxu1  ;;  %v2659_v4 = vadd.f32 %v3968_v17, %v5273_v53  ;;  %v2556_v16 = vpop.f32.mrb[123].mxu0  ;;  %v2888_v26 = vmul.f32 %v2658_v9, %v2658_v9 }
 0x1f3   : > { %v3883_v22 = vadd.f32 %v3882_v18, %v3881_v57  ;;  %v3884_v50 = vpop.f32.mrb[122].mxu1  ;;  %v2847_v1 = vadd.f32 %v2846_v10, %v2656_v13  ;;  %v2886_v41 = vmul.f32 %v2656_v13, %v2656_v13  ;;  %v2657_v52 = vadd.f32 %v2556_v16, %v5261_v19 }
 0x1f4   : > { %v2916_v35 = vadd.f32 %v2915_v6, %v2885_v55  ;;  %v3885_v24 = vpop.f32.mrb[123].mxu1  ;;  %v3386_v42 = vpack.c.bf16 %v2659_v4, %v2658_v9  ;;  %v2889_v54 = vmul.f32 %v2659_v4, %v2659_v4 }
 0x1f5   : > { %v3886_v48 = vadd.f32 %v3885_v24, %v3884_v50  ;;  %v5334_v0 = vadd.f32 %v3883_v22, %v5228_v28  ;;  %v3381_v34 = vpack.c.bf16 %v2657_v52, %v2656_v13  ;;  %v2848_v33 = vadd.f32 %v2847_v1, %v2657_v52 }
 0x1f6   : > { %v2917_v46 = vadd.f32 %v2916_v35, %v2886_v41  ;;  %v2887_v49 = vmul.f32 %v2657_v52, %v2657_v52  ;;  %3458 = vst [vmem:[%s5306_s19 + $0x28] sm:$0xff] %v3386_v42  }
 0x1f7   : > { %v5338_v53 = vadd.f32 %v3886_v48, %v5234_v23  ;;  %3457 = vst [vmem:[%s5306_s19 + $0x20] sm:$0xff] %v3381_v34   ;;  %v2849_v44 = vadd.f32 %v2848_v33, %v2658_v9  ;;  %v3971_v29 = vpop.f32.mrb[124].mxu0 }
 0x1f8   : > { %v2918_v5 = vadd.f32 %v2917_v46, %v2887_v49  ;;  %v2662_v19 = vadd.f32 %v3971_v29, %v5291_v14  ;;  %v2569_v8 = vpop.f32.mrb[125].mxu0 }
 0x1f9   : > { %v3887_v32 = vpop.f32.mrb[124].mxu1  ;;  %v2660_v27 = vadd.f32 %v2569_v8, %v5279_v61  ;;  %v2850_v43 = vadd.f32 %v2849_v44, %v2659_v4  ;;  %v3972_v30 = vpop.f32.mrb[126].mxu0 }
 0x1fa   : > { %v2919_v28 = vadd.f32 %v2918_v5, %v2888_v26  ;;  %v3888_v36 = vpop.f32.mrb[125].mxu1  ;;  %v2663_v25 = vadd.f32 %v3972_v30, %v5297_v11  ;;  %v2572_v2 = vpop.f32.mrb[127].mxu0  ;;  %v2892_v11 = vmul.f32 %v2662_v19, %v2662_v19 }
 0x1fb   : > { %v3889_v3 = vadd.f32 %v3888_v36, %v3887_v32  ;;  %v3890_v23 = vpop.f32.mrb[126].mxu1  ;;  %v2851_v7 = vadd.f32 %v2850_v43, %v2660_v27  ;;  %v2890_v47 = vmul.f32 %v2660_v27, %v2660_v27  ;;  %v2661_v14 = vadd.f32 %v2572_v2, %v5285_v31 }
 0x1fc   : > { %v2920_v60 = vadd.f32 %v2919_v28, %v2889_v54  ;;  %v3891_v57 = vpop.f32.mrb[127].mxu1  ;;  %v3396_v9 = vpack.c.bf16 %v2663_v25, %v2662_v19  ;;  %v2893_v1 = vmul.f32 %v2663_v25, %v2663_v25 }
 0x1fd   : > { %v3892_v38 = vadd.f32 %v3891_v57, %v3890_v23  ;;  %v2413_v55 = vadd.f32 %v3889_v3, %v5240_v62  ;;  %v3391_v6 = vpack.c.bf16 %v2661_v14, %v2660_v27  ;;  %v2852_v18 = vadd.f32 %v2851_v7, %v2661_v14 }
 0x1fe   : > { %v2921_v61 = vadd.f32 %v2920_v60, %v2890_v47  ;;  %v2891_v13 = vmul.f32 %v2661_v14, %v2661_v14  ;;  %3460 = vst [vmem:[%s5306_s19 + $0x38] sm:$0xff] %v3396_v9  }
 0x1ff   : > { %v2414_v10 = vadd.f32 %v3892_v38, %v5246_v21  ;;  %3459 = vst [vmem:[%s5306_s19 + $0x30] sm:$0xff] %v3391_v6   ;;  %v2853_v17 = vadd.f32 %v2852_v18, %v2662_v19  ;;  %v3975_v50 = vpop.f32.mrb[128].mxu0 }
 0x200   : > { %v2922_v22 = vadd.f32 %v2921_v61, %v2891_v13  ;;  %v2666_v16 = vadd.f32 %v3975_v50, %v5322_v63  ;;  %v2585_v31 = vpop.f32.mrb[129].mxu0 }
 0x201   : > { %v3893_v4 = vpop.f32.mrb[128].mxu1  ;;  %v2664_v62 = vadd.f32 %v2585_v31, %v5310_v45  ;;  %v2854_v24 = vadd.f32 %v2853_v17, %v2663_v25  ;;  %v3976_v52 = vpop.f32.mrb[130].mxu0 }
 0x202   : > { %v2923_v41 = vadd.f32 %v2922_v22, %v2892_v11  ;;  %v3894_v35 = vpop.f32.mrb[129].mxu1  ;;  %v2667_v21 = vadd.f32 %v3976_v52, %v5326_v51  ;;  %v2588_v46 = vpop.f32.mrb[131].mxu0  ;;  %v2896_v51 = vmul.f32 %v2666_v16, %v2666_v16 }
 0x203   : > { %v3895_v42 = vadd.f32 %v3894_v35, %v3893_v4  ;;  %v3896_v48 = vpop.f32.mrb[130].mxu1  ;;  %v2855_v34 = vadd.f32 %v2854_v24, %v2664_v62  ;;  %v2894_v33 = vmul.f32 %v2664_v62, %v2664_v62  ;;  %v2665_v63 = vadd.f32 %v2588_v46, %v5314_v58 }
 0x204   : > { %v2924_v49 = vadd.f32 %v2923_v41, %v2893_v1  ;;  %v3897_v26 = vpop.f32.mrb[131].mxu1  ;;  %v3406_v44 = vpack.c.bf16 %v2667_v21, %v2666_v16  ;;  %v2897_v58 = vmul.f32 %v2667_v21, %v2667_v21 }
 0x205   : > { %v3898_v5 = vadd.f32 %v3897_v26, %v3896_v48  ;;  %v2415_v29 = vadd.f32 %v3895_v42, %v5252_v59  ;;  %v3401_v32 = vpack.c.bf16 %v2665_v63, %v2664_v62  ;;  %v2856_v19 = vadd.f32 %v2855_v34, %v2665_v63 }
 0x206   : > { %v2925_v45 = vadd.f32 %v2924_v49, %v2894_v33  ;;  %v2895_v8 = vmul.f32 %v2665_v63, %v2665_v63  ;;  %3462 = vst [vmem:[%s5306_s19 + $0x48] sm:$0xff] %v3406_v44  }
 0x207   : > { %v2416_v54 = vadd.f32 %v3898_v5, %v5258_v12  ;;  %3461 = vst [vmem:[%s5306_s19 + $0x40] sm:$0xff] %v3401_v32   ;;  %v2857_v28 = vadd.f32 %v2856_v19, %v2666_v16  ;;  %v3979_v27 = vpop.f32.mrb[132].mxu0 }
 0x208   : > { %v2926_v36 = vadd.f32 %v2925_v45, %v2895_v8  ;;  %v2670_v30 = vadd.f32 %v3979_v27, %v2413_v55  ;;  %v2601_v3 = vpop.f32.mrb[133].mxu0 }
 0x209   : > { %v3899_v43 = vpop.f32.mrb[132].mxu1  ;;  %v2668_v59 = vadd.f32 %v2601_v3, %v5334_v0  ;;  %v2858_v2 = vadd.f32 %v2857_v28, %v2667_v21  ;;  %v3980_v7 = vpop.f32.mrb[134].mxu0 }
 0x20a   : > { %v2927_v23 = vadd.f32 %v2926_v36, %v2896_v51  ;;  %v3900_v25 = vpop.f32.mrb[133].mxu1  ;;  %v2671_v57 = vadd.f32 %v3980_v7, %v2414_v10  ;;  %v2604_v12 = vpop.f32.mrb[135].mxu0  ;;  %v2900_v10 = vmul.f32 %v2670_v30, %v2670_v30 }
 0x20b   : > { %v3901_v47 = vadd.f32 %v3900_v25, %v3899_v43  ;;  %v3902_v60 = vpop.f32.mrb[134].mxu1  ;;  %v2859_v14 = vadd.f32 %v2858_v2, %v2668_v59  ;;  %v2898_v9 = vmul.f32 %v2668_v59, %v2668_v59  ;;  %v2669_v55 = vadd.f32 %v2604_v12, %v5338_v53 }
 0x20c   : > { %v2928_v38 = vadd.f32 %v2927_v23, %v2897_v58  ;;  %v3903_v61 = vpop.f32.mrb[135].mxu1  ;;  %v3416_v6 = vpack.c.bf16 %v2671_v57, %v2670_v30  ;;  %v2901_v53 = vmul.f32 %v2671_v57, %v2671_v57 }
 0x20d   : > { %v3904_v18 = vadd.f32 %v3903_v61, %v3902_v60  ;;  %v2417_v13 = vadd.f32 %v3901_v47, %v5264_v15  ;;  %v3411_v0 = vpack.c.bf16 %v2669_v55, %v2668_v59  ;;  %v2860_v17 = vadd.f32 %v2859_v14, %v2669_v55 }
 0x20e   : > { %v2929_v11 = vadd.f32 %v2928_v38, %v2898_v9  ;;  %v2899_v22 = vmul.f32 %v2669_v55, %v2669_v55  ;;  %3464 = vst [vmem:[%s5306_s19 + $0x58] sm:$0xff] %v3416_v6  }
 0x20f   : > { %v2418_v50 = vadd.f32 %v3904_v18, %v5270_v37  ;;  %3463 = vst [vmem:[%s5306_s19 + $0x50] sm:$0xff] %v3411_v0   ;;  %v2861_v4 = vadd.f32 %v2860_v17, %v2670_v30  ;;  %v3983_v31 = vpop.f32.mrb[136].mxu0 }
 0x210   : > { %v2930_v16 = vadd.f32 %v2929_v11, %v2899_v22  ;;  %v2674_v41 = vadd.f32 %v3983_v31, %v2417_v13  ;;  %v2617_v35 = vpop.f32.mrb[137].mxu0 }
 0x211   : > { %v3905_v1 = vpop.f32.mrb[136].mxu1  ;;  %v2672_v52 = vadd.f32 %v2617_v35, %v2415_v29  ;;  %v2862_v15 = vadd.f32 %v2861_v4, %v2671_v57  ;;  %v3984_v42 = vpop.f32.mrb[138].mxu0 }
 0x212   : > { %v2931_v62 = vadd.f32 %v2930_v16, %v2900_v10  ;;  %v3906_v24 = vpop.f32.mrb[137].mxu1  ;;  %v2675_v46 = vadd.f32 %v3984_v42, %v2418_v50  ;;  %v2620_v34 = vpop.f32.mrb[139].mxu0  ;;  %v2904_v28 = vmul.f32 %v2674_v41, %v2674_v41 }
 0x213   : > { %v3907_v48 = vadd.f32 %v3906_v24, %v3905_v1  ;;  %v3908_v21 = vpop.f32.mrb[138].mxu1  ;;  %v2863_v37 = vadd.f32 %v2862_v15, %v2672_v52  ;;  %v2902_v33 = vmul.f32 %v2672_v52, %v2672_v52  ;;  %v2673_v63 = vadd.f32 %v2620_v34, %v2416_v54 }
 0x214   : > { %v2932_v49 = vadd.f32 %v2931_v62, %v2901_v53  ;;  %v3909_v26 = vpop.f32.mrb[139].mxu1  ;;  %v3426_v44 = vpack.c.bf16 %v2675_v46, %v2674_v41  ;;  %v2905_v58 = vmul.f32 %v2675_v46, %v2675_v46 }
 0x215   : > { %v3910_v5 = vadd.f32 %v3909_v26, %v3908_v21  ;;  %v2419_v45 = vadd.f32 %v3907_v48, %v5276_v56  ;;  %v3421_v19 = vpack.c.bf16 %v2673_v63, %v2672_v52  ;;  %v2864_v29 = vadd.f32 %v2863_v37, %v2673_v63 }
 0x216   : > { %v2933_v32 = vadd.f32 %v2932_v49, %v2902_v33  ;;  %v2903_v8 = vmul.f32 %v2673_v63, %v2673_v63  ;;  %3466 = vst [vmem:[%s5306_s19 + $0x68] sm:$0xff] %v3426_v44  }
 0x217   : > { %v2420_v51 = vadd.f32 %v3910_v5, %v5282_v39  ;;  %3465 = vst [vmem:[%s5306_s19 + $0x60] sm:$0xff] %v3421_v19   ;;  %v2865_v36 = vadd.f32 %v2864_v29, %v2674_v41  ;;  %v3987_v43 = vpop.f32.mrb[140].mxu0 }
 0x218   : > { %v2934_v27 = vadd.f32 %v2933_v32, %v2903_v8  ;;  %v2633_v3 = vpop.f32.mrb[141].mxu0 }
 0x219   : > { %v3911_v30 = vpop.f32.mrb[140].mxu1  ;;  %v2676_v25 = vadd.f32 %v2633_v3, %v2419_v45  ;;  %v2866_v59 = vadd.f32 %v2865_v36, %v2675_v46  ;;  %v3988_v56 = vpop.f32.mrb[142].mxu0 }
 0x21a   : > { %v2935_v54 = vadd.f32 %v2934_v27, %v2904_v28  ;;  %v3912_v23 = vpop.f32.mrb[141].mxu1  ;;  %v2636_v47 = vpop.f32.mrb[143].mxu0 }
 0x21b   : > { %v3913_v2 = vadd.f32 %v3912_v23, %v3911_v30  ;;  %v3914_v7 = vpop.f32.mrb[142].mxu1  ;;  %v2867_v60 = vadd.f32 %v2866_v59, %v2676_v25  ;;  %v2906_v57 = vmul.f32 %v2676_v25, %v2676_v25  ;;  %v2677_v14 = vadd.f32 %v2636_v47, %v2420_v51 }
 0x21c   : > { %v2936_v39 = vadd.f32 %v2935_v54, %v2905_v58  ;;  %v3915_v12 = vpop.f32.mrb[143].mxu1 }
 0x21d   : > { %v2421_v9 = vadd.f32 %v3913_v2, %v5288_v40  ;;  %v3916_v38 = vadd.f32 %v3915_v12, %v3914_v7  ;;  %v3431_v55 = vpack.c.bf16 %v2677_v14, %v2676_v25  ;;  %v2868_v6 = vadd.f32 %v2867_v60, %v2677_v14 }
 0x21e   : > { %v2937_v61 = vadd.f32 %v2936_v39, %v2906_v57  ;;  %v2907_v18 = vmul.f32 %v2677_v14, %v2677_v14 }
 0x21f   : > { %v2678_v13 = vadd.f32 %v3987_v43, %v2421_v9  ;;  %v2422_v11 = vadd.f32 %v3916_v38, %v5294_v20  ;;  %3467 = vst [vmem:[%s5306_s19 + $0x70] sm:$0xff] %v3431_v55  }
 0x220   : > { %v2938_v0 = vadd.f32 %v2937_v61, %v2907_v18 }
 0x221   : > { %v2908_v17 = vmul.f32 %v2678_v13, %v2678_v13  ;;  %v2679_v22 = vadd.f32 %v3988_v56, %v2422_v11  ;;  %v2869_v50 = vadd.f32 %v2868_v6, %v2678_v13 }
 0x223   : > { %v3436_v10 = vpack.c.bf16 %v2679_v22, %v2678_v13  ;;  %v2909_v4 = vmul.f32 %v2679_v22, %v2679_v22  ;;  %v2870_v16 = vadd.f32 %v2869_v50, %v2679_v22  ;;  %v2939_v31 = vadd.f32 %v2938_v0, %v2908_v17 }
 0x225   : > { %3468 = vst [vmem:[%s5306_s19 + $0x78] sm:$0xff] %v3436_v10   ;;  %v2871_v40 = vrot.slane %v2870_v16, 4  ;;  %v2940_v1 = vadd.f32 %v2939_v31, %v2909_v4 }
 0x227   : > { %v2872_v41 = vadd.f32 %v2871_v40, %v2870_v16  ;;  %v2941_v35 = vrot.slane %v2940_v1, 4 }
 0x229   : > { %v2873_v53 = vrot.slane %v2872_v41, 2  ;;  %v2942_v62 = vadd.f32 %v2941_v35, %v2940_v1 }
 0x22b   : > { %v2874_v24 = vadd.f32 %v2873_v53, %v2872_v41  ;;  %v2943_v20 = vrot.slane %v2942_v62, 2 }
 0x22d   : > { %v2875_v52 = vrot.slane %v2874_v24, 1  ;;  %v2944_v15 = vadd.f32 %v2943_v20, %v2942_v62 }
 0x22f   : > { %v2876_v42 = vadd.f32 %v2875_v52, %v2874_v24  ;;  %v2945_v48 = vrot.slane %v2944_v15, 1 }
 0x231   : > { %2877 = vst [vmem:[%s438_s27] sm:$0x1] %v2876_v42  ;;  %v2946_v21 = vadd.f32 %v2945_v48, %v2944_v15 }
 0x233   : > { %2947 = vst [vmem:[%s438_s27 + $0x1] sm:$0x1] %v2946_v21 }
 0x234 PF: > { %s17_s23 = sadd.s32 1, %s4125_s23   ;;  %s5393_s21 = smov %s4121_s22 }
 0x235   : > { %p14_p5 = scmp.ge.s32.totalorder %s17_s23, 4   ;;  %s5394_s22 = smov %s5396_s24 }
 0x237   :  { %16 = sbr.rel (!%p14_p5) target bundleno = 2 (0x2), region = 88 }

</bundles_post_ra>
